<compile_context>
chip_gen: v5e
topology: v5e:2x2
jax: 0.10.0
libtpu: 0.0.40
codegen_flags: <defaults>
</compile_context>

<pallas_src>
import functools
import math

import jax
import jax.numpy as jnp
import numpy as np
from jax.experimental import pallas as pl
from jax.experimental.pallas import tpu as pltpu

LOG_2PI = float(np.log(2.0 * np.pi))


def vrnn_kernel(y_ref, eps_ref, w_pre_ref, wh_ref, w_ep_ref, wz_ref, w_dec_ref,
                b_ref, loss_ref, pre_ref, *, steps, B, Y, Z, H, R):
    f32, bf16 = jnp.float32, jnp.bfloat16
    W = 3 * H + 3 * R            # packed pre / h-projection width
    SB = steps * B

    def mm(a, w):                # MXU: bf16 x bf16 -> f32 accumulation
        return jnp.dot(a.astype(bf16), w, preferred_element_type=f32)

    # ---- hoisted packed weights (bf16, resident across the unrolled loop) ----
    w_pre = w_pre_ref[...]                        # (2Y, W): rows [x | y_prev]
    wh_all = wh_ref[...]                          # (R, W):  [enc_h|pri_h|dec_h|gru_whh]
    w_ep = w_ep_ref[...]                          # (2H, 2H+4Z)
    w_ep2 = w_ep[:, 0:2 * H]                      # blockdiag(enc2_w, pri2_w)
    w_ep_head = w_ep[:, 2 * H:2 * H + 4 * Z]      # blockdiag enc/pri mean|std heads
    wz = wz_ref[...]                              # (Z, H+3R): [dec1_wz | gru_wih_z]
    w_dec = w_dec_ref[...]                        # (H, H+2Y): [dec2_w | decm_w|decs_w]
    w_dec2 = w_dec[:, 0:H]
    w_dec_head = w_dec[:, H:H + 2 * Y]

    # ---- hoisted bias broadcasts (f32; JAX does not CSE broadcast_in_dim) ----
    b = b_ref[...]                                # (6, W)
    b_pre = b[0:1, :]                             # [enc1_b|pri1_b|dec1_b|gru_bih]
    bhh_b = jnp.broadcast_to(b[1:2, 0:3 * R], (B, 3 * R))        # gru_bhh
    b_ep2_b = jnp.broadcast_to(b[2:3, 0:2 * H], (B, 2 * H))      # [enc2_b|pri2_b]
    b_eph_b = jnp.broadcast_to(b[3:4, 0:4 * Z], (B, 4 * Z))      # [encm|prim|encs|pris]
    b_d2_b = jnp.broadcast_to(b[4:5, 0:H], (B, H))               # dec2_b
    b_dh_b = jnp.broadcast_to(b[5:6, 0:2 * Y], (B, 2 * Y))       # [decm_b|decs_b]

    # ---- prologue: every h/z-independent projection in one fused pass ----
    # columns of `pre`: [enc_pre(H) | pri_pre(H) | dec_pre(H) | gru_gi(3R)]
    y_bf = y_ref[...].astype(bf16)                # (T*B, Y)
    pre = (mm(y_bf[B:SB + B, :], w_pre[0:Y, :])            # x_t  (= y[t+1]) part
           + mm(y_bf[0:SB, :], w_pre[Y:2 * Y, :])          # y_t  part
           + jnp.broadcast_to(b_pre, (SB, W)))
    pre_ref[...] = pre                            # park in VMEM scratch (off vregs)

    h = jnp.zeros((B, R), f32)
    h_bf = jnp.zeros((B, R), bf16)
    kl_acc = jnp.zeros((B, Z), f32)
    nll_acc = jnp.zeros((B, Y), f32)

    # TODO(synk): n_layers > 1 stacked GRU not implemented (module uses n_layers=1).
    # TODO(synk): with >=2 independent sequences, add a leading "parallel" grid
    #             axis so the second TensorCore on v7x runs its own recurrence.
    for t in range(steps):                        # fully unrolled (steps is static)
        r0 = t * B
        pre_t = pre_ref[r0:r0 + B, :]             # (B, W)
        x_t = y_ref[r0 + B:r0 + 2 * B, :]         # (B, Y) == y[t+1], f32
        eps_t = eps_ref[r0:r0 + B, :]             # (B, Z)

        # single fused h-projection: [enc|pri|dec|gru] in one matmul
        hw = mm(h_bf, wh_all)                     # (B, W)
        gh = hw[:, 3 * H:W] + bhh_b               # (B, 3R) h-side GRU gates (+bhh)
        s_epd = pre_t[:, 0:3 * H] + hw[:, 0:3 * H]  # aligned full-width add

        # fused encoder + prior stack (block-diagonal packed weights)
        ep1 = jax.nn.relu(s_epd[:, 0:2 * H])
        ep2 = jax.nn.relu(mm(ep1, w_ep2) + b_ep2_b)
        stats = mm(ep2, w_ep_head) + b_eph_b      # [enc_m|pri_m|enc_sraw|pri_sraw]
        std_ep = jax.nn.softplus(stats[:, 2 * Z:4 * Z])   # one packed softplus
        log_std_ep = jnp.log(std_ep)                      # one packed log
        enc_mean = stats[:, 0:Z]
        pri_mean = stats[:, Z:2 * Z]
        enc_std = std_ep[:, 0:Z]
        pri_std = std_ep[:, Z:2 * Z]

        # reparameterized sample and fused z-projection
        z_t = enc_mean + enc_std * eps_t
        zw = mm(z_t, wz)                          # (B, H+3R): [z->dec | z->gru]

        # decoder p(x_t | y_t, z_t, h)
        d1 = jax.nn.relu(s_epd[:, 2 * H:3 * H] + zw[:, 0:H])
        d2 = jax.nn.relu(mm(d1, w_dec2) + b_d2_b)
        dst = mm(d2, w_dec_head) + b_dh_b         # (B, 2Y): [dec_mean | dec_std_raw]
        dec_mean = dst[:, 0:Y]
        dec_std = jax.nn.softplus(dst[:, Y:2 * Y])

        # single-layer GRU cell, PyTorch gate order (r, z, n)
        gi = pre_t[:, 3 * H:W] + zw[:, H:H + 3 * R]               # x/z side (+bih)
        s_rz = jax.nn.sigmoid(gi[:, 0:2 * R] + gh[:, 0:2 * R])    # one packed sigmoid
        r_g = s_rz[:, 0:R]
        z_g = s_rz[:, R:2 * R]
        n_g = jnp.tanh(gi[:, 2 * R:3 * R] + r_g * gh[:, 2 * R:3 * R])
        h = (1.0 - z_g) * n_g + z_g * h
        h_bf = h.astype(bf16)

        # losses: elementwise partial sums; divides moved to the EUP
        dm = enc_mean - pri_mean
        kl_acc = kl_acc + (
            2.0 * (log_std_ep[:, Z:2 * Z] - log_std_ep[:, 0:Z])
            + (enc_std * enc_std + dm * dm)
            * pl.reciprocal(pri_std * pri_std, approx=True)
            - 1.0)
        diff = x_t - dec_mean
        nll_acc = nll_acc + (
            diff * diff * pl.reciprocal(dec_std * dec_std, approx=True)
            + 2.0 * jnp.log(dec_std) + LOG_2PI)

    # reduce exactly once, pack both scalars into a single (1, 2) output
    kl = 0.5 * jnp.sum(kl_acc, keepdims=True)        # (1, 1)
    nll = 0.5 * jnp.sum(nll_acc, keepdims=True)      # (1, 1)
    col = jax.lax.broadcasted_iota(jnp.int32, (1, 2), 1)
    loss_ref[...] = jnp.where(col == 0,
                              jnp.broadcast_to(kl, (1, 2)),
                              jnp.broadcast_to(nll, (1, 2)))


def pack_params(p):
    """One-time host-side packing of the 33 raw tensors into 6 fused arrays."""
    f32, bf = jnp.float32, jnp.bfloat16
    Y = p["enc1_wx"].shape[0]
    Z = p["encm_w"].shape[1]
    H = p["enc2_w"].shape[0]
    R = p["gru_whh"].shape[0]
    W = 3 * H + 3 * R

    def zeros(r, c):
        return jnp.zeros((r, c), f32)

    # prologue weight: rows [x_t | y_t], cols [enc|pri|dec|gru_gi]
    w_pre = jnp.concatenate([
        jnp.concatenate([p["enc1_wx"], zeros(Y, H), zeros(Y, H), p["gru_wih_x"]], axis=1),
        jnp.concatenate([p["enc1_wy"], p["pri1_wy"], p["dec1_wy"], zeros(Y, 3 * R)], axis=1),
    ], axis=0)                                                        # (2Y, W)
    # h-projection: cols [enc|pri|dec|gru_whh]
    wh_all = jnp.concatenate(
        [p["enc1_wh"], p["pri1_wh"], p["dec1_wh"], p["gru_whh"]], axis=1)   # (R, W)
    # fused enc/pri layer-2 (block diagonal) and mean|std heads
    w_ep2 = jnp.concatenate([
        jnp.concatenate([p["enc2_w"], zeros(H, H)], axis=1),
        jnp.concatenate([zeros(H, H), p["pri2_w"]], axis=1)], axis=0)       # (2H, 2H)
    w_ep_head = jnp.concatenate([
        jnp.concatenate([p["encm_w"], zeros(H, Z), p["encs_w"], zeros(H, Z)], axis=1),
        jnp.concatenate([zeros(H, Z), p["prim_w"], zeros(H, Z), p["pris_w"]], axis=1)],
        axis=0)                                                             # (2H, 4Z)
    w_ep = jnp.concatenate([w_ep2, w_ep_head], axis=1)                      # (2H, 2H+4Z)
    # z-projection: [dec1_wz | gru_wih_z]
    wz = jnp.concatenate([p["dec1_wz"], p["gru_wih_z"]], axis=1)            # (Z, H+3R)
    # decoder layer-2 + mean|std head
    w_dec = jnp.concatenate(
        [p["dec2_w"], p["decm_w"], p["decs_w"]], axis=1)                    # (H, H+2Y)

    def pad_row(v):
        pad = W - v.shape[1]
        return v if pad == 0 else jnp.concatenate([v, jnp.zeros((1, pad), f32)], axis=1)

    biases = jnp.concatenate([
        pad_row(jnp.concatenate([p["enc1_b"], p["pri1_b"], p["dec1_b"], p["gru_bih"]], axis=1)),
        pad_row(p["gru_bhh"]),
        pad_row(jnp.concatenate([p["enc2_b"], p["pri2_b"]], axis=1)),
        pad_row(jnp.concatenate([p["encm_b"], p["prim_b"], p["encs_b"], p["pris_b"]], axis=1)),
        pad_row(p["dec2_b"]),
        pad_row(jnp.concatenate([p["decm_b"], p["decs_b"]], axis=1)),
    ], axis=0)                                                              # (6, W)

    return {
        "w_pre": w_pre.astype(bf), "wh_all": wh_all.astype(bf),
        "w_ep": w_ep.astype(bf), "wz": wz.astype(bf), "w_dec": w_dec.astype(bf),
        "biases": biases,
    }


@jax.jit
def vrnn_single_forward(y, eps, packed):
    T, B, Y = y.shape
    S, _, Z = eps.shape
    R = packed["wh_all"].shape[0]
    H = packed["w_dec"].shape[0]

    y2d = y.reshape(T * B, Y)        # free, layout-preserving
    eps2d = eps.reshape(S * B, Z)

    kernel = functools.partial(vrnn_kernel, steps=S, B=B, Y=Y, Z=Z, H=H, R=R)
    vmem = pl.BlockSpec(memory_space=pltpu.MemorySpace.VMEM)

    losses = pl.pallas_call(
        kernel,
        out_shape=jax.ShapeDtypeStruct((1, 2), jnp.float32),
        in_specs=[vmem] * 8,
        out_specs=vmem,
        scratch_shapes=[pltpu.VMEM((S * B, 3 * H + 3 * R), jnp.float32)],
    )(y2d, eps2d, packed["w_pre"], packed["wh_all"], packed["w_ep"],
      packed["wz"], packed["w_dec"], packed["biases"])

    return {"kl_loss": losses[0, 0], "recon_loss": losses[0, 1]}


def init_params(key, y_dim, z_dim, h_dim, rnn_dim):
    """Deterministic init mirroring PyTorch nn.Linear / nn.GRU defaults."""
    params = {}

    def linear(k, fan_in, fan_out):
        k1, k2 = jax.random.split(k)
        bound = 1.0 / math.sqrt(fan_in)
        w = jax.random.uniform(k1, (fan_in, fan_out), jnp.float32, -bound, bound)
        b = jax.random.uniform(k2, (1, fan_out), jnp.float32, -bound, bound)
        return w, b

    keys = jax.random.split(key, 13)
    # enc: Linear(y+y+r, h) -> split the (in, out) weight into x/y/h chunks
    w, b = linear(keys[0], 2 * y_dim + rnn_dim, h_dim)
    params["enc1_wx"], params["enc1_wy"], params["enc1_wh"], params["enc1_b"] = (
        w[:y_dim], w[y_dim:2 * y_dim], w[2 * y_dim:], b)
    params["enc2_w"], params["enc2_b"] = linear(keys[1], h_dim, h_dim)
    params["encm_w"], params["encm_b"] = linear(keys[2], h_dim, z_dim)
    params["encs_w"], params["encs_b"] = linear(keys[3], h_dim, z_dim)
    # prior: Linear(y+r, h)
    w, b = linear(keys[4], y_dim + rnn_dim, h_dim)
    params["pri1_wy"], params["pri1_wh"], params["pri1_b"] = w[:y_dim], w[y_dim:], b
    params["pri2_w"], params["pri2_b"] = linear(keys[5], h_dim, h_dim)
    params["prim_w"], params["prim_b"] = linear(keys[6], h_dim, z_dim)
    params["pris_w"], params["pris_b"] = linear(keys[7], h_dim, z_dim)
    # dec: Linear(y+z+r, h)
    w, b = linear(keys[8], y_dim + z_dim + rnn_dim, h_dim)
    params["dec1_wy"] = w[:y_dim]
    params["dec1_wz"] = w[y_dim:y_dim + z_dim]
    params["dec1_wh"] = w[y_dim + z_dim:]
    params["dec1_b"] = b
    params["dec2_w"], params["dec2_b"] = linear(keys[9], h_dim, h_dim)
    params["decm_w"], params["decm_b"] = linear(keys[10], h_dim, y_dim)
    params["decs_w"], params["decs_b"] = linear(keys[11], h_dim, y_dim)
    # GRU(y+z, r), n_layers = 1; PyTorch init bound = 1/sqrt(rnn_dim)
    bound = 1.0 / math.sqrt(rnn_dim)
    gk = jax.random.split(keys[12], 4)
    wih = jax.random.uniform(gk[0], (y_dim + z_dim, 3 * rnn_dim), jnp.float32, -bound, bound)
    whh = jax.random.uniform(gk[1], (rnn_dim, 3 * rnn_dim), jnp.float32, -bound, bound)
    params["gru_wih_x"] = wih[:y_dim]
    params["gru_wih_z"] = wih[y_dim:]
    params["gru_whh"] = whh
    params["gru_bih"] = jax.random.uniform(gk[2], (1, 3 * rnn_dim), jnp.float32, -bound, bound)
    params["gru_bhh"] = jax.random.uniform(gk[3], (1, 3 * rnn_dim), jnp.float32, -bound, bound)
    return params


def reference_forward(y, eps, p):
    """Pure-JAX port of VRNN_SINGLE.forward (same raw param layout)."""
    T, B, _ = y.shape
    R = p["gru_whh"].shape[0]
    h = jnp.zeros((B, R), jnp.float32)
    kl = 0.0
    recon = 0.0
    for t in range(T - 1):
        y_t, x_t, e = y[t], y[t + 1], eps[t]
        e1 = jax.nn.relu(x_t @ p["enc1_wx"] + y_t @ p["enc1_wy"] + h @ p["enc1_wh"] + p["enc1_b"])
        e2 = jax.nn.relu(e1 @ p["enc2_w"] + p["enc2_b"])
        enc_mean = e2 @ p["encm_w"] + p["encm_b"]
        enc_std = jax.nn.softplus(e2 @ p["encs_w"] + p["encs_b"])
        p1 = jax.nn.relu(y_t @ p["pri1_wy"] + h @ p["pri1_wh"] + p["pri1_b"])
        p2 = jax.nn.relu(p1 @ p["pri2_w"] + p["pri2_b"])
        pri_mean = p2 @ p["prim_w"] + p["prim_b"]
        pri_std = jax.nn.softplus(p2 @ p["pris_w"] + p["pris_b"])
        z_t = enc_mean + enc_std * e
        d1 = jax.nn.relu(y_t @ p["dec1_wy"] + z_t @ p["dec1_wz"] + h @ p["dec1_wh"] + p["dec1_b"])
        d2 = jax.nn.relu(d1 @ p["dec2_w"] + p["dec2_b"])
        dec_mean = d2 @ p["decm_w"] + p["decm_b"]
        dec_std = jax.nn.softplus(d2 @ p["decs_w"] + p["decs_b"])
        gi = x_t @ p["gru_wih_x"] + z_t @ p["gru_wih_z"] + p["gru_bih"]
        gh = h @ p["gru_whh"] + p["gru_bhh"]
        r_g = jax.nn.sigmoid(gi[:, :R] + gh[:, :R])
        z_g = jax.nn.sigmoid(gi[:, R:2 * R] + gh[:, R:2 * R])
        n_g = jnp.tanh(gi[:, 2 * R:] + r_g * gh[:, 2 * R:])
        h = (1.0 - z_g) * n_g + z_g * h
        kl = kl + 0.5 * jnp.sum(
            2.0 * jnp.log(pri_std) - 2.0 * jnp.log(enc_std)
            + (enc_std ** 2 + (enc_mean - pri_mean) ** 2) / (pri_std ** 2) - 1.0)
        recon = recon + 0.5 * jnp.sum(
            (x_t - dec_mean) ** 2 / (dec_std ** 2) + 2.0 * jnp.log(dec_std) + LOG_2PI)
    return {"kl_loss": kl, "recon_loss": recon}


if __name__ == "__main__":
    # params: y_dim=16, z_dim=16, h_dim=32, rnn_dim=32, n_layers=1, seq=8, batch=8
    T, B = 8, 8
    y_dim, z_dim, h_dim, rnn_dim = 16, 16, 32, 32

    key = jax.random.PRNGKey(0)
    kp, kd, ke = jax.random.split(key, 3)
    params = init_params(kp, y_dim, z_dim, h_dim, rnn_dim)
    packed = pack_params(params)                                  # once, at init
    y = jax.random.normal(kd, (T, B, y_dim), jnp.float32)         # data (T, B, y_dim)
    eps = jax.random.normal(ke, (T - 1, B, z_dim), jnp.float32)   # reparam noise

    out = vrnn_single_forward(y, eps, packed)
    jax.block_until_ready(out["kl_loss"])
    jax.block_until_ready(out["recon_loss"])

    ref = reference_forward(y, eps, params)
    np.testing.assert_allclose(float(out["kl_loss"]), float(ref["kl_loss"]),
                               rtol=2e-2, atol=1e-2)
    np.testing.assert_allclose(float(out["recon_loss"]), float(ref["recon_loss"]),
                               rtol=2e-2, atol=1e-2)
    print("KERNEL_OK")
</pallas_src>

<mosaic_0001>
module attributes {stable_mosaic.version = 11 : i64} {
  func.func @vrnn_kernel(%arg0: memref<64x16xf32, #tpu.memory_space<vmem>>, %arg1: memref<56x16xf32, #tpu.memory_space<vmem>>, %arg2: memref<32x192xbf16, #tpu.memory_space<vmem>>, %arg3: memref<32x192xbf16, #tpu.memory_space<vmem>>, %arg4: memref<64x128xbf16, #tpu.memory_space<vmem>>, %arg5: memref<16x128xbf16, #tpu.memory_space<vmem>>, %arg6: memref<32x64xbf16, #tpu.memory_space<vmem>>, %arg7: memref<6x192xf32, #tpu.memory_space<vmem>>, %arg8: memref<1x2xf32, #tpu.memory_space<vmem>>, %arg9: memref<56x192xf32, #tpu.memory_space<vmem>>) attributes {dimension_semantics = [], scalar_prefetch = 0 : i64, scratch_operands = 1 : i64, tpu.core_type = #tpu.core_type<tc>} {
    %c0 = arith.constant 0 : index
    %c0_0 = arith.constant 0 : index
    %0 = vector.load %arg2[%c0, %c0_0] : memref<32x192xbf16, #tpu.memory_space<vmem>>, vector<32x192xbf16>
    %c0_1 = arith.constant 0 : index
    %c0_2 = arith.constant 0 : index
    %1 = vector.load %arg3[%c0_1, %c0_2] : memref<32x192xbf16, #tpu.memory_space<vmem>>, vector<32x192xbf16>
    %c0_3 = arith.constant 0 : index
    %c0_4 = arith.constant 0 : index
    %2 = vector.load %arg4[%c0_3, %c0_4] : memref<64x128xbf16, #tpu.memory_space<vmem>>, vector<64x128xbf16>
    %3 = vector.extract_strided_slice %2 {offsets = [0, 0], sizes = [64, 64], strides = [1, 1]} : vector<64x128xbf16> to vector<64x64xbf16>
    %4 = vector.extract_strided_slice %2 {offsets = [0, 64], sizes = [64, 64], strides = [1, 1]} : vector<64x128xbf16> to vector<64x64xbf16>
    %c0_5 = arith.constant 0 : index
    %c0_6 = arith.constant 0 : index
    %5 = vector.load %arg5[%c0_5, %c0_6] : memref<16x128xbf16, #tpu.memory_space<vmem>>, vector<16x128xbf16>
    %c0_7 = arith.constant 0 : index
    %c0_8 = arith.constant 0 : index
    %6 = vector.load %arg6[%c0_7, %c0_8] : memref<32x64xbf16, #tpu.memory_space<vmem>>, vector<32x64xbf16>
    %7 = vector.extract_strided_slice %6 {offsets = [0, 0], sizes = [32, 32], strides = [1, 1]} : vector<32x64xbf16> to vector<32x32xbf16>
    %8 = vector.extract_strided_slice %6 {offsets = [0, 32], sizes = [32, 32], strides = [1, 1]} : vector<32x64xbf16> to vector<32x32xbf16>
    %c0_9 = arith.constant 0 : index
    %c0_10 = arith.constant 0 : index
    %9 = vector.load %arg7[%c0_9, %c0_10] : memref<6x192xf32, #tpu.memory_space<vmem>>, vector<6x192xf32>
    %10 = vector.extract_strided_slice %9 {offsets = [0, 0], sizes = [1, 192], strides = [1, 1]} : vector<6x192xf32> to vector<1x192xf32>
    %11 = vector.extract_strided_slice %9 {offsets = [1, 0], sizes = [1, 96], strides = [1, 1]} : vector<6x192xf32> to vector<1x96xf32>
    %12 = vector.shape_cast %11 : vector<1x96xf32> to vector<1x96xf32>
    %13 = vector.broadcast %12 : vector<1x96xf32> to vector<8x96xf32>
    %14 = vector.extract_strided_slice %9 {offsets = [2, 0], sizes = [1, 64], strides = [1, 1]} : vector<6x192xf32> to vector<1x64xf32>
    %15 = vector.shape_cast %14 : vector<1x64xf32> to vector<1x64xf32>
    %16 = vector.broadcast %15 : vector<1x64xf32> to vector<8x64xf32>
    %17 = vector.extract_strided_slice %9 {offsets = [3, 0], sizes = [1, 64], strides = [1, 1]} : vector<6x192xf32> to vector<1x64xf32>
    %18 = vector.shape_cast %17 : vector<1x64xf32> to vector<1x64xf32>
    %19 = vector.broadcast %18 : vector<1x64xf32> to vector<8x64xf32>
    %20 = vector.extract_strided_slice %9 {offsets = [4, 0], sizes = [1, 32], strides = [1, 1]} : vector<6x192xf32> to vector<1x32xf32>
    %21 = vector.shape_cast %20 : vector<1x32xf32> to vector<1x32xf32>
    %22 = vector.broadcast %21 : vector<1x32xf32> to vector<8x32xf32>
    %23 = vector.extract_strided_slice %9 {offsets = [5, 0], sizes = [1, 32], strides = [1, 1]} : vector<6x192xf32> to vector<1x32xf32>
    %24 = vector.shape_cast %23 : vector<1x32xf32> to vector<1x32xf32>
    %25 = vector.broadcast %24 : vector<1x32xf32> to vector<8x32xf32>
    %c0_11 = arith.constant 0 : index
    %c0_12 = arith.constant 0 : index
    %26 = vector.load %arg0[%c0_11, %c0_12] : memref<64x16xf32, #tpu.memory_space<vmem>>, vector<64x16xf32>
    %27 = arith.truncf %26 : vector<64x16xf32> to vector<64x16xbf16>
    %28 = vector.extract_strided_slice %27 {offsets = [8, 0], sizes = [56, 16], strides = [1, 1]} : vector<64x16xbf16> to vector<56x16xbf16>
    %29 = vector.extract_strided_slice %0 {offsets = [0, 0], sizes = [16, 192], strides = [1, 1]} : vector<32x192xbf16> to vector<16x192xbf16>
    %cst = arith.constant dense<0.000000e+00> : vector<56x192xf32>
    %30 = tpu.matmul %28, %29, %cst {dimension_numbers = #tpu.dot_dimension_numbers<[1], [0], [0], [1], [0, 0, 1, 1], [], []>} : vector<56x16xbf16>, vector<16x192xbf16>, vector<56x192xf32> -> vector<56x192xf32>
    %31 = vector.extract_strided_slice %27 {offsets = [0, 0], sizes = [56, 16], strides = [1, 1]} : vector<64x16xbf16> to vector<56x16xbf16>
    %32 = vector.extract_strided_slice %0 {offsets = [16, 0], sizes = [16, 192], strides = [1, 1]} : vector<32x192xbf16> to vector<16x192xbf16>
    %cst_13 = arith.constant dense<0.000000e+00> : vector<56x192xf32>
    %33 = tpu.matmul %31, %32, %cst_13 {dimension_numbers = #tpu.dot_dimension_numbers<[1], [0], [0], [1], [0, 0, 1, 1], [], []>} : vector<56x16xbf16>, vector<16x192xbf16>, vector<56x192xf32> -> vector<56x192xf32>
    %34 = arith.addf %30, %33 : vector<56x192xf32>
    %35 = vector.shape_cast %10 : vector<1x192xf32> to vector<1x192xf32>
    %36 = vector.broadcast %35 : vector<1x192xf32> to vector<56x192xf32>
    %37 = arith.addf %34, %36 : vector<56x192xf32>
    %c0_14 = arith.constant 0 : index
    %c0_15 = arith.constant 0 : index
    %38 = vector.load %arg9[%c0_14, %c0_15] : memref<56x192xf32, #tpu.memory_space<vmem>>, vector<56x192xf32>
    tpu.vector_store %arg9[%c0_14, %c0_15], %37 {strides = array<i32>} : memref<56x192xf32, #tpu.memory_space<vmem>>, vector<56x192xf32>,
    %cst_16 = arith.constant 0.000000e+00 : f32
    %39 = vector.broadcast %cst_16 : f32 to vector<8x32xf32>
    %cst_17 = arith.constant 0.000000e+00 : bf16
    %40 = vector.broadcast %cst_17 : bf16 to vector<8x32xbf16>
    %cst_18 = arith.constant 0.000000e+00 : f32
    %41 = vector.broadcast %cst_18 : f32 to vector<8x16xf32>
    %cst_19 = arith.constant 0.000000e+00 : f32
    %42 = vector.broadcast %cst_19 : f32 to vector<8x16xf32>
    %c0_20 = arith.constant 0 : index
    %c0_21 = arith.constant 0 : index
    %43 = vector.load %arg9[%c0_20, %c0_21] : memref<56x192xf32, #tpu.memory_space<vmem>>, vector<8x192xf32>
    %c8 = arith.constant 8 : index
    %c0_22 = arith.constant 0 : index
    %44 = vector.load %arg0[%c8, %c0_22] : memref<64x16xf32, #tpu.memory_space<vmem>>, vector<8x16xf32>
    %c0_23 = arith.constant 0 : index
    %c0_24 = arith.constant 0 : index
    %45 = vector.load %arg1[%c0_23, %c0_24] : memref<56x16xf32, #tpu.memory_space<vmem>>, vector<8x16xf32>
    %cst_25 = arith.constant dense<0.000000e+00> : vector<8x192xf32>
    %46 = tpu.matmul %40, %1, %cst_25 {dimension_numbers = #tpu.dot_dimension_numbers<[1], [0], [0], [1], [0, 0, 1, 1], [], []>} : vector<8x32xbf16>, vector<32x192xbf16>, vector<8x192xf32> -> vector<8x192xf32>
    %47 = vector.extract_strided_slice %46 {offsets = [0, 96], sizes = [8, 96], strides = [1, 1]} : vector<8x192xf32> to vector<8x96xf32>
    %48 = arith.addf %47, %13 : vector<8x96xf32>
    %49 = vector.extract_strided_slice %43 {offsets = [0, 0], sizes = [8, 96], strides = [1, 1]} : vector<8x192xf32> to vector<8x96xf32>
    %50 = vector.extract_strided_slice %46 {offsets = [0, 0], sizes = [8, 96], strides = [1, 1]} : vector<8x192xf32> to vector<8x96xf32>
    %51 = arith.addf %49, %50 : vector<8x96xf32>
    %52 = vector.extract_strided_slice %51 {offsets = [0, 0], sizes = [8, 64], strides = [1, 1]} : vector<8x96xf32> to vector<8x64xf32>
    %cst_26 = arith.constant 0.000000e+00 : f32
    %53 = vector.broadcast %cst_26 : f32 to vector<8x64xf32>
    %54 = arith.maximumf %52, %53 : vector<8x64xf32>
    %55 = arith.truncf %54 : vector<8x64xf32> to vector<8x64xbf16>
    %cst_27 = arith.constant dense<0.000000e+00> : vector<8x64xf32>
    %56 = tpu.matmul %55, %3, %cst_27 {dimension_numbers = #tpu.dot_dimension_numbers<[1], [0], [0], [1], [0, 0, 1, 1], [], []>} : vector<8x64xbf16>, vector<64x64xbf16>, vector<8x64xf32> -> vector<8x64xf32>
    %57 = arith.addf %56, %16 : vector<8x64xf32>
    %cst_28 = arith.constant 0.000000e+00 : f32
    %58 = vector.broadcast %cst_28 : f32 to vector<8x64xf32>
    %59 = arith.maximumf %57, %58 : vector<8x64xf32>
    %60 = arith.truncf %59 : vector<8x64xf32> to vector<8x64xbf16>
    %cst_29 = arith.constant dense<0.000000e+00> : vector<8x64xf32>
    %61 = tpu.matmul %60, %4, %cst_29 {dimension_numbers = #tpu.dot_dimension_numbers<[1], [0], [0], [1], [0, 0, 1, 1], [], []>} : vector<8x64xbf16>, vector<64x64xbf16>, vector<8x64xf32> -> vector<8x64xf32>
    %62 = arith.addf %61, %19 : vector<8x64xf32>
    %63 = vector.extract_strided_slice %62 {offsets = [0, 32], sizes = [8, 32], strides = [1, 1]} : vector<8x64xf32> to vector<8x32xf32>
    %cst_30 = arith.constant 0.000000e+00 : f32
    %64 = vector.broadcast %cst_30 : f32 to vector<8x32xf32>
    %65 = arith.maximumf %63, %64 : vector<8x32xf32>
    %66 = vector.broadcast %cst_30 : f32 to vector<8x32xf32>
    %67 = arith.subf %63, %66 : vector<8x32xf32>
    %68 = arith.cmpf one, %67, %67 : vector<8x32xf32>
    %69 = vector.broadcast %cst_30 : f32 to vector<8x32xf32>
    %70 = arith.addf %63, %69 : vector<8x32xf32>
    %71 = math.absf %67 : vector<8x32xf32>
    %cst_31 = arith.constant 0.000000e+00 : f32
    %72 = vector.broadcast %cst_31 : f32 to vector<8x32xf32>
    %73 = arith.subf %72, %71 : vector<8x32xf32>
    %74 = math.exp %73 : vector<8x32xf32>
    %75 = math.log1p %74 : vector<8x32xf32>
    %76 = arith.addf %65, %75 : vector<8x32xf32>
    %77 = arith.select %68, %70, %76 : vector<8x32xi1>, vector<8x32xf32>
    %78 = math.log %77 : vector<8x32xf32>
    %79 = vector.extract_strided_slice %62 {offsets = [0, 0], sizes = [8, 16], strides = [1, 1]} : vector<8x64xf32> to vector<8x16xf32>
    %80 = vector.extract_strided_slice %62 {offsets = [0, 16], sizes = [8, 16], strides = [1, 1]} : vector<8x64xf32> to vector<8x16xf32>
    %81 = vector.extract_strided_slice %77 {offsets = [0, 0], sizes = [8, 16], strides = [1, 1]} : vector<8x32xf32> to vector<8x16xf32>
    %82 = vector.extract_strided_slice %77 {offsets = [0, 16], sizes = [8, 16], strides = [1, 1]} : vector<8x32xf32> to vector<8x16xf32>
    %83 = arith.mulf %81, %45 : vector<8x16xf32>
    %84 = arith.addf %79, %83 : vector<8x16xf32>
    %85 = arith.truncf %84 : vector<8x16xf32> to vector<8x16xbf16>
    %cst_32 = arith.constant dense<0.000000e+00> : vector<8x128xf32>
    %86 = tpu.matmul %85, %5, %cst_32 {dimension_numbers = #tpu.dot_dimension_numbers<[1], [0], [0], [1], [0, 0, 1, 1], [], []>} : vector<8x16xbf16>, vector<16x128xbf16>, vector<8x128xf32> -> vector<8x128xf32>
    %87 = vector.extract_strided_slice %51 {offsets = [0, 64], sizes = [8, 32], strides = [1, 1]} : vector<8x96xf32> to vector<8x32xf32>
    %88 = vector.extract_strided_slice %86 {offsets = [0, 0], sizes = [8, 32], strides = [1, 1]} : vector<8x128xf32> to vector<8x32xf32>
    %89 = arith.addf %87, %88 : vector<8x32xf32>
    %cst_33 = arith.constant 0.000000e+00 : f32
    %90 = vector.broadcast %cst_33 : f32 to vector<8x32xf32>
    %91 = arith.maximumf %89, %90 : vector<8x32xf32>
    %92 = arith.truncf %91 : vector<8x32xf32> to vector<8x32xbf16>
    %cst_34 = arith.constant dense<0.000000e+00> : vector<8x32xf32>
    %93 = tpu.matmul %92, %7, %cst_34 {dimension_numbers = #tpu.dot_dimension_numbers<[1], [0], [0], [1], [0, 0, 1, 1], [], []>} : vector<8x32xbf16>, vector<32x32xbf16>, vector<8x32xf32> -> vector<8x32xf32>
    %94 = arith.addf %93, %22 : vector<8x32xf32>
    %cst_35 = arith.constant 0.000000e+00 : f32
    %95 = vector.broadcast %cst_35 : f32 to vector<8x32xf32>
    %96 = arith.maximumf %94, %95 : vector<8x32xf32>
    %97 = arith.truncf %96 : vector<8x32xf32> to vector<8x32xbf16>
    %cst_36 = arith.constant dense<0.000000e+00> : vector<8x32xf32>
    %98 = tpu.matmul %97, %8, %cst_36 {dimension_numbers = #tpu.dot_dimension_numbers<[1], [0], [0], [1], [0, 0, 1, 1], [], []>} : vector<8x32xbf16>, vector<32x32xbf16>, vector<8x32xf32> -> vector<8x32xf32>
    %99 = arith.addf %98, %25 : vector<8x32xf32>
    %100 = vector.extract_strided_slice %99 {offsets = [0, 0], sizes = [8, 16], strides = [1, 1]} : vector<8x32xf32> to vector<8x16xf32>
    %101 = vector.extract_strided_slice %99 {offsets = [0, 16], sizes = [8, 16], strides = [1, 1]} : vector<8x32xf32> to vector<8x16xf32>
    %cst_37 = arith.constant 0.000000e+00 : f32
    %102 = vector.broadcast %cst_37 : f32 to vector<8x16xf32>
    %103 = arith.maximumf %101, %102 : vector<8x16xf32>
    %104 = vector.broadcast %cst_37 : f32 to vector<8x16xf32>
    %105 = arith.subf %101, %104 : vector<8x16xf32>
    %106 = arith.cmpf one, %105, %105 : vector<8x16xf32>
    %107 = vector.broadcast %cst_37 : f32 to vector<8x16xf32>
    %108 = arith.addf %101, %107 : vector<8x16xf32>
    %109 = math.absf %105 : vector<8x16xf32>
    %cst_38 = arith.constant 0.000000e+00 : f32
    %110 = vector.broadcast %cst_38 : f32 to vector<8x16xf32>
    %111 = arith.subf %110, %109 : vector<8x16xf32>
    %112 = math.exp %111 : vector<8x16xf32>
    %113 = math.log1p %112 : vector<8x16xf32>
    %114 = arith.addf %103, %113 : vector<8x16xf32>
    %115 = arith.select %106, %108, %114 : vector<8x16xi1>, vector<8x16xf32>
    %116 = vector.extract_strided_slice %43 {offsets = [0, 96], sizes = [8, 96], strides = [1, 1]} : vector<8x192xf32> to vector<8x96xf32>
    %117 = vector.extract_strided_slice %86 {offsets = [0, 32], sizes = [8, 96], strides = [1, 1]} : vector<8x128xf32> to vector<8x96xf32>
    %118 = arith.addf %116, %117 : vector<8x96xf32>
    %119 = vector.extract_strided_slice %118 {offsets = [0, 0], sizes = [8, 64], strides = [1, 1]} : vector<8x96xf32> to vector<8x64xf32>
    %120 = vector.extract_strided_slice %48 {offsets = [0, 0], sizes = [8, 64], strides = [1, 1]} : vector<8x96xf32> to vector<8x64xf32>
    %121 = arith.addf %119, %120 : vector<8x64xf32>
    %122 = arith.negf %121 : vector<8x64xf32>
    %123 = math.exp %122 : vector<8x64xf32>
    %cst_39 = arith.constant 1.000000e+00 : f32
    %124 = vector.broadcast %cst_39 : f32 to vector<8x64xf32>
    %125 = arith.addf %124, %123 : vector<8x64xf32>
    %126 = arith.divf %124, %125 : vector<8x64xf32>
    %127 = vector.extract_strided_slice %126 {offsets = [0, 0], sizes = [8, 32], strides = [1, 1]} : vector<8x64xf32> to vector<8x32xf32>
    %128 = vector.extract_strided_slice %126 {offsets = [0, 32], sizes = [8, 32], strides = [1, 1]} : vector<8x64xf32> to vector<8x32xf32>
    %129 = vector.extract_strided_slice %118 {offsets = [0, 64], sizes = [8, 32], strides = [1, 1]} : vector<8x96xf32> to vector<8x32xf32>
    %130 = vector.extract_strided_slice %48 {offsets = [0, 64], sizes = [8, 32], strides = [1, 1]} : vector<8x96xf32> to vector<8x32xf32>
    %131 = arith.mulf %127, %130 : vector<8x32xf32>
    %132 = arith.addf %129, %131 : vector<8x32xf32>
    %133 = math.tanh %132 : vector<8x32xf32>
    %cst_40 = arith.constant 1.000000e+00 : f32
    %134 = vector.broadcast %cst_40 : f32 to vector<8x32xf32>
    %135 = arith.subf %134, %128 : vector<8x32xf32>
    %136 = arith.mulf %135, %133 : vector<8x32xf32>
    %137 = arith.mulf %128, %39 : vector<8x32xf32>
    %138 = arith.addf %136, %137 : vector<8x32xf32>
    %139 = arith.truncf %138 : vector<8x32xf32> to vector<8x32xbf16>
    %140 = arith.subf %79, %80 : vector<8x16xf32>
    %141 = vector.extract_strided_slice %78 {offsets = [0, 16], sizes = [8, 16], strides = [1, 1]} : vector<8x32xf32> to vector<8x16xf32>
    %142 = vector.extract_strided_slice %78 {offsets = [0, 0], sizes = [8, 16], strides = [1, 1]} : vector<8x32xf32> to vector<8x16xf32>
    %143 = arith.subf %141, %142 : vector<8x16xf32>
    %cst_41 = arith.constant 2.000000e+00 : f32
    %144 = vector.broadcast %cst_41 : f32 to vector<8x16xf32>
    %145 = arith.mulf %144, %143 : vector<8x16xf32>
    %146 = arith.mulf %81, %81 : vector<8x16xf32>
    %147 = arith.mulf %140, %140 : vector<8x16xf32>
    %148 = arith.addf %146, %147 : vector<8x16xf32>
    %149 = arith.mulf %82, %82 : vector<8x16xf32>
    %150 = tpu.reciprocal %149 {approx = true} : vector<8x16xf32> -> vector<8x16xf32>
    %151 = arith.mulf %148, %150 : vector<8x16xf32>
    %152 = arith.addf %145, %151 : vector<8x16xf32>
    %cst_42 = arith.constant 1.000000e+00 : f32
    %153 = vector.broadcast %cst_42 : f32 to vector<8x16xf32>
    %154 = arith.subf %152, %153 : vector<8x16xf32>
    %155 = arith.addf %41, %154 : vector<8x16xf32>
    %156 = arith.subf %44, %100 : vector<8x16xf32>
    %157 = arith.mulf %156, %156 : vector<8x16xf32>
    %158 = arith.mulf %115, %115 : vector<8x16xf32>
    %159 = tpu.reciprocal %158 {approx = true} : vector<8x16xf32> -> vector<8x16xf32>
    %160 = arith.mulf %157, %159 : vector<8x16xf32>
    %161 = math.log %115 : vector<8x16xf32>
    %cst_43 = arith.constant 2.000000e+00 : f32
    %162 = vector.broadcast %cst_43 : f32 to vector<8x16xf32>
    %163 = arith.mulf %162, %161 : vector<8x16xf32>
    %164 = arith.addf %160, %163 : vector<8x16xf32>
    %cst_44 = arith.constant 1.83787704 : f32
    %165 = vector.broadcast %cst_44 : f32 to vector<8x16xf32>
    %166 = arith.addf %164, %165 : vector<8x16xf32>
    %167 = arith.addf %42, %166 : vector<8x16xf32>
    %c8_45 = arith.constant 8 : index
    %c0_46 = arith.constant 0 : index
    %168 = vector.load %arg9[%c8_45, %c0_46] : memref<56x192xf32, #tpu.memory_space<vmem>>, vector<8x192xf32>
    %c16 = arith.constant 16 : index
    %c0_47 = arith.constant 0 : index
    %169 = vector.load %arg0[%c16, %c0_47] : memref<64x16xf32, #tpu.memory_space<vmem>>, vector<8x16xf32>
    %c8_48 = arith.constant 8 : index
    %c0_49 = arith.constant 0 : index
    %170 = vector.load %arg1[%c8_48, %c0_49] : memref<56x16xf32, #tpu.memory_space<vmem>>, vector<8x16xf32>
    %cst_50 = arith.constant dense<0.000000e+00> : vector<8x192xf32>
    %171 = tpu.matmul %139, %1, %cst_50 {dimension_numbers = #tpu.dot_dimension_numbers<[1], [0], [0], [1], [0, 0, 1, 1], [], []>} : vector<8x32xbf16>, vector<32x192xbf16>, vector<8x192xf32> -> vector<8x192xf32>
    %172 = vector.extract_strided_slice %171 {offsets = [0, 96], sizes = [8, 96], strides = [1, 1]} : vector<8x192xf32> to vector<8x96xf32>
    %173 = arith.addf %172, %13 : vector<8x96xf32>
    %174 = vector.extract_strided_slice %168 {offsets = [0, 0], sizes = [8, 96], strides = [1, 1]} : vector<8x192xf32> to vector<8x96xf32>
    %175 = vector.extract_strided_slice %171 {offsets = [0, 0], sizes = [8, 96], strides = [1, 1]} : vector<8x192xf32> to vector<8x96xf32>
    %176 = arith.addf %174, %175 : vector<8x96xf32>
    %177 = vector.extract_strided_slice %176 {offsets = [0, 0], sizes = [8, 64], strides = [1, 1]} : vector<8x96xf32> to vector<8x64xf32>
    %cst_51 = arith.constant 0.000000e+00 : f32
    %178 = vector.broadcast %cst_51 : f32 to vector<8x64xf32>
    %179 = arith.maximumf %177, %178 : vector<8x64xf32>
    %180 = arith.truncf %179 : vector<8x64xf32> to vector<8x64xbf16>
    %cst_52 = arith.constant dense<0.000000e+00> : vector<8x64xf32>
    %181 = tpu.matmul %180, %3, %cst_52 {dimension_numbers = #tpu.dot_dimension_numbers<[1], [0], [0], [1], [0, 0, 1, 1], [], []>} : vector<8x64xbf16>, vector<64x64xbf16>, vector<8x64xf32> -> vector<8x64xf32>
    %182 = arith.addf %181, %16 : vector<8x64xf32>
    %cst_53 = arith.constant 0.000000e+00 : f32
    %183 = vector.broadcast %cst_53 : f32 to vector<8x64xf32>
    %184 = arith.maximumf %182, %183 : vector<8x64xf32>
    %185 = arith.truncf %184 : vector<8x64xf32> to vector<8x64xbf16>
    %cst_54 = arith.constant dense<0.000000e+00> : vector<8x64xf32>
    %186 = tpu.matmul %185, %4, %cst_54 {dimension_numbers = #tpu.dot_dimension_numbers<[1], [0], [0], [1], [0, 0, 1, 1], [], []>} : vector<8x64xbf16>, vector<64x64xbf16>, vector<8x64xf32> -> vector<8x64xf32>
    %187 = arith.addf %186, %19 : vector<8x64xf32>
    %188 = vector.extract_strided_slice %187 {offsets = [0, 32], sizes = [8, 32], strides = [1, 1]} : vector<8x64xf32> to vector<8x32xf32>
    %cst_55 = arith.constant 0.000000e+00 : f32
    %189 = vector.broadcast %cst_55 : f32 to vector<8x32xf32>
    %190 = arith.maximumf %188, %189 : vector<8x32xf32>
    %191 = vector.broadcast %cst_55 : f32 to vector<8x32xf32>
    %192 = arith.subf %188, %191 : vector<8x32xf32>
    %193 = arith.cmpf one, %192, %192 : vector<8x32xf32>
    %194 = vector.broadcast %cst_55 : f32 to vector<8x32xf32>
    %195 = arith.addf %188, %194 : vector<8x32xf32>
    %196 = math.absf %192 : vector<8x32xf32>
    %cst_56 = arith.constant 0.000000e+00 : f32
    %197 = vector.broadcast %cst_56 : f32 to vector<8x32xf32>
    %198 = arith.subf %197, %196 : vector<8x32xf32>
    %199 = math.exp %198 : vector<8x32xf32>
    %200 = math.log1p %199 : vector<8x32xf32>
    %201 = arith.addf %190, %200 : vector<8x32xf32>
    %202 = arith.select %193, %195, %201 : vector<8x32xi1>, vector<8x32xf32>
    %203 = math.log %202 : vector<8x32xf32>
    %204 = vector.extract_strided_slice %187 {offsets = [0, 0], sizes = [8, 16], strides = [1, 1]} : vector<8x64xf32> to vector<8x16xf32>
    %205 = vector.extract_strided_slice %187 {offsets = [0, 16], sizes = [8, 16], strides = [1, 1]} : vector<8x64xf32> to vector<8x16xf32>
    %206 = vector.extract_strided_slice %202 {offsets = [0, 0], sizes = [8, 16], strides = [1, 1]} : vector<8x32xf32> to vector<8x16xf32>
    %207 = vector.extract_strided_slice %202 {offsets = [0, 16], sizes = [8, 16], strides = [1, 1]} : vector<8x32xf32> to vector<8x16xf32>
    %208 = arith.mulf %206, %170 : vector<8x16xf32>
    %209 = arith.addf %204, %208 : vector<8x16xf32>
    %210 = arith.truncf %209 : vector<8x16xf32> to vector<8x16xbf16>
    %cst_57 = arith.constant dense<0.000000e+00> : vector<8x128xf32>
    %211 = tpu.matmul %210, %5, %cst_57 {dimension_numbers = #tpu.dot_dimension_numbers<[1], [0], [0], [1], [0, 0, 1, 1], [], []>} : vector<8x16xbf16>, vector<16x128xbf16>, vector<8x128xf32> -> vector<8x128xf32>
    %212 = vector.extract_strided_slice %176 {offsets = [0, 64], sizes = [8, 32], strides = [1, 1]} : vector<8x96xf32> to vector<8x32xf32>
    %213 = vector.extract_strided_slice %211 {offsets = [0, 0], sizes = [8, 32], strides = [1, 1]} : vector<8x128xf32> to vector<8x32xf32>
    %214 = arith.addf %212, %213 : vector<8x32xf32>
    %cst_58 = arith.constant 0.000000e+00 : f32
    %215 = vector.broadcast %cst_58 : f32 to vector<8x32xf32>
    %216 = arith.maximumf %214, %215 : vector<8x32xf32>
    %217 = arith.truncf %216 : vector<8x32xf32> to vector<8x32xbf16>
    %cst_59 = arith.constant dense<0.000000e+00> : vector<8x32xf32>
    %218 = tpu.matmul %217, %7, %cst_59 {dimension_numbers = #tpu.dot_dimension_numbers<[1], [0], [0], [1], [0, 0, 1, 1], [], []>} : vector<8x32xbf16>, vector<32x32xbf16>, vector<8x32xf32> -> vector<8x32xf32>
    %219 = arith.addf %218, %22 : vector<8x32xf32>
    %cst_60 = arith.constant 0.000000e+00 : f32
    %220 = vector.broadcast %cst_60 : f32 to vector<8x32xf32>
    %221 = arith.maximumf %219, %220 : vector<8x32xf32>
    %222 = arith.truncf %221 : vector<8x32xf32> to vector<8x32xbf16>
    %cst_61 = arith.constant dense<0.000000e+00> : vector<8x32xf32>
    %223 = tpu.matmul %222, %8, %cst_61 {dimension_numbers = #tpu.dot_dimension_numbers<[1], [0], [0], [1], [0, 0, 1, 1], [], []>} : vector<8x32xbf16>, vector<32x32xbf16>, vector<8x32xf32> -> vector<8x32xf32>
    %224 = arith.addf %223, %25 : vector<8x32xf32>
    %225 = vector.extract_strided_slice %224 {offsets = [0, 0], sizes = [8, 16], strides = [1, 1]} : vector<8x32xf32> to vector<8x16xf32>
    %226 = vector.extract_strided_slice %224 {offsets = [0, 16], sizes = [8, 16], strides = [1, 1]} : vector<8x32xf32> to vector<8x16xf32>
    %cst_62 = arith.constant 0.000000e+00 : f32
    %227 = vector.broadcast %cst_62 : f32 to vector<8x16xf32>
    %228 = arith.maximumf %226, %227 : vector<8x16xf32>
    %229 = vector.broadcast %cst_62 : f32 to vector<8x16xf32>
    %230 = arith.subf %226, %229 : vector<8x16xf32>
    %231 = arith.cmpf one, %230, %230 : vector<8x16xf32>
    %232 = vector.broadcast %cst_62 : f32 to vector<8x16xf32>
    %233 = arith.addf %226, %232 : vector<8x16xf32>
    %234 = math.absf %230 : vector<8x16xf32>
    %cst_63 = arith.constant 0.000000e+00 : f32
    %235 = vector.broadcast %cst_63 : f32 to vector<8x16xf32>
    %236 = arith.subf %235, %234 : vector<8x16xf32>
    %237 = math.exp %236 : vector<8x16xf32>
    %238 = math.log1p %237 : vector<8x16xf32>
    %239 = arith.addf %228, %238 : vector<8x16xf32>
    %240 = arith.select %231, %233, %239 : vector<8x16xi1>, vector<8x16xf32>
    %241 = vector.extract_strided_slice %168 {offsets = [0, 96], sizes = [8, 96], strides = [1, 1]} : vector<8x192xf32> to vector<8x96xf32>
    %242 = vector.extract_strided_slice %211 {offsets = [0, 32], sizes = [8, 96], strides = [1, 1]} : vector<8x128xf32> to vector<8x96xf32>
    %243 = arith.addf %241, %242 : vector<8x96xf32>
    %244 = vector.extract_strided_slice %243 {offsets = [0, 0], sizes = [8, 64], strides = [1, 1]} : vector<8x96xf32> to vector<8x64xf32>
    %245 = vector.extract_strided_slice %173 {offsets = [0, 0], sizes = [8, 64], strides = [1, 1]} : vector<8x96xf32> to vector<8x64xf32>
    %246 = arith.addf %244, %245 : vector<8x64xf32>
    %247 = arith.negf %246 : vector<8x64xf32>
    %248 = math.exp %247 : vector<8x64xf32>
    %cst_64 = arith.constant 1.000000e+00 : f32
    %249 = vector.broadcast %cst_64 : f32 to vector<8x64xf32>
    %250 = arith.addf %249, %248 : vector<8x64xf32>
    %251 = arith.divf %249, %250 : vector<8x64xf32>
    %252 = vector.extract_strided_slice %251 {offsets = [0, 0], sizes = [8, 32], strides = [1, 1]} : vector<8x64xf32> to vector<8x32xf32>
    %253 = vector.extract_strided_slice %251 {offsets = [0, 32], sizes = [8, 32], strides = [1, 1]} : vector<8x64xf32> to vector<8x32xf32>
    %254 = vector.extract_strided_slice %243 {offsets = [0, 64], sizes = [8, 32], strides = [1, 1]} : vector<8x96xf32> to vector<8x32xf32>
    %255 = vector.extract_strided_slice %173 {offsets = [0, 64], sizes = [8, 32], strides = [1, 1]} : vector<8x96xf32> to vector<8x32xf32>
    %256 = arith.mulf %252, %255 : vector<8x32xf32>
    %257 = arith.addf %254, %256 : vector<8x32xf32>
    %258 = math.tanh %257 : vector<8x32xf32>
    %cst_65 = arith.constant 1.000000e+00 : f32
    %259 = vector.broadcast %cst_65 : f32 to vector<8x32xf32>
    %260 = arith.subf %259, %253 : vector<8x32xf32>
    %261 = arith.mulf %260, %258 : vector<8x32xf32>
    %262 = arith.mulf %253, %138 : vector<8x32xf32>
    %263 = arith.addf %261, %262 : vector<8x32xf32>
    %264 = arith.truncf %263 : vector<8x32xf32> to vector<8x32xbf16>
    %265 = arith.subf %204, %205 : vector<8x16xf32>
    %266 = vector.extract_strided_slice %203 {offsets = [0, 16], sizes = [8, 16], strides = [1, 1]} : vector<8x32xf32> to vector<8x16xf32>
    %267 = vector.extract_strided_slice %203 {offsets = [0, 0], sizes = [8, 16], strides = [1, 1]} : vector<8x32xf32> to vector<8x16xf32>
    %268 = arith.subf %266, %267 : vector<8x16xf32>
    %cst_66 = arith.constant 2.000000e+00 : f32
    %269 = vector.broadcast %cst_66 : f32 to vector<8x16xf32>
    %270 = arith.mulf %269, %268 : vector<8x16xf32>
    %271 = arith.mulf %206, %206 : vector<8x16xf32>
    %272 = arith.mulf %265, %265 : vector<8x16xf32>
    %273 = arith.addf %271, %272 : vector<8x16xf32>
    %274 = arith.mulf %207, %207 : vector<8x16xf32>
    %275 = tpu.reciprocal %274 {approx = true} : vector<8x16xf32> -> vector<8x16xf32>
    %276 = arith.mulf %273, %275 : vector<8x16xf32>
    %277 = arith.addf %270, %276 : vector<8x16xf32>
    %cst_67 = arith.constant 1.000000e+00 : f32
    %278 = vector.broadcast %cst_67 : f32 to vector<8x16xf32>
    %279 = arith.subf %277, %278 : vector<8x16xf32>
    %280 = arith.addf %155, %279 : vector<8x16xf32>
    %281 = arith.subf %169, %225 : vector<8x16xf32>
    %282 = arith.mulf %281, %281 : vector<8x16xf32>
    %283 = arith.mulf %240, %240 : vector<8x16xf32>
    %284 = tpu.reciprocal %283 {approx = true} : vector<8x16xf32> -> vector<8x16xf32>
    %285 = arith.mulf %282, %284 : vector<8x16xf32>
    %286 = math.log %240 : vector<8x16xf32>
    %cst_68 = arith.constant 2.000000e+00 : f32
    %287 = vector.broadcast %cst_68 : f32 to vector<8x16xf32>
    %288 = arith.mulf %287, %286 : vector<8x16xf32>
    %289 = arith.addf %285, %288 : vector<8x16xf32>
    %cst_69 = arith.constant 1.83787704 : f32
    %290 = vector.broadcast %cst_69 : f32 to vector<8x16xf32>
    %291 = arith.addf %289, %290 : vector<8x16xf32>
    %292 = arith.addf %167, %291 : vector<8x16xf32>
    %c16_70 = arith.constant 16 : index
    %c0_71 = arith.constant 0 : index
    %293 = vector.load %arg9[%c16_70, %c0_71] : memref<56x192xf32, #tpu.memory_space<vmem>>, vector<8x192xf32>
    %c24 = arith.constant 24 : index
    %c0_72 = arith.constant 0 : index
    %294 = vector.load %arg0[%c24, %c0_72] : memref<64x16xf32, #tpu.memory_space<vmem>>, vector<8x16xf32>
    %c16_73 = arith.constant 16 : index
    %c0_74 = arith.constant 0 : index
    %295 = vector.load %arg1[%c16_73, %c0_74] : memref<56x16xf32, #tpu.memory_space<vmem>>, vector<8x16xf32>
    %cst_75 = arith.constant dense<0.000000e+00> : vector<8x192xf32>
    %296 = tpu.matmul %264, %1, %cst_75 {dimension_numbers = #tpu.dot_dimension_numbers<[1], [0], [0], [1], [0, 0, 1, 1], [], []>} : vector<8x32xbf16>, vector<32x192xbf16>, vector<8x192xf32> -> vector<8x192xf32>
    %297 = vector.extract_strided_slice %296 {offsets = [0, 96], sizes = [8, 96], strides = [1, 1]} : vector<8x192xf32> to vector<8x96xf32>
    %298 = arith.addf %297, %13 : vector<8x96xf32>
    %299 = vector.extract_strided_slice %293 {offsets = [0, 0], sizes = [8, 96], strides = [1, 1]} : vector<8x192xf32> to vector<8x96xf32>
    %300 = vector.extract_strided_slice %296 {offsets = [0, 0], sizes = [8, 96], strides = [1, 1]} : vector<8x192xf32> to vector<8x96xf32>
    %301 = arith.addf %299, %300 : vector<8x96xf32>
    %302 = vector.extract_strided_slice %301 {offsets = [0, 0], sizes = [8, 64], strides = [1, 1]} : vector<8x96xf32> to vector<8x64xf32>
    %cst_76 = arith.constant 0.000000e+00 : f32
    %303 = vector.broadcast %cst_76 : f32 to vector<8x64xf32>
    %304 = arith.maximumf %302, %303 : vector<8x64xf32>
    %305 = arith.truncf %304 : vector<8x64xf32> to vector<8x64xbf16>
    %cst_77 = arith.constant dense<0.000000e+00> : vector<8x64xf32>
    %306 = tpu.matmul %305, %3, %cst_77 {dimension_numbers = #tpu.dot_dimension_numbers<[1], [0], [0], [1], [0, 0, 1, 1], [], []>} : vector<8x64xbf16>, vector<64x64xbf16>, vector<8x64xf32> -> vector<8x64xf32>
    %307 = arith.addf %306, %16 : vector<8x64xf32>
    %cst_78 = arith.constant 0.000000e+00 : f32
    %308 = vector.broadcast %cst_78 : f32 to vector<8x64xf32>
    %309 = arith.maximumf %307, %308 : vector<8x64xf32>
    %310 = arith.truncf %309 : vector<8x64xf32> to vector<8x64xbf16>
    %cst_79 = arith.constant dense<0.000000e+00> : vector<8x64xf32>
    %311 = tpu.matmul %310, %4, %cst_79 {dimension_numbers = #tpu.dot_dimension_numbers<[1], [0], [0], [1], [0, 0, 1, 1], [], []>} : vector<8x64xbf16>, vector<64x64xbf16>, vector<8x64xf32> -> vector<8x64xf32>
    %312 = arith.addf %311, %19 : vector<8x64xf32>
    %313 = vector.extract_strided_slice %312 {offsets = [0, 32], sizes = [8, 32], strides = [1, 1]} : vector<8x64xf32> to vector<8x32xf32>
    %cst_80 = arith.constant 0.000000e+00 : f32
    %314 = vector.broadcast %cst_80 : f32 to vector<8x32xf32>
    %315 = arith.maximumf %313, %314 : vector<8x32xf32>
    %316 = vector.broadcast %cst_80 : f32 to vector<8x32xf32>
    %317 = arith.subf %313, %316 : vector<8x32xf32>
    %318 = arith.cmpf one, %317, %317 : vector<8x32xf32>
    %319 = vector.broadcast %cst_80 : f32 to vector<8x32xf32>
    %320 = arith.addf %313, %319 : vector<8x32xf32>
    %321 = math.absf %317 : vector<8x32xf32>
    %cst_81 = arith.constant 0.000000e+00 : f32
    %322 = vector.broadcast %cst_81 : f32 to vector<8x32xf32>
    %323 = arith.subf %322, %321 : vector<8x32xf32>
    %324 = math.exp %323 : vector<8x32xf32>
    %325 = math.log1p %324 : vector<8x32xf32>
    %326 = arith.addf %315, %325 : vector<8x32xf32>
    %327 = arith.select %318, %320, %326 : vector<8x32xi1>, vector<8x32xf32>
    %328 = math.log %327 : vector<8x32xf32>
    %329 = vector.extract_strided_slice %312 {offsets = [0, 0], sizes = [8, 16], strides = [1, 1]} : vector<8x64xf32> to vector<8x16xf32>
    %330 = vector.extract_strided_slice %312 {offsets = [0, 16], sizes = [8, 16], strides = [1, 1]} : vector<8x64xf32> to vector<8x16xf32>
    %331 = vector.extract_strided_slice %327 {offsets = [0, 0], sizes = [8, 16], strides = [1, 1]} : vector<8x32xf32> to vector<8x16xf32>
    %332 = vector.extract_strided_slice %327 {offsets = [0, 16], sizes = [8, 16], strides = [1, 1]} : vector<8x32xf32> to vector<8x16xf32>
    %333 = arith.mulf %331, %295 : vector<8x16xf32>
    %334 = arith.addf %329, %333 : vector<8x16xf32>
    %335 = arith.truncf %334 : vector<8x16xf32> to vector<8x16xbf16>
    %cst_82 = arith.constant dense<0.000000e+00> : vector<8x128xf32>
    %336 = tpu.matmul %335, %5, %cst_82 {dimension_numbers = #tpu.dot_dimension_numbers<[1], [0], [0], [1], [0, 0, 1, 1], [], []>} : vector<8x16xbf16>, vector<16x128xbf16>, vector<8x128xf32> -> vector<8x128xf32>
    %337 = vector.extract_strided_slice %301 {offsets = [0, 64], sizes = [8, 32], strides = [1, 1]} : vector<8x96xf32> to vector<8x32xf32>
    %338 = vector.extract_strided_slice %336 {offsets = [0, 0], sizes = [8, 32], strides = [1, 1]} : vector<8x128xf32> to vector<8x32xf32>
    %339 = arith.addf %337, %338 : vector<8x32xf32>
    %cst_83 = arith.constant 0.000000e+00 : f32
    %340 = vector.broadcast %cst_83 : f32 to vector<8x32xf32>
    %341 = arith.maximumf %339, %340 : vector<8x32xf32>
    %342 = arith.truncf %341 : vector<8x32xf32> to vector<8x32xbf16>
    %cst_84 = arith.constant dense<0.000000e+00> : vector<8x32xf32>
    %343 = tpu.matmul %342, %7, %cst_84 {dimension_numbers = #tpu.dot_dimension_numbers<[1], [0], [0], [1], [0, 0, 1, 1], [], []>} : vector<8x32xbf16>, vector<32x32xbf16>, vector<8x32xf32> -> vector<8x32xf32>
    %344 = arith.addf %343, %22 : vector<8x32xf32>
    %cst_85 = arith.constant 0.000000e+00 : f32
    %345 = vector.broadcast %cst_85 : f32 to vector<8x32xf32>
    %346 = arith.maximumf %344, %345 : vector<8x32xf32>
    %347 = arith.truncf %346 : vector<8x32xf32> to vector<8x32xbf16>
    %cst_86 = arith.constant dense<0.000000e+00> : vector<8x32xf32>
    %348 = tpu.matmul %347, %8, %cst_86 {dimension_numbers = #tpu.dot_dimension_numbers<[1], [0], [0], [1], [0, 0, 1, 1], [], []>} : vector<8x32xbf16>, vector<32x32xbf16>, vector<8x32xf32> -> vector<8x32xf32>
    %349 = arith.addf %348, %25 : vector<8x32xf32>
    %350 = vector.extract_strided_slice %349 {offsets = [0, 0], sizes = [8, 16], strides = [1, 1]} : vector<8x32xf32> to vector<8x16xf32>
    %351 = vector.extract_strided_slice %349 {offsets = [0, 16], sizes = [8, 16], strides = [1, 1]} : vector<8x32xf32> to vector<8x16xf32>
    %cst_87 = arith.constant 0.000000e+00 : f32
    %352 = vector.broadcast %cst_87 : f32 to vector<8x16xf32>
    %353 = arith.maximumf %351, %352 : vector<8x16xf32>
    %354 = vector.broadcast %cst_87 : f32 to vector<8x16xf32>
    %355 = arith.subf %351, %354 : vector<8x16xf32>
    %356 = arith.cmpf one, %355, %355 : vector<8x16xf32>
    %357 = vector.broadcast %cst_87 : f32 to vector<8x16xf32>
    %358 = arith.addf %351, %357 : vector<8x16xf32>
    %359 = math.absf %355 : vector<8x16xf32>
    %cst_88 = arith.constant 0.000000e+00 : f32
    %360 = vector.broadcast %cst_88 : f32 to vector<8x16xf32>
    %361 = arith.subf %360, %359 : vector<8x16xf32>
    %362 = math.exp %361 : vector<8x16xf32>
    %363 = math.log1p %362 : vector<8x16xf32>
    %364 = arith.addf %353, %363 : vector<8x16xf32>
    %365 = arith.select %356, %358, %364 : vector<8x16xi1>, vector<8x16xf32>
    %366 = vector.extract_strided_slice %293 {offsets = [0, 96], sizes = [8, 96], strides = [1, 1]} : vector<8x192xf32> to vector<8x96xf32>
    %367 = vector.extract_strided_slice %336 {offsets = [0, 32], sizes = [8, 96], strides = [1, 1]} : vector<8x128xf32> to vector<8x96xf32>
    %368 = arith.addf %366, %367 : vector<8x96xf32>
    %369 = vector.extract_strided_slice %368 {offsets = [0, 0], sizes = [8, 64], strides = [1, 1]} : vector<8x96xf32> to vector<8x64xf32>
    %370 = vector.extract_strided_slice %298 {offsets = [0, 0], sizes = [8, 64], strides = [1, 1]} : vector<8x96xf32> to vector<8x64xf32>
    %371 = arith.addf %369, %370 : vector<8x64xf32>
    %372 = arith.negf %371 : vector<8x64xf32>
    %373 = math.exp %372 : vector<8x64xf32>
    %cst_89 = arith.constant 1.000000e+00 : f32
    %374 = vector.broadcast %cst_89 : f32 to vector<8x64xf32>
    %375 = arith.addf %374, %373 : vector<8x64xf32>
    %376 = arith.divf %374, %375 : vector<8x64xf32>
    %377 = vector.extract_strided_slice %376 {offsets = [0, 0], sizes = [8, 32], strides = [1, 1]} : vector<8x64xf32> to vector<8x32xf32>
    %378 = vector.extract_strided_slice %376 {offsets = [0, 32], sizes = [8, 32], strides = [1, 1]} : vector<8x64xf32> to vector<8x32xf32>
    %379 = vector.extract_strided_slice %368 {offsets = [0, 64], sizes = [8, 32], strides = [1, 1]} : vector<8x96xf32> to vector<8x32xf32>
    %380 = vector.extract_strided_slice %298 {offsets = [0, 64], sizes = [8, 32], strides = [1, 1]} : vector<8x96xf32> to vector<8x32xf32>
    %381 = arith.mulf %377, %380 : vector<8x32xf32>
    %382 = arith.addf %379, %381 : vector<8x32xf32>
    %383 = math.tanh %382 : vector<8x32xf32>
    %cst_90 = arith.constant 1.000000e+00 : f32
    %384 = vector.broadcast %cst_90 : f32 to vector<8x32xf32>
    %385 = arith.subf %384, %378 : vector<8x32xf32>
    %386 = arith.mulf %385, %383 : vector<8x32xf32>
    %387 = arith.mulf %378, %263 : vector<8x32xf32>
    %388 = arith.addf %386, %387 : vector<8x32xf32>
    %389 = arith.truncf %388 : vector<8x32xf32> to vector<8x32xbf16>
    %390 = arith.subf %329, %330 : vector<8x16xf32>
    %391 = vector.extract_strided_slice %328 {offsets = [0, 16], sizes = [8, 16], strides = [1, 1]} : vector<8x32xf32> to vector<8x16xf32>
    %392 = vector.extract_strided_slice %328 {offsets = [0, 0], sizes = [8, 16], strides = [1, 1]} : vector<8x32xf32> to vector<8x16xf32>
    %393 = arith.subf %391, %392 : vector<8x16xf32>
    %cst_91 = arith.constant 2.000000e+00 : f32
    %394 = vector.broadcast %cst_91 : f32 to vector<8x16xf32>
    %395 = arith.mulf %394, %393 : vector<8x16xf32>
    %396 = arith.mulf %331, %331 : vector<8x16xf32>
    %397 = arith.mulf %390, %390 : vector<8x16xf32>
    %398 = arith.addf %396, %397 : vector<8x16xf32>
    %399 = arith.mulf %332, %332 : vector<8x16xf32>
    %400 = tpu.reciprocal %399 {approx = true} : vector<8x16xf32> -> vector<8x16xf32>
    %401 = arith.mulf %398, %400 : vector<8x16xf32>
    %402 = arith.addf %395, %401 : vector<8x16xf32>
    %cst_92 = arith.constant 1.000000e+00 : f32
    %403 = vector.broadcast %cst_92 : f32 to vector<8x16xf32>
    %404 = arith.subf %402, %403 : vector<8x16xf32>
    %405 = arith.addf %280, %404 : vector<8x16xf32>
    %406 = arith.subf %294, %350 : vector<8x16xf32>
    %407 = arith.mulf %406, %406 : vector<8x16xf32>
    %408 = arith.mulf %365, %365 : vector<8x16xf32>
    %409 = tpu.reciprocal %408 {approx = true} : vector<8x16xf32> -> vector<8x16xf32>
    %410 = arith.mulf %407, %409 : vector<8x16xf32>
    %411 = math.log %365 : vector<8x16xf32>
    %cst_93 = arith.constant 2.000000e+00 : f32
    %412 = vector.broadcast %cst_93 : f32 to vector<8x16xf32>
    %413 = arith.mulf %412, %411 : vector<8x16xf32>
    %414 = arith.addf %410, %413 : vector<8x16xf32>
    %cst_94 = arith.constant 1.83787704 : f32
    %415 = vector.broadcast %cst_94 : f32 to vector<8x16xf32>
    %416 = arith.addf %414, %415 : vector<8x16xf32>
    %417 = arith.addf %292, %416 : vector<8x16xf32>
    %c24_95 = arith.constant 24 : index
    %c0_96 = arith.constant 0 : index
    %418 = vector.load %arg9[%c24_95, %c0_96] : memref<56x192xf32, #tpu.memory_space<vmem>>, vector<8x192xf32>
    %c32 = arith.constant 32 : index
    %c0_97 = arith.constant 0 : index
    %419 = vector.load %arg0[%c32, %c0_97] : memref<64x16xf32, #tpu.memory_space<vmem>>, vector<8x16xf32>
    %c24_98 = arith.constant 24 : index
    %c0_99 = arith.constant 0 : index
    %420 = vector.load %arg1[%c24_98, %c0_99] : memref<56x16xf32, #tpu.memory_space<vmem>>, vector<8x16xf32>
    %cst_100 = arith.constant dense<0.000000e+00> : vector<8x192xf32>
    %421 = tpu.matmul %389, %1, %cst_100 {dimension_numbers = #tpu.dot_dimension_numbers<[1], [0], [0], [1], [0, 0, 1, 1], [], []>} : vector<8x32xbf16>, vector<32x192xbf16>, vector<8x192xf32> -> vector<8x192xf32>
    %422 = vector.extract_strided_slice %421 {offsets = [0, 96], sizes = [8, 96], strides = [1, 1]} : vector<8x192xf32> to vector<8x96xf32>
    %423 = arith.addf %422, %13 : vector<8x96xf32>
    %424 = vector.extract_strided_slice %418 {offsets = [0, 0], sizes = [8, 96], strides = [1, 1]} : vector<8x192xf32> to vector<8x96xf32>
    %425 = vector.extract_strided_slice %421 {offsets = [0, 0], sizes = [8, 96], strides = [1, 1]} : vector<8x192xf32> to vector<8x96xf32>
    %426 = arith.addf %424, %425 : vector<8x96xf32>
    %427 = vector.extract_strided_slice %426 {offsets = [0, 0], sizes = [8, 64], strides = [1, 1]} : vector<8x96xf32> to vector<8x64xf32>
    %cst_101 = arith.constant 0.000000e+00 : f32
    %428 = vector.broadcast %cst_101 : f32 to vector<8x64xf32>
    %429 = arith.maximumf %427, %428 : vector<8x64xf32>
    %430 = arith.truncf %429 : vector<8x64xf32> to vector<8x64xbf16>
    %cst_102 = arith.constant dense<0.000000e+00> : vector<8x64xf32>
    %431 = tpu.matmul %430, %3, %cst_102 {dimension_numbers = #tpu.dot_dimension_numbers<[1], [0], [0], [1], [0, 0, 1, 1], [], []>} : vector<8x64xbf16>, vector<64x64xbf16>, vector<8x64xf32> -> vector<8x64xf32>
    %432 = arith.addf %431, %16 : vector<8x64xf32>
    %cst_103 = arith.constant 0.000000e+00 : f32
    %433 = vector.broadcast %cst_103 : f32 to vector<8x64xf32>
    %434 = arith.maximumf %432, %433 : vector<8x64xf32>
    %435 = arith.truncf %434 : vector<8x64xf32> to vector<8x64xbf16>
    %cst_104 = arith.constant dense<0.000000e+00> : vector<8x64xf32>
    %436 = tpu.matmul %435, %4, %cst_104 {dimension_numbers = #tpu.dot_dimension_numbers<[1], [0], [0], [1], [0, 0, 1, 1], [], []>} : vector<8x64xbf16>, vector<64x64xbf16>, vector<8x64xf32> -> vector<8x64xf32>
    %437 = arith.addf %436, %19 : vector<8x64xf32>
    %438 = vector.extract_strided_slice %437 {offsets = [0, 32], sizes = [8, 32], strides = [1, 1]} : vector<8x64xf32> to vector<8x32xf32>
    %cst_105 = arith.constant 0.000000e+00 : f32
    %439 = vector.broadcast %cst_105 : f32 to vector<8x32xf32>
    %440 = arith.maximumf %438, %439 : vector<8x32xf32>
    %441 = vector.broadcast %cst_105 : f32 to vector<8x32xf32>
    %442 = arith.subf %438, %441 : vector<8x32xf32>
    %443 = arith.cmpf one, %442, %442 : vector<8x32xf32>
    %444 = vector.broadcast %cst_105 : f32 to vector<8x32xf32>
    %445 = arith.addf %438, %444 : vector<8x32xf32>
    %446 = math.absf %442 : vector<8x32xf32>
    %cst_106 = arith.constant 0.000000e+00 : f32
    %447 = vector.broadcast %cst_106 : f32 to vector<8x32xf32>
    %448 = arith.subf %447, %446 : vector<8x32xf32>
    %449 = math.exp %448 : vector<8x32xf32>
    %450 = math.log1p %449 : vector<8x32xf32>
    %451 = arith.addf %440, %450 : vector<8x32xf32>
    %452 = arith.select %443, %445, %451 : vector<8x32xi1>, vector<8x32xf32>
    %453 = math.log %452 : vector<8x32xf32>
    %454 = vector.extract_strided_slice %437 {offsets = [0, 0], sizes = [8, 16], strides = [1, 1]} : vector<8x64xf32> to vector<8x16xf32>
    %455 = vector.extract_strided_slice %437 {offsets = [0, 16], sizes = [8, 16], strides = [1, 1]} : vector<8x64xf32> to vector<8x16xf32>
    %456 = vector.extract_strided_slice %452 {offsets = [0, 0], sizes = [8, 16], strides = [1, 1]} : vector<8x32xf32> to vector<8x16xf32>
    %457 = vector.extract_strided_slice %452 {offsets = [0, 16], sizes = [8, 16], strides = [1, 1]} : vector<8x32xf32> to vector<8x16xf32>
    %458 = arith.mulf %456, %420 : vector<8x16xf32>
    %459 = arith.addf %454, %458 : vector<8x16xf32>
    %460 = arith.truncf %459 : vector<8x16xf32> to vector<8x16xbf16>
    %cst_107 = arith.constant dense<0.000000e+00> : vector<8x128xf32>
    %461 = tpu.matmul %460, %5, %cst_107 {dimension_numbers = #tpu.dot_dimension_numbers<[1], [0], [0], [1], [0, 0, 1, 1], [], []>} : vector<8x16xbf16>, vector<16x128xbf16>, vector<8x128xf32> -> vector<8x128xf32>
    %462 = vector.extract_strided_slice %426 {offsets = [0, 64], sizes = [8, 32], strides = [1, 1]} : vector<8x96xf32> to vector<8x32xf32>
    %463 = vector.extract_strided_slice %461 {offsets = [0, 0], sizes = [8, 32], strides = [1, 1]} : vector<8x128xf32> to vector<8x32xf32>
    %464 = arith.addf %462, %463 : vector<8x32xf32>
    %cst_108 = arith.constant 0.000000e+00 : f32
    %465 = vector.broadcast %cst_108 : f32 to vector<8x32xf32>
    %466 = arith.maximumf %464, %465 : vector<8x32xf32>
    %467 = arith.truncf %466 : vector<8x32xf32> to vector<8x32xbf16>
    %cst_109 = arith.constant dense<0.000000e+00> : vector<8x32xf32>
    %468 = tpu.matmul %467, %7, %cst_109 {dimension_numbers = #tpu.dot_dimension_numbers<[1], [0], [0], [1], [0, 0, 1, 1], [], []>} : vector<8x32xbf16>, vector<32x32xbf16>, vector<8x32xf32> -> vector<8x32xf32>
    %469 = arith.addf %468, %22 : vector<8x32xf32>
    %cst_110 = arith.constant 0.000000e+00 : f32
    %470 = vector.broadcast %cst_110 : f32 to vector<8x32xf32>
    %471 = arith.maximumf %469, %470 : vector<8x32xf32>
    %472 = arith.truncf %471 : vector<8x32xf32> to vector<8x32xbf16>
    %cst_111 = arith.constant dense<0.000000e+00> : vector<8x32xf32>
    %473 = tpu.matmul %472, %8, %cst_111 {dimension_numbers = #tpu.dot_dimension_numbers<[1], [0], [0], [1], [0, 0, 1, 1], [], []>} : vector<8x32xbf16>, vector<32x32xbf16>, vector<8x32xf32> -> vector<8x32xf32>
    %474 = arith.addf %473, %25 : vector<8x32xf32>
    %475 = vector.extract_strided_slice %474 {offsets = [0, 0], sizes = [8, 16], strides = [1, 1]} : vector<8x32xf32> to vector<8x16xf32>
    %476 = vector.extract_strided_slice %474 {offsets = [0, 16], sizes = [8, 16], strides = [1, 1]} : vector<8x32xf32> to vector<8x16xf32>
    %cst_112 = arith.constant 0.000000e+00 : f32
    %477 = vector.broadcast %cst_112 : f32 to vector<8x16xf32>
    %478 = arith.maximumf %476, %477 : vector<8x16xf32>
    %479 = vector.broadcast %cst_112 : f32 to vector<8x16xf32>
    %480 = arith.subf %476, %479 : vector<8x16xf32>
    %481 = arith.cmpf one, %480, %480 : vector<8x16xf32>
    %482 = vector.broadcast %cst_112 : f32 to vector<8x16xf32>
    %483 = arith.addf %476, %482 : vector<8x16xf32>
    %484 = math.absf %480 : vector<8x16xf32>
    %cst_113 = arith.constant 0.000000e+00 : f32
    %485 = vector.broadcast %cst_113 : f32 to vector<8x16xf32>
    %486 = arith.subf %485, %484 : vector<8x16xf32>
    %487 = math.exp %486 : vector<8x16xf32>
    %488 = math.log1p %487 : vector<8x16xf32>
    %489 = arith.addf %478, %488 : vector<8x16xf32>
    %490 = arith.select %481, %483, %489 : vector<8x16xi1>, vector<8x16xf32>
    %491 = vector.extract_strided_slice %418 {offsets = [0, 96], sizes = [8, 96], strides = [1, 1]} : vector<8x192xf32> to vector<8x96xf32>
    %492 = vector.extract_strided_slice %461 {offsets = [0, 32], sizes = [8, 96], strides = [1, 1]} : vector<8x128xf32> to vector<8x96xf32>
    %493 = arith.addf %491, %492 : vector<8x96xf32>
    %494 = vector.extract_strided_slice %493 {offsets = [0, 0], sizes = [8, 64], strides = [1, 1]} : vector<8x96xf32> to vector<8x64xf32>
    %495 = vector.extract_strided_slice %423 {offsets = [0, 0], sizes = [8, 64], strides = [1, 1]} : vector<8x96xf32> to vector<8x64xf32>
    %496 = arith.addf %494, %495 : vector<8x64xf32>
    %497 = arith.negf %496 : vector<8x64xf32>
    %498 = math.exp %497 : vector<8x64xf32>
    %cst_114 = arith.constant 1.000000e+00 : f32
    %499 = vector.broadcast %cst_114 : f32 to vector<8x64xf32>
    %500 = arith.addf %499, %498 : vector<8x64xf32>
    %501 = arith.divf %499, %500 : vector<8x64xf32>
    %502 = vector.extract_strided_slice %501 {offsets = [0, 0], sizes = [8, 32], strides = [1, 1]} : vector<8x64xf32> to vector<8x32xf32>
    %503 = vector.extract_strided_slice %501 {offsets = [0, 32], sizes = [8, 32], strides = [1, 1]} : vector<8x64xf32> to vector<8x32xf32>
    %504 = vector.extract_strided_slice %493 {offsets = [0, 64], sizes = [8, 32], strides = [1, 1]} : vector<8x96xf32> to vector<8x32xf32>
    %505 = vector.extract_strided_slice %423 {offsets = [0, 64], sizes = [8, 32], strides = [1, 1]} : vector<8x96xf32> to vector<8x32xf32>
    %506 = arith.mulf %502, %505 : vector<8x32xf32>
    %507 = arith.addf %504, %506 : vector<8x32xf32>
    %508 = math.tanh %507 : vector<8x32xf32>
    %cst_115 = arith.constant 1.000000e+00 : f32
    %509 = vector.broadcast %cst_115 : f32 to vector<8x32xf32>
    %510 = arith.subf %509, %503 : vector<8x32xf32>
    %511 = arith.mulf %510, %508 : vector<8x32xf32>
    %512 = arith.mulf %503, %388 : vector<8x32xf32>
    %513 = arith.addf %511, %512 : vector<8x32xf32>
    %514 = arith.truncf %513 : vector<8x32xf32> to vector<8x32xbf16>
    %515 = arith.subf %454, %455 : vector<8x16xf32>
    %516 = vector.extract_strided_slice %453 {offsets = [0, 16], sizes = [8, 16], strides = [1, 1]} : vector<8x32xf32> to vector<8x16xf32>
    %517 = vector.extract_strided_slice %453 {offsets = [0, 0], sizes = [8, 16], strides = [1, 1]} : vector<8x32xf32> to vector<8x16xf32>
    %518 = arith.subf %516, %517 : vector<8x16xf32>
    %cst_116 = arith.constant 2.000000e+00 : f32
    %519 = vector.broadcast %cst_116 : f32 to vector<8x16xf32>
    %520 = arith.mulf %519, %518 : vector<8x16xf32>
    %521 = arith.mulf %456, %456 : vector<8x16xf32>
    %522 = arith.mulf %515, %515 : vector<8x16xf32>
    %523 = arith.addf %521, %522 : vector<8x16xf32>
    %524 = arith.mulf %457, %457 : vector<8x16xf32>
    %525 = tpu.reciprocal %524 {approx = true} : vector<8x16xf32> -> vector<8x16xf32>
    %526 = arith.mulf %523, %525 : vector<8x16xf32>
    %527 = arith.addf %520, %526 : vector<8x16xf32>
    %cst_117 = arith.constant 1.000000e+00 : f32
    %528 = vector.broadcast %cst_117 : f32 to vector<8x16xf32>
    %529 = arith.subf %527, %528 : vector<8x16xf32>
    %530 = arith.addf %405, %529 : vector<8x16xf32>
    %531 = arith.subf %419, %475 : vector<8x16xf32>
    %532 = arith.mulf %531, %531 : vector<8x16xf32>
    %533 = arith.mulf %490, %490 : vector<8x16xf32>
    %534 = tpu.reciprocal %533 {approx = true} : vector<8x16xf32> -> vector<8x16xf32>
    %535 = arith.mulf %532, %534 : vector<8x16xf32>
    %536 = math.log %490 : vector<8x16xf32>
    %cst_118 = arith.constant 2.000000e+00 : f32
    %537 = vector.broadcast %cst_118 : f32 to vector<8x16xf32>
    %538 = arith.mulf %537, %536 : vector<8x16xf32>
    %539 = arith.addf %535, %538 : vector<8x16xf32>
    %cst_119 = arith.constant 1.83787704 : f32
    %540 = vector.broadcast %cst_119 : f32 to vector<8x16xf32>
    %541 = arith.addf %539, %540 : vector<8x16xf32>
    %542 = arith.addf %417, %541 : vector<8x16xf32>
    %c32_120 = arith.constant 32 : index
    %c0_121 = arith.constant 0 : index
    %543 = vector.load %arg9[%c32_120, %c0_121] : memref<56x192xf32, #tpu.memory_space<vmem>>, vector<8x192xf32>
    %c40 = arith.constant 40 : index
    %c0_122 = arith.constant 0 : index
    %544 = vector.load %arg0[%c40, %c0_122] : memref<64x16xf32, #tpu.memory_space<vmem>>, vector<8x16xf32>
    %c32_123 = arith.constant 32 : index
    %c0_124 = arith.constant 0 : index
    %545 = vector.load %arg1[%c32_123, %c0_124] : memref<56x16xf32, #tpu.memory_space<vmem>>, vector<8x16xf32>
    %cst_125 = arith.constant dense<0.000000e+00> : vector<8x192xf32>
    %546 = tpu.matmul %514, %1, %cst_125 {dimension_numbers = #tpu.dot_dimension_numbers<[1], [0], [0], [1], [0, 0, 1, 1], [], []>} : vector<8x32xbf16>, vector<32x192xbf16>, vector<8x192xf32> -> vector<8x192xf32>
    %547 = vector.extract_strided_slice %546 {offsets = [0, 96], sizes = [8, 96], strides = [1, 1]} : vector<8x192xf32> to vector<8x96xf32>
    %548 = arith.addf %547, %13 : vector<8x96xf32>
    %549 = vector.extract_strided_slice %543 {offsets = [0, 0], sizes = [8, 96], strides = [1, 1]} : vector<8x192xf32> to vector<8x96xf32>
    %550 = vector.extract_strided_slice %546 {offsets = [0, 0], sizes = [8, 96], strides = [1, 1]} : vector<8x192xf32> to vector<8x96xf32>
    %551 = arith.addf %549, %550 : vector<8x96xf32>
    %552 = vector.extract_strided_slice %551 {offsets = [0, 0], sizes = [8, 64], strides = [1, 1]} : vector<8x96xf32> to vector<8x64xf32>
    %cst_126 = arith.constant 0.000000e+00 : f32
    %553 = vector.broadcast %cst_126 : f32 to vector<8x64xf32>
    %554 = arith.maximumf %552, %553 : vector<8x64xf32>
    %555 = arith.truncf %554 : vector<8x64xf32> to vector<8x64xbf16>
    %cst_127 = arith.constant dense<0.000000e+00> : vector<8x64xf32>
    %556 = tpu.matmul %555, %3, %cst_127 {dimension_numbers = #tpu.dot_dimension_numbers<[1], [0], [0], [1], [0, 0, 1, 1], [], []>} : vector<8x64xbf16>, vector<64x64xbf16>, vector<8x64xf32> -> vector<8x64xf32>
    %557 = arith.addf %556, %16 : vector<8x64xf32>
    %cst_128 = arith.constant 0.000000e+00 : f32
    %558 = vector.broadcast %cst_128 : f32 to vector<8x64xf32>
    %559 = arith.maximumf %557, %558 : vector<8x64xf32>
    %560 = arith.truncf %559 : vector<8x64xf32> to vector<8x64xbf16>
    %cst_129 = arith.constant dense<0.000000e+00> : vector<8x64xf32>
    %561 = tpu.matmul %560, %4, %cst_129 {dimension_numbers = #tpu.dot_dimension_numbers<[1], [0], [0], [1], [0, 0, 1, 1], [], []>} : vector<8x64xbf16>, vector<64x64xbf16>, vector<8x64xf32> -> vector<8x64xf32>
    %562 = arith.addf %561, %19 : vector<8x64xf32>
    %563 = vector.extract_strided_slice %562 {offsets = [0, 32], sizes = [8, 32], strides = [1, 1]} : vector<8x64xf32> to vector<8x32xf32>
    %cst_130 = arith.constant 0.000000e+00 : f32
    %564 = vector.broadcast %cst_130 : f32 to vector<8x32xf32>
    %565 = arith.maximumf %563, %564 : vector<8x32xf32>
    %566 = vector.broadcast %cst_130 : f32 to vector<8x32xf32>
    %567 = arith.subf %563, %566 : vector<8x32xf32>
    %568 = arith.cmpf one, %567, %567 : vector<8x32xf32>
    %569 = vector.broadcast %cst_130 : f32 to vector<8x32xf32>
    %570 = arith.addf %563, %569 : vector<8x32xf32>
    %571 = math.absf %567 : vector<8x32xf32>
    %cst_131 = arith.constant 0.000000e+00 : f32
    %572 = vector.broadcast %cst_131 : f32 to vector<8x32xf32>
    %573 = arith.subf %572, %571 : vector<8x32xf32>
    %574 = math.exp %573 : vector<8x32xf32>
    %575 = math.log1p %574 : vector<8x32xf32>
    %576 = arith.addf %565, %575 : vector<8x32xf32>
    %577 = arith.select %568, %570, %576 : vector<8x32xi1>, vector<8x32xf32>
    %578 = math.log %577 : vector<8x32xf32>
    %579 = vector.extract_strided_slice %562 {offsets = [0, 0], sizes = [8, 16], strides = [1, 1]} : vector<8x64xf32> to vector<8x16xf32>
    %580 = vector.extract_strided_slice %562 {offsets = [0, 16], sizes = [8, 16], strides = [1, 1]} : vector<8x64xf32> to vector<8x16xf32>
    %581 = vector.extract_strided_slice %577 {offsets = [0, 0], sizes = [8, 16], strides = [1, 1]} : vector<8x32xf32> to vector<8x16xf32>
    %582 = vector.extract_strided_slice %577 {offsets = [0, 16], sizes = [8, 16], strides = [1, 1]} : vector<8x32xf32> to vector<8x16xf32>
    %583 = arith.mulf %581, %545 : vector<8x16xf32>
    %584 = arith.addf %579, %583 : vector<8x16xf32>
    %585 = arith.truncf %584 : vector<8x16xf32> to vector<8x16xbf16>
    %cst_132 = arith.constant dense<0.000000e+00> : vector<8x128xf32>
    %586 = tpu.matmul %585, %5, %cst_132 {dimension_numbers = #tpu.dot_dimension_numbers<[1], [0], [0], [1], [0, 0, 1, 1], [], []>} : vector<8x16xbf16>, vector<16x128xbf16>, vector<8x128xf32> -> vector<8x128xf32>
    %587 = vector.extract_strided_slice %551 {offsets = [0, 64], sizes = [8, 32], strides = [1, 1]} : vector<8x96xf32> to vector<8x32xf32>
    %588 = vector.extract_strided_slice %586 {offsets = [0, 0], sizes = [8, 32], strides = [1, 1]} : vector<8x128xf32> to vector<8x32xf32>
    %589 = arith.addf %587, %588 : vector<8x32xf32>
    %cst_133 = arith.constant 0.000000e+00 : f32
    %590 = vector.broadcast %cst_133 : f32 to vector<8x32xf32>
    %591 = arith.maximumf %589, %590 : vector<8x32xf32>
    %592 = arith.truncf %591 : vector<8x32xf32> to vector<8x32xbf16>
    %cst_134 = arith.constant dense<0.000000e+00> : vector<8x32xf32>
    %593 = tpu.matmul %592, %7, %cst_134 {dimension_numbers = #tpu.dot_dimension_numbers<[1], [0], [0], [1], [0, 0, 1, 1], [], []>} : vector<8x32xbf16>, vector<32x32xbf16>, vector<8x32xf32> -> vector<8x32xf32>
    %594 = arith.addf %593, %22 : vector<8x32xf32>
    %cst_135 = arith.constant 0.000000e+00 : f32
    %595 = vector.broadcast %cst_135 : f32 to vector<8x32xf32>
    %596 = arith.maximumf %594, %595 : vector<8x32xf32>
    %597 = arith.truncf %596 : vector<8x32xf32> to vector<8x32xbf16>
    %cst_136 = arith.constant dense<0.000000e+00> : vector<8x32xf32>
    %598 = tpu.matmul %597, %8, %cst_136 {dimension_numbers = #tpu.dot_dimension_numbers<[1], [0], [0], [1], [0, 0, 1, 1], [], []>} : vector<8x32xbf16>, vector<32x32xbf16>, vector<8x32xf32> -> vector<8x32xf32>
    %599 = arith.addf %598, %25 : vector<8x32xf32>
    %600 = vector.extract_strided_slice %599 {offsets = [0, 0], sizes = [8, 16], strides = [1, 1]} : vector<8x32xf32> to vector<8x16xf32>
    %601 = vector.extract_strided_slice %599 {offsets = [0, 16], sizes = [8, 16], strides = [1, 1]} : vector<8x32xf32> to vector<8x16xf32>
    %cst_137 = arith.constant 0.000000e+00 : f32
    %602 = vector.broadcast %cst_137 : f32 to vector<8x16xf32>
    %603 = arith.maximumf %601, %602 : vector<8x16xf32>
    %604 = vector.broadcast %cst_137 : f32 to vector<8x16xf32>
    %605 = arith.subf %601, %604 : vector<8x16xf32>
    %606 = arith.cmpf one, %605, %605 : vector<8x16xf32>
    %607 = vector.broadcast %cst_137 : f32 to vector<8x16xf32>
    %608 = arith.addf %601, %607 : vector<8x16xf32>
    %609 = math.absf %605 : vector<8x16xf32>
    %cst_138 = arith.constant 0.000000e+00 : f32
    %610 = vector.broadcast %cst_138 : f32 to vector<8x16xf32>
    %611 = arith.subf %610, %609 : vector<8x16xf32>
    %612 = math.exp %611 : vector<8x16xf32>
    %613 = math.log1p %612 : vector<8x16xf32>
    %614 = arith.addf %603, %613 : vector<8x16xf32>
    %615 = arith.select %606, %608, %614 : vector<8x16xi1>, vector<8x16xf32>
    %616 = vector.extract_strided_slice %543 {offsets = [0, 96], sizes = [8, 96], strides = [1, 1]} : vector<8x192xf32> to vector<8x96xf32>
    %617 = vector.extract_strided_slice %586 {offsets = [0, 32], sizes = [8, 96], strides = [1, 1]} : vector<8x128xf32> to vector<8x96xf32>
    %618 = arith.addf %616, %617 : vector<8x96xf32>
    %619 = vector.extract_strided_slice %618 {offsets = [0, 0], sizes = [8, 64], strides = [1, 1]} : vector<8x96xf32> to vector<8x64xf32>
    %620 = vector.extract_strided_slice %548 {offsets = [0, 0], sizes = [8, 64], strides = [1, 1]} : vector<8x96xf32> to vector<8x64xf32>
    %621 = arith.addf %619, %620 : vector<8x64xf32>
    %622 = arith.negf %621 : vector<8x64xf32>
    %623 = math.exp %622 : vector<8x64xf32>
    %cst_139 = arith.constant 1.000000e+00 : f32
    %624 = vector.broadcast %cst_139 : f32 to vector<8x64xf32>
    %625 = arith.addf %624, %623 : vector<8x64xf32>
    %626 = arith.divf %624, %625 : vector<8x64xf32>
    %627 = vector.extract_strided_slice %626 {offsets = [0, 0], sizes = [8, 32], strides = [1, 1]} : vector<8x64xf32> to vector<8x32xf32>
    %628 = vector.extract_strided_slice %626 {offsets = [0, 32], sizes = [8, 32], strides = [1, 1]} : vector<8x64xf32> to vector<8x32xf32>
    %629 = vector.extract_strided_slice %618 {offsets = [0, 64], sizes = [8, 32], strides = [1, 1]} : vector<8x96xf32> to vector<8x32xf32>
    %630 = vector.extract_strided_slice %548 {offsets = [0, 64], sizes = [8, 32], strides = [1, 1]} : vector<8x96xf32> to vector<8x32xf32>
    %631 = arith.mulf %627, %630 : vector<8x32xf32>
    %632 = arith.addf %629, %631 : vector<8x32xf32>
    %633 = math.tanh %632 : vector<8x32xf32>
    %cst_140 = arith.constant 1.000000e+00 : f32
    %634 = vector.broadcast %cst_140 : f32 to vector<8x32xf32>
    %635 = arith.subf %634, %628 : vector<8x32xf32>
    %636 = arith.mulf %635, %633 : vector<8x32xf32>
    %637 = arith.mulf %628, %513 : vector<8x32xf32>
    %638 = arith.addf %636, %637 : vector<8x32xf32>
    %639 = arith.truncf %638 : vector<8x32xf32> to vector<8x32xbf16>
    %640 = arith.subf %579, %580 : vector<8x16xf32>
    %641 = vector.extract_strided_slice %578 {offsets = [0, 16], sizes = [8, 16], strides = [1, 1]} : vector<8x32xf32> to vector<8x16xf32>
    %642 = vector.extract_strided_slice %578 {offsets = [0, 0], sizes = [8, 16], strides = [1, 1]} : vector<8x32xf32> to vector<8x16xf32>
    %643 = arith.subf %641, %642 : vector<8x16xf32>
    %cst_141 = arith.constant 2.000000e+00 : f32
    %644 = vector.broadcast %cst_141 : f32 to vector<8x16xf32>
    %645 = arith.mulf %644, %643 : vector<8x16xf32>
    %646 = arith.mulf %581, %581 : vector<8x16xf32>
    %647 = arith.mulf %640, %640 : vector<8x16xf32>
    %648 = arith.addf %646, %647 : vector<8x16xf32>
    %649 = arith.mulf %582, %582 : vector<8x16xf32>
    %650 = tpu.reciprocal %649 {approx = true} : vector<8x16xf32> -> vector<8x16xf32>
    %651 = arith.mulf %648, %650 : vector<8x16xf32>
    %652 = arith.addf %645, %651 : vector<8x16xf32>
    %cst_142 = arith.constant 1.000000e+00 : f32
    %653 = vector.broadcast %cst_142 : f32 to vector<8x16xf32>
    %654 = arith.subf %652, %653 : vector<8x16xf32>
    %655 = arith.addf %530, %654 : vector<8x16xf32>
    %656 = arith.subf %544, %600 : vector<8x16xf32>
    %657 = arith.mulf %656, %656 : vector<8x16xf32>
    %658 = arith.mulf %615, %615 : vector<8x16xf32>
    %659 = tpu.reciprocal %658 {approx = true} : vector<8x16xf32> -> vector<8x16xf32>
    %660 = arith.mulf %657, %659 : vector<8x16xf32>
    %661 = math.log %615 : vector<8x16xf32>
    %cst_143 = arith.constant 2.000000e+00 : f32
    %662 = vector.broadcast %cst_143 : f32 to vector<8x16xf32>
    %663 = arith.mulf %662, %661 : vector<8x16xf32>
    %664 = arith.addf %660, %663 : vector<8x16xf32>
    %cst_144 = arith.constant 1.83787704 : f32
    %665 = vector.broadcast %cst_144 : f32 to vector<8x16xf32>
    %666 = arith.addf %664, %665 : vector<8x16xf32>
    %667 = arith.addf %542, %666 : vector<8x16xf32>
    %c40_145 = arith.constant 40 : index
    %c0_146 = arith.constant 0 : index
    %668 = vector.load %arg9[%c40_145, %c0_146] : memref<56x192xf32, #tpu.memory_space<vmem>>, vector<8x192xf32>
    %c48 = arith.constant 48 : index
    %c0_147 = arith.constant 0 : index
    %669 = vector.load %arg0[%c48, %c0_147] : memref<64x16xf32, #tpu.memory_space<vmem>>, vector<8x16xf32>
    %c40_148 = arith.constant 40 : index
    %c0_149 = arith.constant 0 : index
    %670 = vector.load %arg1[%c40_148, %c0_149] : memref<56x16xf32, #tpu.memory_space<vmem>>, vector<8x16xf32>
    %cst_150 = arith.constant dense<0.000000e+00> : vector<8x192xf32>
    %671 = tpu.matmul %639, %1, %cst_150 {dimension_numbers = #tpu.dot_dimension_numbers<[1], [0], [0], [1], [0, 0, 1, 1], [], []>} : vector<8x32xbf16>, vector<32x192xbf16>, vector<8x192xf32> -> vector<8x192xf32>
    %672 = vector.extract_strided_slice %671 {offsets = [0, 96], sizes = [8, 96], strides = [1, 1]} : vector<8x192xf32> to vector<8x96xf32>
    %673 = arith.addf %672, %13 : vector<8x96xf32>
    %674 = vector.extract_strided_slice %668 {offsets = [0, 0], sizes = [8, 96], strides = [1, 1]} : vector<8x192xf32> to vector<8x96xf32>
    %675 = vector.extract_strided_slice %671 {offsets = [0, 0], sizes = [8, 96], strides = [1, 1]} : vector<8x192xf32> to vector<8x96xf32>
    %676 = arith.addf %674, %675 : vector<8x96xf32>
    %677 = vector.extract_strided_slice %676 {offsets = [0, 0], sizes = [8, 64], strides = [1, 1]} : vector<8x96xf32> to vector<8x64xf32>
    %cst_151 = arith.constant 0.000000e+00 : f32
    %678 = vector.broadcast %cst_151 : f32 to vector<8x64xf32>
    %679 = arith.maximumf %677, %678 : vector<8x64xf32>
    %680 = arith.truncf %679 : vector<8x64xf32> to vector<8x64xbf16>
    %cst_152 = arith.constant dense<0.000000e+00> : vector<8x64xf32>
    %681 = tpu.matmul %680, %3, %cst_152 {dimension_numbers = #tpu.dot_dimension_numbers<[1], [0], [0], [1], [0, 0, 1, 1], [], []>} : vector<8x64xbf16>, vector<64x64xbf16>, vector<8x64xf32> -> vector<8x64xf32>
    %682 = arith.addf %681, %16 : vector<8x64xf32>
    %cst_153 = arith.constant 0.000000e+00 : f32
    %683 = vector.broadcast %cst_153 : f32 to vector<8x64xf32>
    %684 = arith.maximumf %682, %683 : vector<8x64xf32>
    %685 = arith.truncf %684 : vector<8x64xf32> to vector<8x64xbf16>
    %cst_154 = arith.constant dense<0.000000e+00> : vector<8x64xf32>
    %686 = tpu.matmul %685, %4, %cst_154 {dimension_numbers = #tpu.dot_dimension_numbers<[1], [0], [0], [1], [0, 0, 1, 1], [], []>} : vector<8x64xbf16>, vector<64x64xbf16>, vector<8x64xf32> -> vector<8x64xf32>
    %687 = arith.addf %686, %19 : vector<8x64xf32>
    %688 = vector.extract_strided_slice %687 {offsets = [0, 32], sizes = [8, 32], strides = [1, 1]} : vector<8x64xf32> to vector<8x32xf32>
    %cst_155 = arith.constant 0.000000e+00 : f32
    %689 = vector.broadcast %cst_155 : f32 to vector<8x32xf32>
    %690 = arith.maximumf %688, %689 : vector<8x32xf32>
    %691 = vector.broadcast %cst_155 : f32 to vector<8x32xf32>
    %692 = arith.subf %688, %691 : vector<8x32xf32>
    %693 = arith.cmpf one, %692, %692 : vector<8x32xf32>
    %694 = vector.broadcast %cst_155 : f32 to vector<8x32xf32>
    %695 = arith.addf %688, %694 : vector<8x32xf32>
    %696 = math.absf %692 : vector<8x32xf32>
    %cst_156 = arith.constant 0.000000e+00 : f32
    %697 = vector.broadcast %cst_156 : f32 to vector<8x32xf32>
    %698 = arith.subf %697, %696 : vector<8x32xf32>
    %699 = math.exp %698 : vector<8x32xf32>
    %700 = math.log1p %699 : vector<8x32xf32>
    %701 = arith.addf %690, %700 : vector<8x32xf32>
    %702 = arith.select %693, %695, %701 : vector<8x32xi1>, vector<8x32xf32>
    %703 = math.log %702 : vector<8x32xf32>
    %704 = vector.extract_strided_slice %687 {offsets = [0, 0], sizes = [8, 16], strides = [1, 1]} : vector<8x64xf32> to vector<8x16xf32>
    %705 = vector.extract_strided_slice %687 {offsets = [0, 16], sizes = [8, 16], strides = [1, 1]} : vector<8x64xf32> to vector<8x16xf32>
    %706 = vector.extract_strided_slice %702 {offsets = [0, 0], sizes = [8, 16], strides = [1, 1]} : vector<8x32xf32> to vector<8x16xf32>
    %707 = vector.extract_strided_slice %702 {offsets = [0, 16], sizes = [8, 16], strides = [1, 1]} : vector<8x32xf32> to vector<8x16xf32>
    %708 = arith.mulf %706, %670 : vector<8x16xf32>
    %709 = arith.addf %704, %708 : vector<8x16xf32>
    %710 = arith.truncf %709 : vector<8x16xf32> to vector<8x16xbf16>
    %cst_157 = arith.constant dense<0.000000e+00> : vector<8x128xf32>
    %711 = tpu.matmul %710, %5, %cst_157 {dimension_numbers = #tpu.dot_dimension_numbers<[1], [0], [0], [1], [0, 0, 1, 1], [], []>} : vector<8x16xbf16>, vector<16x128xbf16>, vector<8x128xf32> -> vector<8x128xf32>
    %712 = vector.extract_strided_slice %676 {offsets = [0, 64], sizes = [8, 32], strides = [1, 1]} : vector<8x96xf32> to vector<8x32xf32>
    %713 = vector.extract_strided_slice %711 {offsets = [0, 0], sizes = [8, 32], strides = [1, 1]} : vector<8x128xf32> to vector<8x32xf32>
    %714 = arith.addf %712, %713 : vector<8x32xf32>
    %cst_158 = arith.constant 0.000000e+00 : f32
    %715 = vector.broadcast %cst_158 : f32 to vector<8x32xf32>
    %716 = arith.maximumf %714, %715 : vector<8x32xf32>
    %717 = arith.truncf %716 : vector<8x32xf32> to vector<8x32xbf16>
    %cst_159 = arith.constant dense<0.000000e+00> : vector<8x32xf32>
    %718 = tpu.matmul %717, %7, %cst_159 {dimension_numbers = #tpu.dot_dimension_numbers<[1], [0], [0], [1], [0, 0, 1, 1], [], []>} : vector<8x32xbf16>, vector<32x32xbf16>, vector<8x32xf32> -> vector<8x32xf32>
    %719 = arith.addf %718, %22 : vector<8x32xf32>
    %cst_160 = arith.constant 0.000000e+00 : f32
    %720 = vector.broadcast %cst_160 : f32 to vector<8x32xf32>
    %721 = arith.maximumf %719, %720 : vector<8x32xf32>
    %722 = arith.truncf %721 : vector<8x32xf32> to vector<8x32xbf16>
    %cst_161 = arith.constant dense<0.000000e+00> : vector<8x32xf32>
    %723 = tpu.matmul %722, %8, %cst_161 {dimension_numbers = #tpu.dot_dimension_numbers<[1], [0], [0], [1], [0, 0, 1, 1], [], []>} : vector<8x32xbf16>, vector<32x32xbf16>, vector<8x32xf32> -> vector<8x32xf32>
    %724 = arith.addf %723, %25 : vector<8x32xf32>
    %725 = vector.extract_strided_slice %724 {offsets = [0, 0], sizes = [8, 16], strides = [1, 1]} : vector<8x32xf32> to vector<8x16xf32>
    %726 = vector.extract_strided_slice %724 {offsets = [0, 16], sizes = [8, 16], strides = [1, 1]} : vector<8x32xf32> to vector<8x16xf32>
    %cst_162 = arith.constant 0.000000e+00 : f32
    %727 = vector.broadcast %cst_162 : f32 to vector<8x16xf32>
    %728 = arith.maximumf %726, %727 : vector<8x16xf32>
    %729 = vector.broadcast %cst_162 : f32 to vector<8x16xf32>
    %730 = arith.subf %726, %729 : vector<8x16xf32>
    %731 = arith.cmpf one, %730, %730 : vector<8x16xf32>
    %732 = vector.broadcast %cst_162 : f32 to vector<8x16xf32>
    %733 = arith.addf %726, %732 : vector<8x16xf32>
    %734 = math.absf %730 : vector<8x16xf32>
    %cst_163 = arith.constant 0.000000e+00 : f32
    %735 = vector.broadcast %cst_163 : f32 to vector<8x16xf32>
    %736 = arith.subf %735, %734 : vector<8x16xf32>
    %737 = math.exp %736 : vector<8x16xf32>
    %738 = math.log1p %737 : vector<8x16xf32>
    %739 = arith.addf %728, %738 : vector<8x16xf32>
    %740 = arith.select %731, %733, %739 : vector<8x16xi1>, vector<8x16xf32>
    %741 = vector.extract_strided_slice %668 {offsets = [0, 96], sizes = [8, 96], strides = [1, 1]} : vector<8x192xf32> to vector<8x96xf32>
    %742 = vector.extract_strided_slice %711 {offsets = [0, 32], sizes = [8, 96], strides = [1, 1]} : vector<8x128xf32> to vector<8x96xf32>
    %743 = arith.addf %741, %742 : vector<8x96xf32>
    %744 = vector.extract_strided_slice %743 {offsets = [0, 0], sizes = [8, 64], strides = [1, 1]} : vector<8x96xf32> to vector<8x64xf32>
    %745 = vector.extract_strided_slice %673 {offsets = [0, 0], sizes = [8, 64], strides = [1, 1]} : vector<8x96xf32> to vector<8x64xf32>
    %746 = arith.addf %744, %745 : vector<8x64xf32>
    %747 = arith.negf %746 : vector<8x64xf32>
    %748 = math.exp %747 : vector<8x64xf32>
    %cst_164 = arith.constant 1.000000e+00 : f32
    %749 = vector.broadcast %cst_164 : f32 to vector<8x64xf32>
    %750 = arith.addf %749, %748 : vector<8x64xf32>
    %751 = arith.divf %749, %750 : vector<8x64xf32>
    %752 = vector.extract_strided_slice %751 {offsets = [0, 0], sizes = [8, 32], strides = [1, 1]} : vector<8x64xf32> to vector<8x32xf32>
    %753 = vector.extract_strided_slice %751 {offsets = [0, 32], sizes = [8, 32], strides = [1, 1]} : vector<8x64xf32> to vector<8x32xf32>
    %754 = vector.extract_strided_slice %743 {offsets = [0, 64], sizes = [8, 32], strides = [1, 1]} : vector<8x96xf32> to vector<8x32xf32>
    %755 = vector.extract_strided_slice %673 {offsets = [0, 64], sizes = [8, 32], strides = [1, 1]} : vector<8x96xf32> to vector<8x32xf32>
    %756 = arith.mulf %752, %755 : vector<8x32xf32>
    %757 = arith.addf %754, %756 : vector<8x32xf32>
    %758 = math.tanh %757 : vector<8x32xf32>
    %cst_165 = arith.constant 1.000000e+00 : f32
    %759 = vector.broadcast %cst_165 : f32 to vector<8x32xf32>
    %760 = arith.subf %759, %753 : vector<8x32xf32>
    %761 = arith.mulf %760, %758 : vector<8x32xf32>
    %762 = arith.mulf %753, %638 : vector<8x32xf32>
    %763 = arith.addf %761, %762 : vector<8x32xf32>
    %764 = arith.truncf %763 : vector<8x32xf32> to vector<8x32xbf16>
    %765 = arith.subf %704, %705 : vector<8x16xf32>
    %766 = vector.extract_strided_slice %703 {offsets = [0, 16], sizes = [8, 16], strides = [1, 1]} : vector<8x32xf32> to vector<8x16xf32>
    %767 = vector.extract_strided_slice %703 {offsets = [0, 0], sizes = [8, 16], strides = [1, 1]} : vector<8x32xf32> to vector<8x16xf32>
    %768 = arith.subf %766, %767 : vector<8x16xf32>
    %cst_166 = arith.constant 2.000000e+00 : f32
    %769 = vector.broadcast %cst_166 : f32 to vector<8x16xf32>
    %770 = arith.mulf %769, %768 : vector<8x16xf32>
    %771 = arith.mulf %706, %706 : vector<8x16xf32>
    %772 = arith.mulf %765, %765 : vector<8x16xf32>
    %773 = arith.addf %771, %772 : vector<8x16xf32>
    %774 = arith.mulf %707, %707 : vector<8x16xf32>
    %775 = tpu.reciprocal %774 {approx = true} : vector<8x16xf32> -> vector<8x16xf32>
    %776 = arith.mulf %773, %775 : vector<8x16xf32>
    %777 = arith.addf %770, %776 : vector<8x16xf32>
    %cst_167 = arith.constant 1.000000e+00 : f32
    %778 = vector.broadcast %cst_167 : f32 to vector<8x16xf32>
    %779 = arith.subf %777, %778 : vector<8x16xf32>
    %780 = arith.addf %655, %779 : vector<8x16xf32>
    %781 = arith.subf %669, %725 : vector<8x16xf32>
    %782 = arith.mulf %781, %781 : vector<8x16xf32>
    %783 = arith.mulf %740, %740 : vector<8x16xf32>
    %784 = tpu.reciprocal %783 {approx = true} : vector<8x16xf32> -> vector<8x16xf32>
    %785 = arith.mulf %782, %784 : vector<8x16xf32>
    %786 = math.log %740 : vector<8x16xf32>
    %cst_168 = arith.constant 2.000000e+00 : f32
    %787 = vector.broadcast %cst_168 : f32 to vector<8x16xf32>
    %788 = arith.mulf %787, %786 : vector<8x16xf32>
    %789 = arith.addf %785, %788 : vector<8x16xf32>
    %cst_169 = arith.constant 1.83787704 : f32
    %790 = vector.broadcast %cst_169 : f32 to vector<8x16xf32>
    %791 = arith.addf %789, %790 : vector<8x16xf32>
    %792 = arith.addf %667, %791 : vector<8x16xf32>
    %c48_170 = arith.constant 48 : index
    %c0_171 = arith.constant 0 : index
    %793 = vector.load %arg9[%c48_170, %c0_171] : memref<56x192xf32, #tpu.memory_space<vmem>>, vector<8x192xf32>
    %c56 = arith.constant 56 : index
    %c0_172 = arith.constant 0 : index
    %794 = vector.load %arg0[%c56, %c0_172] : memref<64x16xf32, #tpu.memory_space<vmem>>, vector<8x16xf32>
    %c48_173 = arith.constant 48 : index
    %c0_174 = arith.constant 0 : index
    %795 = vector.load %arg1[%c48_173, %c0_174] : memref<56x16xf32, #tpu.memory_space<vmem>>, vector<8x16xf32>
    %cst_175 = arith.constant dense<0.000000e+00> : vector<8x192xf32>
    %796 = tpu.matmul %764, %1, %cst_175 {dimension_numbers = #tpu.dot_dimension_numbers<[1], [0], [0], [1], [0, 0, 1, 1], [], []>} : vector<8x32xbf16>, vector<32x192xbf16>, vector<8x192xf32> -> vector<8x192xf32>
    %797 = vector.extract_strided_slice %793 {offsets = [0, 0], sizes = [8, 96], strides = [1, 1]} : vector<8x192xf32> to vector<8x96xf32>
    %798 = vector.extract_strided_slice %796 {offsets = [0, 0], sizes = [8, 96], strides = [1, 1]} : vector<8x192xf32> to vector<8x96xf32>
    %799 = arith.addf %797, %798 : vector<8x96xf32>
    %800 = vector.extract_strided_slice %799 {offsets = [0, 0], sizes = [8, 64], strides = [1, 1]} : vector<8x96xf32> to vector<8x64xf32>
    %cst_176 = arith.constant 0.000000e+00 : f32
    %801 = vector.broadcast %cst_176 : f32 to vector<8x64xf32>
    %802 = arith.maximumf %800, %801 : vector<8x64xf32>
    %803 = arith.truncf %802 : vector<8x64xf32> to vector<8x64xbf16>
    %cst_177 = arith.constant dense<0.000000e+00> : vector<8x64xf32>
    %804 = tpu.matmul %803, %3, %cst_177 {dimension_numbers = #tpu.dot_dimension_numbers<[1], [0], [0], [1], [0, 0, 1, 1], [], []>} : vector<8x64xbf16>, vector<64x64xbf16>, vector<8x64xf32> -> vector<8x64xf32>
    %805 = arith.addf %804, %16 : vector<8x64xf32>
    %cst_178 = arith.constant 0.000000e+00 : f32
    %806 = vector.broadcast %cst_178 : f32 to vector<8x64xf32>
    %807 = arith.maximumf %805, %806 : vector<8x64xf32>
    %808 = arith.truncf %807 : vector<8x64xf32> to vector<8x64xbf16>
    %cst_179 = arith.constant dense<0.000000e+00> : vector<8x64xf32>
    %809 = tpu.matmul %808, %4, %cst_179 {dimension_numbers = #tpu.dot_dimension_numbers<[1], [0], [0], [1], [0, 0, 1, 1], [], []>} : vector<8x64xbf16>, vector<64x64xbf16>, vector<8x64xf32> -> vector<8x64xf32>
    %810 = arith.addf %809, %19 : vector<8x64xf32>
    %811 = vector.extract_strided_slice %810 {offsets = [0, 32], sizes = [8, 32], strides = [1, 1]} : vector<8x64xf32> to vector<8x32xf32>
    %cst_180 = arith.constant 0.000000e+00 : f32
    %812 = vector.broadcast %cst_180 : f32 to vector<8x32xf32>
    %813 = arith.maximumf %811, %812 : vector<8x32xf32>
    %814 = vector.broadcast %cst_180 : f32 to vector<8x32xf32>
    %815 = arith.subf %811, %814 : vector<8x32xf32>
    %816 = arith.cmpf one, %815, %815 : vector<8x32xf32>
    %817 = vector.broadcast %cst_180 : f32 to vector<8x32xf32>
    %818 = arith.addf %811, %817 : vector<8x32xf32>
    %819 = math.absf %815 : vector<8x32xf32>
    %cst_181 = arith.constant 0.000000e+00 : f32
    %820 = vector.broadcast %cst_181 : f32 to vector<8x32xf32>
    %821 = arith.subf %820, %819 : vector<8x32xf32>
    %822 = math.exp %821 : vector<8x32xf32>
    %823 = math.log1p %822 : vector<8x32xf32>
    %824 = arith.addf %813, %823 : vector<8x32xf32>
    %825 = arith.select %816, %818, %824 : vector<8x32xi1>, vector<8x32xf32>
    %826 = math.log %825 : vector<8x32xf32>
    %827 = vector.extract_strided_slice %810 {offsets = [0, 0], sizes = [8, 16], strides = [1, 1]} : vector<8x64xf32> to vector<8x16xf32>
    %828 = vector.extract_strided_slice %810 {offsets = [0, 16], sizes = [8, 16], strides = [1, 1]} : vector<8x64xf32> to vector<8x16xf32>
    %829 = vector.extract_strided_slice %825 {offsets = [0, 0], sizes = [8, 16], strides = [1, 1]} : vector<8x32xf32> to vector<8x16xf32>
    %830 = vector.extract_strided_slice %825 {offsets = [0, 16], sizes = [8, 16], strides = [1, 1]} : vector<8x32xf32> to vector<8x16xf32>
    %831 = arith.mulf %829, %795 : vector<8x16xf32>
    %832 = arith.addf %827, %831 : vector<8x16xf32>
    %833 = arith.truncf %832 : vector<8x16xf32> to vector<8x16xbf16>
    %cst_182 = arith.constant dense<0.000000e+00> : vector<8x128xf32>
    %834 = tpu.matmul %833, %5, %cst_182 {dimension_numbers = #tpu.dot_dimension_numbers<[1], [0], [0], [1], [0, 0, 1, 1], [], []>} : vector<8x16xbf16>, vector<16x128xbf16>, vector<8x128xf32> -> vector<8x128xf32>
    %835 = vector.extract_strided_slice %799 {offsets = [0, 64], sizes = [8, 32], strides = [1, 1]} : vector<8x96xf32> to vector<8x32xf32>
    %836 = vector.extract_strided_slice %834 {offsets = [0, 0], sizes = [8, 32], strides = [1, 1]} : vector<8x128xf32> to vector<8x32xf32>
    %837 = arith.addf %835, %836 : vector<8x32xf32>
    %cst_183 = arith.constant 0.000000e+00 : f32
    %838 = vector.broadcast %cst_183 : f32 to vector<8x32xf32>
    %839 = arith.maximumf %837, %838 : vector<8x32xf32>
    %840 = arith.truncf %839 : vector<8x32xf32> to vector<8x32xbf16>
    %cst_184 = arith.constant dense<0.000000e+00> : vector<8x32xf32>
    %841 = tpu.matmul %840, %7, %cst_184 {dimension_numbers = #tpu.dot_dimension_numbers<[1], [0], [0], [1], [0, 0, 1, 1], [], []>} : vector<8x32xbf16>, vector<32x32xbf16>, vector<8x32xf32> -> vector<8x32xf32>
    %842 = arith.addf %841, %22 : vector<8x32xf32>
    %cst_185 = arith.constant 0.000000e+00 : f32
    %843 = vector.broadcast %cst_185 : f32 to vector<8x32xf32>
    %844 = arith.maximumf %842, %843 : vector<8x32xf32>
    %845 = arith.truncf %844 : vector<8x32xf32> to vector<8x32xbf16>
    %cst_186 = arith.constant dense<0.000000e+00> : vector<8x32xf32>
    %846 = tpu.matmul %845, %8, %cst_186 {dimension_numbers = #tpu.dot_dimension_numbers<[1], [0], [0], [1], [0, 0, 1, 1], [], []>} : vector<8x32xbf16>, vector<32x32xbf16>, vector<8x32xf32> -> vector<8x32xf32>
    %847 = arith.addf %846, %25 : vector<8x32xf32>
    %848 = vector.extract_strided_slice %847 {offsets = [0, 0], sizes = [8, 16], strides = [1, 1]} : vector<8x32xf32> to vector<8x16xf32>
    %849 = vector.extract_strided_slice %847 {offsets = [0, 16], sizes = [8, 16], strides = [1, 1]} : vector<8x32xf32> to vector<8x16xf32>
    %cst_187 = arith.constant 0.000000e+00 : f32
    %850 = vector.broadcast %cst_187 : f32 to vector<8x16xf32>
    %851 = arith.maximumf %849, %850 : vector<8x16xf32>
    %852 = vector.broadcast %cst_187 : f32 to vector<8x16xf32>
    %853 = arith.subf %849, %852 : vector<8x16xf32>
    %854 = arith.cmpf one, %853, %853 : vector<8x16xf32>
    %855 = vector.broadcast %cst_187 : f32 to vector<8x16xf32>
    %856 = arith.addf %849, %855 : vector<8x16xf32>
    %857 = math.absf %853 : vector<8x16xf32>
    %cst_188 = arith.constant 0.000000e+00 : f32
    %858 = vector.broadcast %cst_188 : f32 to vector<8x16xf32>
    %859 = arith.subf %858, %857 : vector<8x16xf32>
    %860 = math.exp %859 : vector<8x16xf32>
    %861 = math.log1p %860 : vector<8x16xf32>
    %862 = arith.addf %851, %861 : vector<8x16xf32>
    %863 = arith.select %854, %856, %862 : vector<8x16xi1>, vector<8x16xf32>
    %864 = arith.subf %827, %828 : vector<8x16xf32>
    %865 = vector.extract_strided_slice %826 {offsets = [0, 16], sizes = [8, 16], strides = [1, 1]} : vector<8x32xf32> to vector<8x16xf32>
    %866 = vector.extract_strided_slice %826 {offsets = [0, 0], sizes = [8, 16], strides = [1, 1]} : vector<8x32xf32> to vector<8x16xf32>
    %867 = arith.subf %865, %866 : vector<8x16xf32>
    %cst_189 = arith.constant 2.000000e+00 : f32
    %868 = vector.broadcast %cst_189 : f32 to vector<8x16xf32>
    %869 = arith.mulf %868, %867 : vector<8x16xf32>
    %870 = arith.mulf %829, %829 : vector<8x16xf32>
    %871 = arith.mulf %864, %864 : vector<8x16xf32>
    %872 = arith.addf %870, %871 : vector<8x16xf32>
    %873 = arith.mulf %830, %830 : vector<8x16xf32>
    %874 = tpu.reciprocal %873 {approx = true} : vector<8x16xf32> -> vector<8x16xf32>
    %875 = arith.mulf %872, %874 : vector<8x16xf32>
    %876 = arith.addf %869, %875 : vector<8x16xf32>
    %cst_190 = arith.constant 1.000000e+00 : f32
    %877 = vector.broadcast %cst_190 : f32 to vector<8x16xf32>
    %878 = arith.subf %876, %877 : vector<8x16xf32>
    %879 = arith.addf %780, %878 : vector<8x16xf32>
    %880 = arith.subf %794, %848 : vector<8x16xf32>
    %881 = arith.mulf %880, %880 : vector<8x16xf32>
    %882 = arith.mulf %863, %863 : vector<8x16xf32>
    %883 = tpu.reciprocal %882 {approx = true} : vector<8x16xf32> -> vector<8x16xf32>
    %884 = arith.mulf %881, %883 : vector<8x16xf32>
    %885 = math.log %863 : vector<8x16xf32>
    %cst_191 = arith.constant 2.000000e+00 : f32
    %886 = vector.broadcast %cst_191 : f32 to vector<8x16xf32>
    %887 = arith.mulf %886, %885 : vector<8x16xf32>
    %888 = arith.addf %884, %887 : vector<8x16xf32>
    %cst_192 = arith.constant 1.83787704 : f32
    %889 = vector.broadcast %cst_192 : f32 to vector<8x16xf32>
    %890 = arith.addf %888, %889 : vector<8x16xf32>
    %891 = arith.addf %792, %890 : vector<8x16xf32>
    %892 = vector.shape_cast %879 : vector<8x16xf32> to vector<1x8x16xf32>
    %cst_193 = arith.constant dense<0.000000e+00> : vector<1xf32>
    %893 = vector.multi_reduction <add>, %892, %cst_193 [1, 2] : vector<1x8x16xf32> to vector<1xf32>
    %894 = vector.shape_cast %893 : vector<1xf32> to vector<1x1x1xf32>
    %895 = vector.extract %894[0, 0, 0] : f32 from vector<1x1x1xf32>
    %896 = vector.broadcast %895 : f32 to vector<1x1xf32>
    %cst_194 = arith.constant 5.000000e-01 : f32
    %897 = vector.broadcast %cst_194 : f32 to vector<1x1xf32>
    %898 = arith.mulf %897, %896 : vector<1x1xf32>
    %899 = vector.shape_cast %891 : vector<8x16xf32> to vector<1x8x16xf32>
    %cst_195 = arith.constant dense<0.000000e+00> : vector<1xf32>
    %900 = vector.multi_reduction <add>, %899, %cst_195 [1, 2] : vector<1x8x16xf32> to vector<1xf32>
    %901 = vector.shape_cast %900 : vector<1xf32> to vector<1x1x1xf32>
    %902 = vector.extract %901[0, 0, 0] : f32 from vector<1x1x1xf32>
    %903 = vector.broadcast %902 : f32 to vector<1x1xf32>
    %cst_196 = arith.constant 5.000000e-01 : f32
    %904 = vector.broadcast %cst_196 : f32 to vector<1x1xf32>
    %905 = arith.mulf %904, %903 : vector<1x1xf32>
    %906 = tpu.iota {dimensions = array<i32: 1>} : vector<1x2xi32>
    %c0_i32 = arith.constant 0 : i32
    %907 = vector.broadcast %c0_i32 : i32 to vector<1x2xi32>
    %908 = arith.cmpi eq, %906, %907 : vector<1x2xi32>
    %909 = vector.shape_cast %898 : vector<1x1xf32> to vector<1x1xf32>
    %910 = vector.broadcast %909 : vector<1x1xf32> to vector<1x2xf32>
    %911 = vector.shape_cast %905 : vector<1x1xf32> to vector<1x1xf32>
    %912 = vector.broadcast %911 : vector<1x1xf32> to vector<1x2xf32>
    %913 = arith.select %908, %910, %912 : vector<1x2xi1>, vector<1x2xf32>
    %c0_197 = arith.constant 0 : index
    %c0_198 = arith.constant 0 : index
    %914 = vector.load %arg8[%c0_197, %c0_198] : memref<1x2xf32, #tpu.memory_space<vmem>>, vector<1x2xf32>
    tpu.vector_store %arg8[%c0_197, %c0_198], %913 {strides = array<i32>} : memref<1x2xf32, #tpu.memory_space<vmem>>, vector<1x2xf32>,
    return
  }
}

</mosaic_0001>

<bundles_post_ra>
// kernel: vrnn_single_forward.1
= control target key start
LH: loop header
LB: loop body
LE: loop exit
PB: predicated region body
PF: predicated region fallthrough
CT: control target
= control target key end

     0   :  { %13 = vsyncpa [#allocation4], 0  ;;  %s3922_s0 = inlined_call_operand.hbm [shape: f32[64,16], index: 0, kind: input, shape index: {}]   ;;  %s3923_s1 = inlined_call_operand.hbm [shape: f32[56,16], index: 1, kind: input, shape index: {}]   ;;  %s3924_s2 = inlined_call_operand.hbm [shape: bf16[32,192], index: 2, kind: input, shape index: {}]   ;;  %s3925_s3 = inlined_call_operand.hbm [shape: bf16[32,192], index: 3, kind: input, shape index: {}]   ;;  %s3926_s4 = inlined_call_operand.hbm [shape: bf16[64,128], index: 4, kind: input, shape index: {}]   ;;  %s3927_s5 = inlined_call_operand.vmem [shape: bf16[16,128], index: 5, kind: input, shape index: {}]   ;;  %s3928_s6 = inlined_call_operand.hbm [shape: bf16[32,64], index: 6, kind: input, shape index: {}]   ;;  %s3929_s7 = inlined_call_operand.hbm [shape: f32[6,192], index: 7, kind: input, shape index: {}]   ;;  %s3930_s8 = inlined_call_operand.vmem [shape: f32[1,2], index: 8, kind: output, shape index: {}]  }
   0x1   :  { %14 = vsyncpa [#allocation6], 0 }
   0x2   :  { %15 = vsyncpa [#allocation9], 0 }
   0x3   :  { %16 = vsyncpa [#allocation12], 0  ;;  %s34_s29 = sshll.u32 %s3923_s1, 4  ;;  %s3027_s30 = smov [#allocation5]   ;;  %s35_s29 = int_to_ptr.hbm [resolvable:$true] %s34_s29 }
   0x4   :  { %s36_s9 = sshll.u32 %s3027_s30, 4  ;;  %s60_s12 = sshll.u32 %s3925_s3, 4  ;;  %s37_s9 = int_to_ptr.vmem [resolvable:$true] %s36_s9  ;;  %s61_s12 = int_to_ptr.hbm [resolvable:$true] %s60_s12 }
   0x5   :  { %s3028_s13 = smov 128   ;;  %s3029_s14 = smov 8  }
   0x6   :  { %42 = dma.hbm_to_vmem [thread:$0]  %s35_s29, 896, %s37_s9, [#allocation6], %s3028_s13, %s3028_s13, %s3029_s14  }
   0x7   :  { %s3030_s15 = smov [#allocation8]   ;;  %s88_s18 = sshll.u32 %s3928_s6, 4  ;;  %s89_s18 = int_to_ptr.hbm [resolvable:$true] %s88_s18 }
   0x8   :  { %s62_s16 = sshll.u32 %s3030_s15, 4  ;;  %s3031_s3 = smov [#allocation11]   ;;  %s63_s16 = int_to_ptr.vmem [resolvable:$true] %s62_s16 }
   0x9   :  { %68 = dma.hbm_to_vmem [thread:$0]  %s61_s12, 512, %s63_s16, [#allocation9], %s3028_s13, %s3028_s13, %s3029_s14  }
   0xa   :  { %s90_s19 = sshll.u32 %s3031_s3, 4  ;;  %s21_s22 = sshll.u32 %s3922_s0, 4  ;;  %s91_s19 = int_to_ptr.vmem [resolvable:$true] %s90_s19  ;;  %s22_s22 = int_to_ptr.hbm [resolvable:$true] %s21_s22 }
   0xb   :  { %s3032_s23 = smov 64   ;;  %s3033_s24 = smov 4  }
   0xc   :  { %96 = dma.hbm_to_vmem [thread:$0]  %s89_s18, 256, %s91_s19, [#allocation12], %s3032_s23, %s3032_s23, %s3033_s24  }
   0xd   :  { %s3034_s25 = smov [#allocation3]   ;;  %s47_s6 = sshll.u32 %s3924_s2, 4  ;;  %s48_s6 = int_to_ptr.hbm [resolvable:$true] %s47_s6 }
   0xe   :  { %s23_s26 = sshll.u32 %s3034_s25, 4  ;;  %s73_s30 = sshll.u32 %s3926_s4, 4  ;;  %s24_s26 = int_to_ptr.vmem [resolvable:$true] %s23_s26  ;;  %s74_s30 = int_to_ptr.hbm [resolvable:$true] %s73_s30 }
   0xf   :  { %29 = dma.hbm_to_vmem [thread:$0]  %s22_s22, 1024, %s24_s26, [#allocation4], %s3028_s13, %s3028_s13, %s3029_s14  }
  0x10   :  { %s3035_s9 = smov [#allocation7]   ;;  %s3036_s11 = smov [#allocation10]  }
  0x11   :  { %s49_s10 = sshll.u32 %s3035_s9, 4  ;;  %s75_s2 = sshll.u32 %s3036_s11, 4  ;;  %s50_s10 = int_to_ptr.vmem [resolvable:$true] %s49_s10  ;;  %s76_s2 = int_to_ptr.vmem [resolvable:$true] %s75_s2 }
  0x12   :  { %55 = dma.hbm_to_vmem [thread:$0]  %s48_s6, 512, %s50_s10, [#allocation6], %s3028_s13, %s3028_s13, %s3029_s14  }
  0x13   :  { %s102_s16 = sshll.u32 %s3929_s7, 4  ;;  %s3037_s4 = smov [#allocation13]   ;;  %s103_s16 = int_to_ptr.hbm [resolvable:$true] %s102_s16 }
  0x14   :  { %81 = dma.hbm_to_vmem [thread:$0]  %s74_s30, 512, %s76_s2, [#allocation9], %s3032_s23, %s3032_s23, %s3033_s24  }
  0x15   :  { %s104_s1 = sshll.u32 %s3037_s4, 4  ;;  %s105_s1 = int_to_ptr.vmem [resolvable:$true] %s104_s1 }
  0x16   :  { %107 = dma.hbm_to_vmem [thread:$0]  %s103_s16, 256, %s105_s1, [#allocation12]  }
  0x17   :  { %3019 = dma.done.wait [#allocation4], 1024  }
  0x18   :  { %3020 = vsyncadd [#allocation4], 4294966272 }
  0x19   :  { %3021 = dma.done.wait [#allocation6], 1408  }
  0x1a   :  { %3022 = vsyncadd [#allocation6], 4294965888 }
  0x1b   :  { %3023 = dma.done.wait [#allocation9], 1024  }
  0x1c   :  { %3024 = vsyncadd [#allocation9], 4294966272 }
  0x1d   :  { %3025 = dma.done.wait [#allocation12], 512  }
  0x1e   :  { %3026 = vsyncadd [#allocation12], 4294966784  ;;  %v2496_v0 = vld [vmem:[#allocation7 + $0x10] sm:$0xf]  ;;  %v2638_v1 = vld [vmem:[#allocation7 + $0x14] sm:$0xf0] }
  0x1f   :  { %v2512_v2 = vld [vmem:[#allocation7] sm:$0xf]  ;;  %v2497_v3 = vor.u32 %v2638_v1, %v2496_v0  ;;  %v2636_v4 = vld [vmem:[#allocation7 + $0x4] sm:$0xf0]  ;;  %v167_v6 = vld [vmem:[#allocation3 + $0x8] sm:$0xff]  ;;  %vm210_vm0 = vcmask 130048  }
  0x20   :  { %v166_v5 = vld [vmem:[#allocation3] sm:$0xff]  ;;  %v2513_v7 = vor.u32 %v2636_v4, %v2512_v2  ;;  %v175_v9 = vpack.c.bf16 %v167_v6, %v167_v6  ;;  %v168_v10 = vld [vmem:[#allocation3 + $0x10] sm:$0xff]  ;;  %v2536_v11 = vld [vmem:[#allocation8 + $0x10] sm:$0xf]  ;;  %s3038_s7 = smov 96   ;;  %v3039_v48 = vmov 0  }
  0x21   :  { %v174_v8 = vpack.c.bf16 %v166_v5, %v166_v5  ;;  %v2642_v12 = vld [vmem:[#allocation8 + $0x14] sm:$0xf0]  ;;  %230 = vmatpush.bf16.msra.mxu0 %v2497_v3  ;;  %v176_v13 = vpack.c.bf16 %v168_v10, %v168_v10  ;;  %v169_v20 = vld [vmem:[#allocation3 + $0x18] sm:$0xff]  ;;  %v2640_v22 = vld [vmem:[#allocation8 + $0x4] sm:$0xf0]  ;;  %vm380_vm1 = vcmask 523264  }
  0x22   :  { %v3126_v14 = vor.u32 %v2642_v12, %v2536_v11  ;;  %314 = vmatpush.bf16.msra.mxu2 %v2513_v7  ;;  %v190_v16 = vunpack.c.l.b16 %v175_v9  ;;  %v2528_v21 = vld [vmem:[#allocation8] sm:$0xf]  ;;  %v170_v23 = vld [vmem:[#allocation3 + $0x20] sm:$0xff]  ;;  %v177_v25 = vpack.c.bf16 %v169_v20, %v169_v20  ;;  %v171_v31 = vld [vmem:[#allocation3 + $0x28] sm:$0xff]  ;;  %s3040_s13 = smov 32   ;;  %vm418_vm8 = vcmask 261120  }
  0x23   :  { %v189_v15 = vunpack.c.l.b16 %v174_v8  ;;  %v191_v17 = vunpack.c.l.b16 %v176_v13  ;;  %v3137_v24 = vor.u32 %v2640_v22, %v2528_v21  ;;  %v178_v26 = vpack.c.bf16 %v170_v23, %v170_v23  ;;  %v3148_v32 = vld [vmem:[#allocation10 + $0x18] sm:$0xff]  ;;  %v3159_v40 = vld [vmem:[#allocation10 + $0x10] sm:$0xff]  ;;  %v173_v41 = vld [vmem:[#allocation3 + $0x38] sm:$0xff]  ;;  %s3042_s19 = smov 16   ;;  %s3043_s20 = smov 80  }
  0x24   :  { %v192_v27 = vunpack.c.l.b16 %v177_v25  ;;  %v172_v33 = vld [vmem:[#allocation3 + $0x30] sm:$0xff]  ;;  %505 = vrot.lane.b32.xlu0 %v3148_v32, %s3032_s23  ;;  %v179_v34 = vpack.c.bf16 %v171_v31, %v171_v31  ;;  %v3166_v42 = vld [vmem:[#allocation13] sm:$0x3f]  ;;  %v181_v43 = vpack.c.bf16 %v173_v41, %v173_v41  ;;  %v3182_v55 = vld [vmem:[#allocation10 + $0x8] sm:$0xff] }
  0x25   :  { %428 = vmatpush.bf16.msrb.mxu0 %v3126_v14  ;;  %v3129_v18 = vpack.c.b16 %v190_v16, %v189_v15  ;;  %v3131_v19 = vpack.c.b16 %v191_v17, %v190_v16  ;;  %v193_v28 = vunpack.c.l.b16 %v178_v26  ;;  %v180_v35 = vpack.c.bf16 %v172_v33, %v172_v33  ;;  %501 = vrot.lane.b32.xlu1 %v3182_v55, %s3032_s23  ;;  %v3191_v0 = vld [vmem:[#allocation10] sm:$0xff]  ;;  %v2514_v10 = vld [vmem:[#allocation7 + $0x8] sm:$0xf0]  ;;  %v2637_v11 = vld [vmem:[#allocation7 + $0x14] sm:$0xf] }
  0x26   :  { %v3140_v29 = vpack.c.b16 %v192_v27, %v191_v17  ;;  %488 = vmatpush.bf16.msrb.mxu2 %v3148_v32  ;;  %v194_v36 = vunpack.c.l.b16 %v179_v34  ;;  %v161_v44 = vperm.slane %v3166_v42, 1  ;;  %v280_v45 = vunpack.c.l.b16 %v181_v43  ;;  %v2635_v9 = vld [vmem:[#allocation7 + $0x4] sm:$0xf]  ;;  %v2498_v13 = vld [vmem:[#allocation7 + $0x18] sm:$0xf0] }
  0x27   :  { %2502 = vmatmul.msk.bf16.vlgmr.msra.gmra.mxu0 %vm210_vm0, %v3129_v18  ;;  %2518 = vmatmul.msk.bf16.vlgmr.msra.gmra.mxu2 %vm210_vm0, %v3131_v19  ;;  %v3142_v30 = vpack.c.b16 %v193_v28, %v192_v27  ;;  %v195_v37 = vunpack.c.l.b16 %v180_v35  ;;  %v363_v50 = vperm.slane %v3166_v42, 0  ;;  %v2517_v12 = vor.u32 %v2635_v9, %v2514_v10 }
  0x28   :  { %v3153_v38 = vpack.c.b16 %v194_v36, %v193_v28  ;;  %v3172_v47 = vpack.c.b16 %v280_v45, %v280_v45  ;;  %v2501_v16 = vor.u32 %v2637_v11, %v2498_v13 }
  0x29   :  { %429 = vmatpush.bf16.msrb.mxu0 %v3137_v24  ;;  %v3155_v39 = vpack.c.b16 %v195_v37, %v194_v36  ;;  %v3170_v46 = vpack.c.b16 %v195_v37, %v195_v37  ;;  %342 = vmatpush.bf16.msra.mxu3 %v2517_v12  ;;  %v160_v37 = vld [vmem:[#allocation13 + $0x8] sm:$0x3f] }
  0x2a   :  { %489 = vmatpush.bf16.msrb.mxu2 %v3159_v40  ;;  %258 = vmatpush.bf16.msra.mxu1 %v2501_v16  ;;  %v364_v43 = vperm.slane %v160_v37, 0 }
  0x2c   :  { %503 = vrot.lane.b32.xlu0 %v3159_v40, %s3032_s23  ;;  %2522 = vmatmul.msk.bf16.vlgmr.msra.gmra.mxu3 %vm210_vm0, %v3131_v19 }
  0x2d   :  { %499 = vrot.lane.b32.xlu1 %v3191_v0, %s3032_s23  ;;  %2506 = vmatmul.msk.bf16.vlgmr.msra.gmra.mxu1 %vm210_vm0, %v3129_v18 }
  0x2e   :  { %490 = vmatpush.bf16.msrb.mxu2 %v3182_v55 }
  0x32   :  { %491 = vmatpush.bf16.msrb.mxu2 %v3191_v0 }
  0x34   :  { %449 = vrot.lane.b32.xlu0 %v161_v44, %s3038_s7 }
  0x37   :  { %2503 = vmatmul.msk.bf16.gmra.mxu0 %vm210_vm0, %v3140_v29  ;;  %2519 = vmatmul.msk.bf16.gmra.mxu2 %vm210_vm0, %v3142_v30 }
  0x3c   :  { %2523 = vmatmul.msk.bf16.gmra.mxu3 %vm210_vm0, %v3142_v30 }
  0x3d   :  { %2507 = vmatmul.msk.bf16.gmra.mxu1 %vm210_vm0, %v3140_v29 }
  0x47   :  { %2504 = vmatmul.msk.bf16.gmra.mxu0 %vm210_vm0, %v3153_v38  ;;  %2520 = vmatmul.msk.bf16.gmra.mxu2 %vm210_vm0, %v3155_v39 }
  0x4c   :  { %2524 = vmatmul.msk.bf16.gmra.mxu3 %vm210_vm0, %v3155_v39  ;;  %v397_v39 = vld [vmem:[#allocation5] sm:$0xff] }
  0x4d   :  { %2508 = vmatmul.msk.bf16.gmra.mxu1 %vm210_vm0, %v3153_v38  ;;  %548 = vrot.lane.b32.xlu2 %v397_v39, %s3040_s13 }
  0x57   :  { %2505 = vmatmul.msk.bf16.gmra.mxu0 %vm210_vm0, %v3170_v46  ;;  %2521 = vmatmul.msk.bf16.gmra.mxu2 %vm210_vm0, %v3172_v47 }
  0x5c   :  { %2525 = vmatmul.msk.bf16.gmra.mxu3 %vm210_vm0, %v3172_v47 }
  0x5d   :  { %2509 = vmatmul.msk.bf16.gmra.mxu1 %vm210_vm0, %v3170_v46 }
  0x67   :  { %430 = vmatmul.bf16.vlgmr.msrb.gmra.mxu0 %v3039_v48 }
  0x96   :  { %v3196_v5 = vpop.permute.xlu0 %505 }
  0x97   :  { %518 = vmatpush.bf16.msrb.mxu3 %v3196_v5  ;;  %v3226_v29 = vpop.permute.xlu1 %501 }
  0x9e   :  { %v3201_v20 = vpop.permute.xlu0 %503 }
  0x9f   :  { %519 = vmatpush.bf16.msrb.mxu3 %v3201_v20  ;;  %v3229_v30 = vpop.permute.xlu1 %499 }
  0xa3   :  { %520 = vmatpush.bf16.msrb.mxu3 %v3226_v29 }
  0xa4   :  { %v232_v49 = vpop.f32.mrf.mxu0 }
  0xa7   :  { %521 = vmatpush.bf16.msrb.mxu3 %v3229_v30 }
  0xaa   :  { %v316_v51 = vpop.f32.mrf.mxu2  ;;  %v260_v36 = vpop.f32.mrf.mxu1 }
  0xab   :  { %v317_v52 = vadd.f32 %v316_v51, %v232_v49  ;;  %785 = vmatpush.bf16.msra.mxu3 %v3126_v14 }
  0xac   :  { %v234_v53 = vpop.f32.mrf.mxu0 }
  0xad   :  { %v3180_v54 = vadd.f32 %v363_v50, %v317_v52 }
  0xaf   :  { %786 = vmatpush.bf16.msra.mxu3 %v3137_v24  ;;  %v344_v38 = vpop.f32.mrf.mxu3 }
  0xb0   :  { %v345_v41 = vadd.f32 %v344_v38, %v260_v36 }
  0xb2   :  { %v318_v56 = vpop.f32.mrf.mxu2  ;;  %v366_v44 = vadd.f32 %v364_v43, %v345_v41  ;;  %v262_v45 = vpop.f32.mrf.mxu1 }
  0xb3   :  { %v319_v57 = vadd.f32 %v318_v56, %v234_v53  ;;  %v3238_v56 = vperm.slane %v3166_v42, 2 }
  0xb4   :  { %v237_v58 = vpop.f32.mrf.mxu0  ;;  %381 = vst.msk [vmem:[#allocation2 + $0x8] sm:$0xff] %vm380_vm1, %v366_v44 }
  0xb5   :  { %v3187_v59 = vadd.f32 %v363_v50, %v319_v57 }
  0xb7   :  { %v346_v46 = vpop.f32.mrf.mxu3 }
  0xb8   :  { %v347_v47 = vadd.f32 %v346_v46, %v262_v45 }
  0xba   :  { %v321_v60 = vpop.f32.mrf.mxu2  ;;  %v368_v49 = vadd.f32 %v364_v43, %v347_v47 }
  0xbb   :  { %v322_v61 = vadd.f32 %v321_v60, %v237_v58 }
  0xbc   :  { %v239_v62 = vpop.f32.mrf.mxu0  ;;  %383 = vst.msk [vmem:[#allocation2 + $0x18] sm:$0xff] %vm380_vm1, %v368_v49 }
  0xbd   :  { %v3189_v63 = vadd.f32 %v363_v50, %v322_v61 }
  0xbf   :  { %v349_v51 = vpop.f32.mrf.mxu3 }
  0xc2   :  { %v323_v1 = vpop.f32.mrf.mxu2 }
  0xc3   :  { %v324_v2 = vadd.f32 %v323_v1, %v239_v62 }
  0xc4   :  { %v242_v3 = vpop.f32.mrf.mxu0 }
  0xc5   :  { %v371_v4 = vadd.f32 %v363_v50, %v324_v2 }
  0xc7   :  { %386 = vst [vmem:[#allocation2 + $0x30] sm:$0xff] %v371_v4  ;;  %v351_v61 = vpop.f32.mrf.mxu3 }
  0xca   :  { %v326_v6 = vpop.f32.mrf.mxu2 }
  0xcb   :  { %v327_v7 = vadd.f32 %v326_v6, %v242_v3 }
  0xcc   :  { %v244_v8 = vpop.f32.mrf.mxu0 }
  0xcd   :  { %v373_v15 = vadd.f32 %v363_v50, %v327_v7 }
  0xcf   :  { %388 = vst [vmem:[#allocation2 + $0x40] sm:$0xff] %v373_v15  ;;  %v354_v7 = vpop.f32.mrf.mxu3 }
  0xd2   :  { %v328_v17 = vpop.f32.mrf.mxu2 }
  0xd3   :  { %v329_v21 = vadd.f32 %v328_v17, %v244_v8 }
  0xd4   :  { %v247_v22 = vpop.f32.mrf.mxu0 }
  0xd5   :  { %v375_v23 = vadd.f32 %v363_v50, %v329_v21 }
  0xd7   :  { %390 = vst [vmem:[#allocation2 + $0x50] sm:$0xff] %v375_v23  ;;  %v356_v11 = vpop.f32.mrf.mxu3 }
  0xda   :  { %v331_v25 = vpop.f32.mrf.mxu2 }
  0xdb   :  { %v332_v26 = vadd.f32 %v331_v25, %v247_v22  ;;  %v3247_v22 = vperm.slane %v3166_v42, 3 }
  0xdc   :  { %v249_v27 = vpop.f32.mrf.mxu0 }
  0xdd   :  { %v377_v28 = vadd.f32 %v363_v50, %v332_v26  ;;  %v265_v50 = vpop.f32.mrf.mxu1  ;;  %v3255_v26 = vld [vmem:[%s3927_s5] sm:$0xff]  ;;  %v2641_v27 = vld [vmem:[#allocation8 + $0x14] sm:$0xf] }
  0xde   :  { %v350_v52 = vadd.f32 %v349_v51, %v265_v50  ;;  %574 = vmatpush.bf16.msra.mxu0 %v3255_v26  ;;  %v549_v50 = vpop.permute.xlu2 %548 }
  0xdf   :  { %392 = vst [vmem:[#allocation2 + $0x60] sm:$0xff] %v377_v28  ;;  %v359_v16 = vpop.f32.mrf.mxu3  ;;  %v2538_v28 = vld [vmem:[#allocation8 + $0x18] sm:$0xf0] }
  0xe0   :  { %v370_v53 = vadd.f32 %v364_v43, %v350_v52 }
  0xe2   :  { %v333_v19 = vpop.f32.mrf.mxu2  ;;  %385 = vst.msk [vmem:[#allocation2 + $0x28] sm:$0xff] %vm380_vm1, %v370_v53 }
  0xe3   :  { %v3257_v19 = vor.u32 %v2641_v27, %v2538_v28 }
  0xe4   :  { %v3210_v31 = vpop.f32.mrf.mxu0 }
  0xe5   :  { %v3214_v18 = vadd.f32 %v3210_v31, %v3180_v54  ;;  %v267_v58 = vpop.f32.mrf.mxu1  ;;  %441 = vmatpush.bf16.msrb.mxu1 %v3257_v19  ;;  %798 = vmatpush.bf16.msrb.mxu0 %v3257_v19 }
  0xe6   :  { %v352_v62 = vadd.f32 %v351_v61, %v267_v58  ;;  %v2530_v58 = vld [vmem:[#allocation8 + $0x8] sm:$0xf0] }
  0xe7   :  { %v455_v33 = vmax.f32 %v3214_v18, 0.0  ;;  %v361_v21 = vpop.f32.mrf.mxu3 }
  0xe8   :  { %v372_v2 = vadd.f32 %v364_v43, %v352_v62  ;;  %v3291_v21 = vld [vmem:[#allocation11] sm:$0xff] }
  0xe9   :  { %v456_v34 = vpack.c.bf16 %v455_v33, %v455_v33 }
  0xea   :  { %387 = vst.msk [vmem:[#allocation2 + $0x38] sm:$0xff] %vm380_vm1, %v372_v2  ;;  %v3279_v2 = vpop.permute.xlu0 %449 }
  0xeb   :  { %2558 = vmatmul.msk.bf16.vlgmr.msrb.gmra.mxu2 %vm380_vm1, %v456_v34 }
  0xec   :  { %v433_v35 = vpop.f32.mrf.mxu0 }
  0xed   :  { %v270_v6 = vpop.f32.mrf.mxu1 }
  0xee   :  { %v355_v8 = vadd.f32 %v354_v7, %v270_v6 }
  0xf0   :  { %v374_v9 = vadd.f32 %v364_v43, %v355_v8 }
  0xf2   :  { %389 = vst.msk [vmem:[#allocation2 + $0x48] sm:$0xff] %vm380_vm1, %v374_v9 }
  0xf5   :  { %v272_v10 = vpop.f32.mrf.mxu1 }
  0xf6   :  { %v357_v12 = vadd.f32 %v356_v11, %v272_v10 }
  0xf8   :  { %v376_v13 = vadd.f32 %v364_v43, %v357_v12 }
  0xfa   :  { %391 = vst.msk [vmem:[#allocation2 + $0x58] sm:$0xff] %vm380_vm1, %v376_v13 }
  0xfd   :  { %v275_v15 = vpop.f32.mrf.mxu1 }
  0xfe   :  { %v3288_v15 = vld [vmem:[#allocation11 + $0x8] sm:$0xff] }
 0x105   :  { %v277_v17 = vpop.f32.mrf.mxu1 }
 0x16e   :  { %v493_v57 = vpop.f32.mrf.mxu2 }
 0x16f   :  { %v494_v60 = vadd.f32 %v493_v57, %v3238_v56  ;;  %v2639_v57 = vld [vmem:[#allocation8 + $0x4] sm:$0xf] }
 0x171   :  { %v497_v1 = vmax.f32 %v494_v60, 0.0  ;;  %v3272_v60 = vor.u32 %v2639_v57, %v2530_v58 }
 0x173   :  { %v498_v3 = vpack.c.bf16 %v497_v1, %v497_v1  ;;  %442 = vmatpush.bf16.msrb.mxu1 %v3272_v60  ;;  %799 = vmatpush.bf16.msrb.mxu0 %v3272_v60 }
 0x175   :  { %2559 = vmatmul.msk.bf16.vlgmr.msrb.gmra.mxu3 %vm380_vm1, %v498_v3 }
 0x176   :  { %v495_v4 = vpop.f32.mrf.mxu2  ;;  %885 = vmatpush.bf16.msrb.mxu3 %v3255_v26  ;;  %443 = vmatmul.bf16.vlgmr.msrb.gmra.mxu1 %v3039_v48  ;;  %v452_v48 = vadd.f32 %v3279_v2, %v3210_v31 }
 0x177   :  { %611 = vmatpush.bf16.msra.mxu1 %v3288_v15 }
 0x17b   :  { %612 = vmatpush.bf16.msra.mxu1 %v3291_v21 }
 0x17f   :  { %817 = vmatpush.bf16.msrb.mxu1 %v3148_v32 }
 0x183   :  { %818 = vmatpush.bf16.msrb.mxu1 %v3159_v40 }
 0x187   :  { %819 = vmatpush.bf16.msrb.mxu1 %v3182_v55 }
 0x18b   :  { %820 = vmatpush.bf16.msrb.mxu1 %v3191_v0 }
 0x1f3   :  { %v444_v3 = vpop.f32.mrf.mxu1 }
 0x1f4   :  { %v453_v4 = vadd.f32 %v3279_v2, %v444_v3 }
 0x1f8   :  { %v523_v23 = vpop.f32.mrf.mxu3 }
 0x1f9   :  { %v3250_v25 = vadd.f32 %v523_v23, %v3247_v22 }
 0x1fb   :  { %v530_v33 = vand.u32 2147483647, %v3250_v25  ;;  %v527_v47 = vmax.f32 %v3250_v25, 0.0  ;;  %vm528_vm3 = vcmp.ne.f32.partialorder %v3250_v25, %v3250_v25  ;;  %v446_v6 = vpop.f32.mrf.mxu1 }
 0x1fd   :  { %v531_v34 = vsub.f32 0.0, %v530_v33 }
 0x1ff   :  { %v532_v35 = vmul.f32 1.442695, %v531_v34 }
 0x200   :  { %v525_v36 = vpop.f32.mrf.mxu3 }
 0x201   :  { %2671 = vpow2.f32 %v532_v35 }
 0x207   :  { %v2672_v37 = vpop.eup %2671 }
 0x208   :  { %v534_v38 = vadd.f32 1.0, %v2672_v37  ;;  %v537_v39 = vmul.f32 -0.5, %v2672_v37  ;;  %v540_v43 = vand.u32 2147483647, %v2672_v37 }
 0x20a   :  { %2673 = vlog2.f32 %v534_v38  ;;  %v538_v41 = vadd.f32 1.0, %v537_v39  ;;  %vm541_vm2 = vcmp.lt.f32.partialorder %v540_v43, 0.0004427343 }
 0x20c   :  { %v539_v46 = vmul.f32 %v2672_v37, %v538_v41 }
 0x210   :  { %v2674_v44 = vpop.eup %2673 }
 0x211   :  { %v536_v45 = vmul.f32 0.6931472, %v2674_v44  ;;  %v395_v44 = vld [vmem:[#allocation2 + $0x8] sm:$0xff] }
 0x213   :  { %v542_v49 = vsel %vm541_vm2, %v539_v46, %v536_v45 }
 0x214   :  { %v543_v51 = vadd.f32 %v542_v49, %v527_v47 }
 0x216   :  { %v3268_v52 = vsel %vm528_vm3, %v3250_v25, %v543_v51 }
 0x217   :  { %v551_v53 = vmul.f32 %v549_v50, %v3268_v52 }
 0x219   :  { %553 = vrot.lane.b32.xlu2 %v551_v53, %s3038_s7 }
 0x221   :  { %703 = vrot.lane.b32.xlu2 %v453_v4, %s3032_s23 }
 0x273   :  { %v554_v61 = vpop.permute.xlu2 %553 }
 0x274   :  { %v556_v62 = vadd.f32 %v554_v61, %v3250_v25 }
 0x276   :  { %v557_v1 = vpack.c.bf16 %v556_v62, %v556_v62 }
 0x278   :  { %2564 = vmatmul.msk.bf16.vlgmr.msra.gmra.mxu0 %vm210_vm0, %v557_v1 }
 0x279   :  { %910 = vmatpush.bf16.msra.mxu0 %v3288_v15 }
 0x27b   :  { %v704_v37 = vpop.permute.xlu2 %703 }
 0x27d   :  { %911 = vmatpush.bf16.msra.mxu0 %v3291_v21 }
 0x2f5   :  { %v576_v7 = vpop.f32.mrf.mxu0 }
 0x2f6   :  { %581 = vrot.lane.b32.xlu1 %v576_v7, %s3032_s23 }
 0x2fd   :  { %v578_v8 = vpop.f32.mrf.mxu0 }
 0x368   :  { %v582_v9 = vpop.permute.xlu1 %581 }
 0x369   :  { %v660_v10 = vadd.f32 %v582_v9, %v3180_v54  ;;  %v584_v11 = vadd.f32 %v582_v9, %v3214_v18  ;;  %v661_v45 = vadd.f32 %v582_v9, %v395_v44  ;;  %v775_v9 = vld [vmem:[#allocation5 + $0x8] sm:$0xff] }
 0x36b   :  { %v662_v12 = vadd.f32 %v660_v10, %v452_v48  ;;  %v585_v13 = vmax.f32 %v584_v11, 0.0  ;;  %v663_v50 = vadd.f32 %v661_v45, %v453_v4 }
 0x36d   :  { %v2575_v16 = vmul.f32 -1.442695, %v662_v12  ;;  %v586_v17 = vpack.c.bf16 %v585_v13, %v585_v13  ;;  %v2576_v53 = vmul.f32 -1.442695, %v663_v50  ;;  %v3314_v13 = vperm.slane %v3166_v42, 4 }
 0x36f   :  { %2675 = vpow2.f32 %v2575_v16  ;;  %588 = vrot.lane.b32.xlu2 %v586_v17, %s3032_s23 }
 0x375   :  { %v2676_v54 = vpop.eup %2675 }
 0x376   :  { %v670_v31 = vadd.f32 1.0, %v2676_v54 }
 0x377   :  { %865 = vrot.lane.b32.xlu2 %v775_v9, %s3040_s13 }
 0x378   :  { %2677 = vrcp.f32 %v670_v31  ;;  %v683_v28 = vand.u32 2147483648, %v670_v31  ;;  %v681_v34 = vand.u32 2147483647, %v670_v31  ;;  %vm677_vm5 = vweird.f32 %v670_v31 }
 0x37a   :  { %v684_v36 = vor.u32 1.1754944e-38, %v683_v28  ;;  %vm682_vm7 = vcmp.eq.f32.partialorder %v681_v34, 8.507059e+37 }
 0x37e   :  { %v2678_v18 = vpop.eup %2677 }
 0x37f   :  { %v673_v23 = vmul.f32 %v2678_v18, %v670_v31  ;;  %vm678_vm4 = vweird.f32 %v2678_v18 }
 0x380   :  { %vm679_vm6 = vmor %vm677_vm5, %vm678_vm4 }
 0x381   :  { %v674_v27 = vsub.f32 1.0, %v673_v23 }
 0x383   :  { %v675_v33 = vmul.f32 %v2678_v18, %v674_v27 }
 0x385   :  { %v676_v35 = vadd.f32 %v2678_v18, %v675_v33 }
 0x387   :  { %v680_v38 = vsel %vm679_vm6, %v2678_v18, %v676_v35 }
 0x388   :  { %v685_v39 = vsel %vm682_vm7, %v684_v36, %v680_v38 }
 0x389   :  { %v706_v41 = vmul.f32 %v704_v37, %v685_v39 }
 0x38b   :  { %708 = vrot.lane.b32.xlu0 %v706_v41, %s3032_s23 }
 0x393   :  { %622 = vrot.lane.b32.xlu0 %v3288_v15, %s3038_s7 }
 0x3c9   :  { %v589_v43 = vpop.permute.xlu2 %588 }
 0x3ca   :  { %2573 = vmatmul.msk.bf16.vlgmr.msra.gmra.mxu1 %vm418_vm8, %v589_v43 }
 0x3fd   :  { %v709_v46 = vpop.permute.xlu0 %708 }
 0x3fe   :  { %v711_v47 = vadd.f32 %v709_v46, %v661_v45 }
 0x400   :  { %2679 = vtanh.f32 %v711_v47 }
 0x401   :  { %2681 = vpow2.f32 %v2576_v53 }
 0x405   :  { %v3308_v62 = vpop.permute.xlu0 %622 }
 0x406   :  { %v2680_v49 = vpop.eup %2679  ;;  %635 = vmatpush.bf16.msra.mxu2 %v3308_v62  ;;  %928 = vmatpush.bf16.msra.mxu1 %v3308_v62 }
 0x407   :  { %715 = vrot.lane.b32.xlu1 %v2680_v49, %s3038_s7  ;;  %v2682_v58 = vpop.eup %2681 }
 0x408   :  { %v671_v61 = vadd.f32 1.0, %v2682_v58 }
 0x40a   :  { %2683 = vrcp.f32 %v671_v61  ;;  %v698_v4 = vand.u32 2147483648, %v671_v61  ;;  %vm692_vm10 = vweird.f32 %v671_v61  ;;  %v696_v48 = vand.u32 2147483647, %v671_v61 }
 0x40c   :  { %v699_v11 = vor.u32 1.1754944e-38, %v698_v4  ;;  %vm697_vm12 = vcmp.eq.f32.partialorder %v696_v48, 8.507059e+37 }
 0x40f   :  { %620 = vrot.lane.b32.xlu1 %v3291_v21, %s3038_s7 }
 0x410   :  { %v2684_v1 = vpop.eup %2683 }
 0x411   :  { %v688_v3 = vmul.f32 %v2684_v1, %v671_v61  ;;  %vm693_vm9 = vweird.f32 %v2684_v1 }
 0x412   :  { %vm694_vm11 = vmor %vm692_vm10, %vm693_vm9 }
 0x413   :  { %v689_v6 = vsub.f32 1.0, %v688_v3 }
 0x415   :  { %v690_v7 = vmul.f32 %v2684_v1, %v689_v6 }
 0x417   :  { %v691_v8 = vadd.f32 %v2684_v1, %v690_v7 }
 0x419   :  { %v695_v10 = vsel %vm694_vm11, %v2684_v1, %v691_v8 }
 0x41a   :  { %v700_v12 = vsel %vm697_vm12, %v699_v11, %v695_v10 }
 0x41b   :  { %v713_v16 = vsub.f32 1.0, %v700_v12  ;;  %v719_v31 = vmul.f32 0.0, %v700_v12 }
 0x447   :  { %v614_v51 = vpop.f32.mrf.mxu1 }
 0x448   :  { %v615_v18 = vadd.f32 %v614_v51, %v3314_v13 }
 0x44a   :  { %v618_v28 = vmax.f32 %v615_v18, 0.0 }
 0x44c   :  { %v619_v42 = vpack.c.bf16 %v618_v28, %v618_v28 }
 0x44f   :  { %v616_v57 = vpop.f32.mrf.mxu1 }
 0x479   :  { %v716_v17 = vpop.permute.xlu1 %715 }
 0x47a   :  { %v718_v54 = vmul.f32 %v716_v17, %v713_v16 }
 0x47c   :  { %v3317_v23 = vadd.f32 %v719_v31, %v718_v54  ;;  %v866_v54 = vpop.permute.xlu2 %865 }
 0x47e   :  { %v721_v27 = vpack.c.bf16 %v3317_v23, %v3317_v23 }
 0x480   :  { %2578 = vmatmul.msk.bf16.vlgmr.msra.gmra.mxu3 %vm418_vm8, %v721_v27  ;;  %2579 = vmatmul.msk.bf16.vlgmr.msrb.gmra.mxu0 %vm418_vm8, %v721_v27 }
 0x481   :  { %v3323_v33 = vpop.permute.xlu1 %620  ;;  %1110 = vmatpush.bf16.msrb.mxu0 %v3148_v32  ;;  %1091 = vmatpush.bf16.msra.mxu3 %v3257_v19 }
 0x482   :  { %636 = vmatpush.bf16.msra.mxu2 %v3323_v33  ;;  %929 = vmatpush.bf16.msra.mxu1 %v3323_v33 }
 0x485   :  { %2574 = vmatmul.msk.bf16.vlgmr.msra.gmra.mxu2 %vm418_vm8, %v619_v42  ;;  %1111 = vmatpush.bf16.msrb.mxu0 %v3159_v40 }
 0x486   :  { %835 = vmatpush.bf16.msrb.mxu2 %v3196_v5  ;;  %1092 = vmatpush.bf16.msra.mxu3 %v3272_v60 }
 0x489   :  { %1112 = vmatpush.bf16.msrb.mxu0 %v3182_v55 }
 0x48a   :  { %836 = vmatpush.bf16.msrb.mxu2 %v3201_v20 }
 0x48d   :  { %1113 = vmatpush.bf16.msrb.mxu0 %v3191_v0 }
 0x48e   :  { %837 = vmatpush.bf16.msrb.mxu2 %v3226_v29 }
 0x492   :  { %838 = vmatpush.bf16.msrb.mxu2 %v3229_v30 }
 0x496   :  { %1078 = vmatpush.bf16.msra.mxu2 %v3126_v14 }
 0x49a   :  { %1079 = vmatpush.bf16.msra.mxu2 %v3137_v24 }
 0x4fd   :  { %v801_v34 = vpop.f32.mrf.mxu0 }
 0x4fe   :  { %v3341_v35 = vadd.f32 %v801_v34, %v3279_v2 }
 0x500   :  { %996 = vrot.lane.b32.xlu2 %v3341_v35, %s3032_s23 }
 0x503   :  { %v788_v36 = vpop.f32.mrf.mxu3 }
 0x504   :  { %v807_v37 = vadd.f32 %v788_v36, %v3187_v59 }
 0x505   :  { %v803_v38 = vpop.f32.mrf.mxu0 }
 0x506   :  { %v808_v39 = vmax.f32 %v807_v37, 0.0 }
 0x508   :  { %v809_v41 = vpack.c.bf16 %v808_v39, %v808_v39  ;;  %v3346_v43 = vpop.f32.mrf.mxu2 }
 0x50a   :  { %2580 = vmatmul.msk.bf16.vlgmr.msrb.gmra.mxu1 %vm380_vm1, %v809_v41  ;;  %v805_v41 = vadd.f32 %v788_v36, %v3279_v2 }
 0x50b   :  { %1128 = vmatpush.bf16.msrb.mxu1 %v3196_v5  ;;  %v790_v44 = vpop.f32.mrf.mxu3 }
 0x50f   :  { %1129 = vmatpush.bf16.msrb.mxu1 %v3201_v20 }
 0x510   :  { %v640_v45 = vpop.f32.mrf.mxu2 }
 0x513   :  { %1130 = vmatpush.bf16.msrb.mxu1 %v3226_v29 }
 0x517   :  { %1131 = vmatpush.bf16.msrb.mxu1 %v3229_v30 }
 0x587   :  { %v822_v46 = vpop.f32.mrf.mxu1 }
 0x588   :  { %v823_v47 = vadd.f32 %v822_v46, %v3238_v56 }
 0x58a   :  { %v826_v49 = vmax.f32 %v823_v47, 0.0 }
 0x58c   :  { %v827_v50 = vpack.c.bf16 %v826_v49, %v826_v49 }
 0x58e   :  { %2581 = vmatmul.msk.bf16.vlgmr.msrb.gmra.mxu2 %vm380_vm1, %v827_v50 }
 0x58f   :  { %v824_v51 = vpop.f32.mrf.mxu1  ;;  %1178 = vmatpush.bf16.msrb.mxu2 %v3255_v26 }
 0x611   :  { %v840_v53 = vpop.f32.mrf.mxu2 }
 0x612   :  { %v3357_v57 = vadd.f32 %v840_v53, %v3247_v22 }
 0x614   :  { %v847_v58 = vand.u32 2147483647, %v3357_v57  ;;  %v844_v12 = vmax.f32 %v3357_v57, 0.0  ;;  %vm845_vm14 = vcmp.ne.f32.partialorder %v3357_v57, %v3357_v57 }
 0x616   :  { %v848_v61 = vsub.f32 0.0, %v847_v58 }
 0x618   :  { %v849_v1 = vmul.f32 1.442695, %v848_v61 }
 0x619   :  { %v842_v3 = vpop.f32.mrf.mxu2 }
 0x61a   :  { %2685 = vpow2.f32 %v849_v1 }
 0x620   :  { %v2686_v6 = vpop.eup %2685 }
 0x621   :  { %v851_v7 = vadd.f32 1.0, %v2686_v6  ;;  %v854_v8 = vmul.f32 -0.5, %v2686_v6  ;;  %v857_v9 = vand.u32 2147483647, %v2686_v6 }
 0x623   :  { %2687 = vlog2.f32 %v851_v7  ;;  %v855_v4 = vadd.f32 1.0, %v854_v8  ;;  %vm858_vm13 = vcmp.lt.f32.partialorder %v857_v9, 0.0004427343  ;;  %v997_v8 = vpop.permute.xlu2 %996 }
 0x625   :  { %v856_v11 = vmul.f32 %v2686_v6, %v855_v4 }
 0x629   :  { %v2688_v48 = vpop.eup %2687 }
 0x62a   :  { %v853_v10 = vmul.f32 0.6931472, %v2688_v48 }
 0x62c   :  { %v859_v16 = vsel %vm858_vm13, %v856_v11, %v853_v10  ;;  %v773_v10 = vld [vmem:[#allocation2 + $0x18] sm:$0xff] }
 0x62d   :  { %v860_v17 = vadd.f32 %v859_v16, %v844_v12 }
 0x62f   :  { %v3364_v31 = vsel %vm845_vm14, %v3357_v57, %v860_v17 }
 0x630   :  { %v868_v18 = vmul.f32 %v866_v54, %v3364_v31 }
 0x632   :  { %870 = vrot.lane.b32.xlu0 %v868_v18, %s3038_s7 }
 0x6a4   :  { %v871_v27 = vpop.permute.xlu0 %870 }
 0x6a5   :  { %v873_v28 = vadd.f32 %v871_v27, %v3357_v57 }
 0x6a7   :  { %v874_v42 = vpack.c.bf16 %v873_v28, %v873_v28 }
 0x6a9   :  { %2582 = vmatmul.msk.bf16.vlgmr.msrb.gmra.mxu3 %vm210_vm0, %v874_v42 }
 0x6aa   :  { %1203 = vmatpush.bf16.msrb.mxu3 %v3288_v15 }
 0x6ae   :  { %1204 = vmatpush.bf16.msrb.mxu3 %v3291_v21 }
 0x72c   :  { %v887_v34 = vpop.f32.mrf.mxu3 }
 0x72d   :  { %892 = vrot.lane.b32.xlu1 %v887_v34, %s3032_s23 }
 0x734   :  { %v889_v38 = vpop.f32.mrf.mxu3 }
 0x79f   :  { %v893_v39 = vpop.permute.xlu1 %892 }
 0x7a0   :  { %v953_v44 = vadd.f32 %v893_v39, %v3187_v59  ;;  %v895_v45 = vadd.f32 %v893_v39, %v807_v37  ;;  %v954_v11 = vadd.f32 %v893_v39, %v773_v10 }
 0x7a2   :  { %v955_v46 = vadd.f32 %v953_v44, %v805_v41  ;;  %v896_v47 = vmax.f32 %v895_v45, 0.0  ;;  %v956_v54 = vadd.f32 %v954_v11, %v3341_v35 }
 0x7a4   :  { %v2585_v49 = vmul.f32 -1.442695, %v955_v46  ;;  %v897_v50 = vpack.c.bf16 %v896_v47, %v896_v47  ;;  %v2586_v27 = vmul.f32 -1.442695, %v956_v54 }
 0x7a6   :  { %2689 = vpow2.f32 %v2585_v49  ;;  %899 = vrot.lane.b32.xlu2 %v897_v50, %s3032_s23 }
 0x7ac   :  { %v2690_v51 = vpop.eup %2689 }
 0x7ad   :  { %v963_v53 = vadd.f32 1.0, %v2690_v51 }
 0x7af   :  { %2691 = vrcp.f32 %v963_v53  ;;  %v976_v3 = vand.u32 2147483648, %v963_v53  ;;  %v974_v36 = vand.u32 2147483647, %v963_v53  ;;  %vm970_vm2 = vweird.f32 %v963_v53 }
 0x7b1   :  { %v977_v59 = vor.u32 1.1754944e-38, %v976_v3  ;;  %vm975_vm4 = vcmp.eq.f32.partialorder %v974_v36, 8.507059e+37 }
 0x7b5   :  { %v2692_v58 = vpop.eup %2691 }
 0x7b6   :  { %v966_v61 = vmul.f32 %v2692_v58, %v963_v53  ;;  %vm971_vm15 = vweird.f32 %v2692_v58 }
 0x7b7   :  { %vm972_vm3 = vmor %vm970_vm2, %vm971_vm15 }
 0x7b8   :  { %v967_v1 = vsub.f32 1.0, %v966_v61 }
 0x7ba   :  { %v968_v6 = vmul.f32 %v2692_v58, %v967_v1 }
 0x7bc   :  { %v969_v7 = vadd.f32 %v2692_v58, %v968_v6 }
 0x7be   :  { %v973_v37 = vsel %vm972_vm3, %v2692_v58, %v969_v7 }
 0x7bf   :  { %v978_v4 = vsel %vm975_vm4, %v977_v59, %v973_v37  ;;  %v1068_v59 = vld [vmem:[#allocation5 + $0x10] sm:$0xff] }
 0x7c0   :  { %v999_v9 = vmul.f32 %v997_v8, %v978_v4 }
 0x7c2   :  { %1001 = vrot.lane.b32.xlu0 %v999_v9, %s3032_s23 }
 0x7ca   :  { %1158 = vrot.lane.b32.xlu0 %v1068_v59, %s3040_s13 }
 0x800   :  { %v900_v48 = vpop.permute.xlu2 %899 }
 0x801   :  { %2583 = vmatmul.msk.bf16.vlgmr.msra.gmra.mxu0 %vm418_vm8, %v900_v48 }
 0x802   :  { %1221 = vmatpush.bf16.msra.mxu0 %v3308_v62 }
 0x806   :  { %1222 = vmatpush.bf16.msra.mxu0 %v3323_v33 }
 0x834   :  { %v1002_v12 = vpop.permute.xlu0 %1001 }
 0x835   :  { %v1004_v16 = vadd.f32 %v1002_v12, %v954_v11 }
 0x837   :  { %2693 = vtanh.f32 %v1004_v16 }
 0x838   :  { %2695 = vpow2.f32 %v2586_v27 }
 0x83d   :  { %v2694_v17 = vpop.eup %2693 }
 0x83e   :  { %1008 = vrot.lane.b32.xlu1 %v2694_v17, %s3038_s7  ;;  %v2696_v39 = vpop.eup %2695 }
 0x83f   :  { %v964_v41 = vadd.f32 1.0, %v2696_v39 }
 0x841   :  { %2697 = vrcp.f32 %v964_v41  ;;  %v991_v49 = vand.u32 2147483648, %v964_v41  ;;  %vm985_vm6 = vweird.f32 %v964_v41  ;;  %v989_v50 = vand.u32 2147483647, %v964_v41 }
 0x843   :  { %v992_v53 = vor.u32 1.1754944e-38, %v991_v49  ;;  %vm990_vm9 = vcmp.eq.f32.partialorder %v989_v50, 8.507059e+37 }
 0x847   :  { %v2698_v44 = vpop.eup %2697 }
 0x848   :  { %v981_v45 = vmul.f32 %v2698_v44, %v964_v41  ;;  %vm986_vm5 = vweird.f32 %v2698_v44 }
 0x849   :  { %vm987_vm7 = vmor %vm985_vm6, %vm986_vm5 }
 0x84a   :  { %v982_v35 = vsub.f32 1.0, %v981_v45 }
 0x84c   :  { %v983_v46 = vmul.f32 %v2698_v44, %v982_v35 }
 0x84e   :  { %v984_v47 = vadd.f32 %v2698_v44, %v983_v46 }
 0x850   :  { %v988_v51 = vsel %vm987_vm7, %v2698_v44, %v984_v47 }
 0x851   :  { %v993_v58 = vsel %vm990_vm9, %v992_v53, %v988_v51  ;;  %v1159_v53 = vpop.permute.xlu0 %1158 }
 0x852   :  { %v1006_v61 = vsub.f32 1.0, %v993_v58  ;;  %v1012_v3 = vmul.f32 %v993_v58, %v3317_v23 }
 0x87e   :  { %v913_v18 = vpop.f32.mrf.mxu0 }
 0x87f   :  { %v914_v28 = vadd.f32 %v913_v18, %v3314_v13 }
 0x881   :  { %v917_v42 = vmax.f32 %v914_v28, 0.0 }
 0x883   :  { %v918_v34 = vpack.c.bf16 %v917_v42, %v917_v42 }
 0x885   :  { %2584 = vmatmul.msk.bf16.vlgmr.msra.gmra.mxu1 %vm418_vm8, %v918_v34 }
 0x886   :  { %v915_v38 = vpop.f32.mrf.mxu0  ;;  %1371 = vmatpush.bf16.msra.mxu1 %v3126_v14 }
 0x88a   :  { %1372 = vmatpush.bf16.msra.mxu1 %v3137_v24 }
 0x8b0   :  { %v1009_v1 = vpop.permute.xlu1 %1008 }
 0x8b1   :  { %v1011_v6 = vmul.f32 %v1009_v1, %v1006_v61 }
 0x8b3   :  { %v3387_v36 = vadd.f32 %v1012_v3, %v1011_v6 }
 0x8b5   :  { %v1014_v7 = vpack.c.bf16 %v3387_v36, %v3387_v36 }
 0x8b7   :  { %2588 = vmatmul.msk.bf16.vlgmr.msra.gmra.mxu2 %vm418_vm8, %v1014_v7  ;;  %2589 = vmatmul.msk.bf16.vlgmr.msra.gmra.mxu3 %vm418_vm8, %v1014_v7 }
 0x8b8   :  { %1403 = vmatpush.bf16.msra.mxu3 %v3148_v32  ;;  %1384 = vmatpush.bf16.msra.mxu2 %v3257_v19 }
 0x8bc   :  { %1404 = vmatpush.bf16.msra.mxu3 %v3159_v40  ;;  %1385 = vmatpush.bf16.msra.mxu2 %v3272_v60 }
 0x8c0   :  { %1405 = vmatpush.bf16.msra.mxu3 %v3182_v55 }
 0x8c4   :  { %1406 = vmatpush.bf16.msra.mxu3 %v3191_v0 }
 0x902   :  { %v3399_v23 = vpop.f32.mrf.mxu1 }
 0x90a   :  { %v933_v37 = vpop.f32.mrf.mxu1 }
 0x93a   :  { %v1081_v8 = vpop.f32.mrf.mxu2  ;;  %v1094_v4 = vpop.f32.mrf.mxu3 }
 0x93b   :  { %v1100_v32 = vadd.f32 %v1081_v8, %v3189_v63  ;;  %v3404_v9 = vadd.f32 %v1094_v4, %v3279_v2  ;;  %v1098_v4 = vadd.f32 %v1081_v8, %v3279_v2 }
 0x93d   :  { %v1101_v40 = vmax.f32 %v1100_v32, 0.0  ;;  %1289 = vrot.lane.b32.xlu0 %v3404_v9, %s3032_s23 }
 0x93f   :  { %v1102_v55 = vpack.c.bf16 %v1101_v40, %v1101_v40 }
 0x941   :  { %2590 = vmatmul.msk.bf16.vlgmr.msrb.gmra.mxu0 %vm380_vm1, %v1102_v55 }
 0x942   :  { %1421 = vmatpush.bf16.msrb.mxu0 %v3196_v5  ;;  %v1083_v0 = vpop.f32.mrf.mxu2  ;;  %v1096_v48 = vpop.f32.mrf.mxu3 }
 0x946   :  { %1422 = vmatpush.bf16.msrb.mxu0 %v3201_v20 }
 0x94a   :  { %1423 = vmatpush.bf16.msrb.mxu0 %v3226_v29 }
 0x94e   :  { %1424 = vmatpush.bf16.msrb.mxu0 %v3229_v30 }
 0x9be   :  { %v1115_v10 = vpop.f32.mrf.mxu0 }
 0x9bf   :  { %v1116_v11 = vadd.f32 %v1115_v10, %v3238_v56 }
 0x9c1   :  { %v1119_v12 = vmax.f32 %v1116_v11, 0.0 }
 0x9c3   :  { %v1120_v16 = vpack.c.bf16 %v1119_v12, %v1119_v12 }
 0x9c5   :  { %2591 = vmatmul.msk.bf16.vlgmr.msrb.gmra.mxu1 %vm380_vm1, %v1120_v16 }
 0x9c6   :  { %v1117_v17 = vpop.f32.mrf.mxu0  ;;  %1471 = vmatpush.bf16.msrb.mxu1 %v3255_v26 }
 0xa42   :  { %v1133_v54 = vpop.f32.mrf.mxu1 }
 0xa43   :  { %v3417_v18 = vadd.f32 %v1133_v54, %v3247_v22 }
 0xa45   :  { %v1140_v27 = vand.u32 2147483647, %v3417_v18  ;;  %v1137_v49 = vmax.f32 %v3417_v18, 0.0  ;;  %vm1138_vm11 = vcmp.ne.f32.partialorder %v3417_v18, %v3417_v18 }
 0xa47   :  { %v1141_v28 = vsub.f32 0.0, %v1140_v27 }
 0xa49   :  { %v1142_v42 = vmul.f32 1.442695, %v1141_v28 }
 0xa4a   :  { %v1135_v34 = vpop.f32.mrf.mxu1 }
 0xa4b   :  { %2699 = vpow2.f32 %v1142_v42 }
 0xa51   :  { %v2700_v38 = vpop.eup %2699 }
 0xa52   :  { %v1144_v39 = vadd.f32 1.0, %v2700_v38  ;;  %v1147_v41 = vmul.f32 -0.5, %v2700_v38  ;;  %v1150_v45 = vand.u32 2147483647, %v2700_v38 }
 0xa54   :  { %2701 = vlog2.f32 %v1144_v39  ;;  %v1148_v44 = vadd.f32 1.0, %v1147_v41  ;;  %vm1151_vm10 = vcmp.lt.f32.partialorder %v1150_v45, 0.0004427343  ;;  %v1066_v45 = vld [vmem:[#allocation2 + $0x28] sm:$0xff] }
 0xa56   :  { %v1149_v47 = vmul.f32 %v2700_v38, %v1148_v44  ;;  %v1290_v38 = vpop.permute.xlu0 %1289 }
 0xa5a   :  { %v2702_v35 = vpop.eup %2701 }
 0xa5b   :  { %v1146_v46 = vmul.f32 0.6931472, %v2702_v35 }
 0xa5d   :  { %v1152_v50 = vsel %vm1151_vm10, %v1149_v47, %v1146_v46 }
 0xa5e   :  { %v1153_v51 = vadd.f32 %v1152_v50, %v1137_v49 }
 0xa60   :  { %v3424_v58 = vsel %vm1138_vm11, %v3417_v18, %v1153_v51 }
 0xa61   :  { %v1161_v61 = vmul.f32 %v1159_v53, %v3424_v58 }
 0xa63   :  { %1163 = vrot.lane.b32.xlu1 %v1161_v61, %s3038_s7 }
 0xad5   :  { %v1164_v1 = vpop.permute.xlu1 %1163 }
 0xad6   :  { %v1166_v3 = vadd.f32 %v1164_v1, %v3417_v18 }
 0xad8   :  { %v1167_v6 = vpack.c.bf16 %v1166_v3, %v1166_v3 }
 0xada   :  { %2592 = vmatmul.msk.bf16.vlgmr.msrb.gmra.mxu2 %vm210_vm0, %v1167_v6 }
 0xadb   :  { %1496 = vmatpush.bf16.msrb.mxu2 %v3288_v15 }
 0xadf   :  { %1497 = vmatpush.bf16.msrb.mxu2 %v3291_v21 }
 0xb5d   :  { %v1180_v7 = vpop.f32.mrf.mxu2 }
 0xb5e   :  { %1185 = vrot.lane.b32.xlu2 %v1180_v7, %s3032_s23 }
 0xb65   :  { %v1182_v59 = vpop.f32.mrf.mxu2 }
 0xbb8   :  { %v1186_v37 = vpop.permute.xlu2 %1185 }
 0xbb9   :  { %v1246_v40 = vadd.f32 %v1186_v37, %v3189_v63  ;;  %v1188_v55 = vadd.f32 %v1186_v37, %v1100_v32  ;;  %v1247_v35 = vadd.f32 %v1186_v37, %v1066_v45 }
 0xbbb   :  { %v1248_v0 = vadd.f32 %v1246_v40, %v1098_v4  ;;  %v1189_v48 = vmax.f32 %v1188_v55, 0.0  ;;  %v1249_v50 = vadd.f32 %v1247_v35, %v3404_v9 }
 0xbbd   :  { %v2595_v10 = vmul.f32 -1.442695, %v1248_v0  ;;  %v1190_v11 = vpack.c.bf16 %v1189_v48, %v1189_v48  ;;  %v2596_v51 = vmul.f32 -1.442695, %v1249_v50 }
 0xbbf   :  { %2703 = vpow2.f32 %v2595_v10  ;;  %1192 = vrot.lane.b32.xlu0 %v1190_v11, %s3032_s23 }
 0xbc5   :  { %v2704_v12 = vpop.eup %2703 }
 0xbc6   :  { %v1256_v16 = vadd.f32 1.0, %v2704_v12 }
 0xbc8   :  { %2705 = vrcp.f32 %v1256_v16  ;;  %v1269_v28 = vand.u32 2147483648, %v1256_v16  ;;  %v1267_v8 = vand.u32 2147483647, %v1256_v16  ;;  %vm1263_vm13 = vweird.f32 %v1256_v16 }
 0xbca   :  { %v1270_v63 = vor.u32 1.1754944e-38, %v1269_v28  ;;  %vm1268_vm15 = vcmp.eq.f32.partialorder %v1267_v8, 8.507059e+37  ;;  %v3450_v28 = vld [vmem:[#allocation10 + $0x18] sm:$0xff]  ;;  %v3455_v8 = vld [vmem:[#allocation10 + $0x10] sm:$0xff] }
 0xbce   :  { %v2706_v17 = vpop.eup %2705 }
 0xbcf   :  { %v1259_v54 = vmul.f32 %v2706_v17, %v1256_v16  ;;  %vm1264_vm12 = vweird.f32 %v2706_v17 }
 0xbd0   :  { %vm1265_vm14 = vmor %vm1263_vm13, %vm1264_vm12 }
 0xbd1   :  { %v1260_v27 = vsub.f32 1.0, %v1259_v54 }
 0xbd3   :  { %v1261_v42 = vmul.f32 %v2706_v17, %v1260_v27 }
 0xbd5   :  { %v1262_v34 = vadd.f32 %v2706_v17, %v1261_v42 }
 0xbd7   :  { %v1266_v32 = vsel %vm1265_vm14, %v2706_v17, %v1262_v34  ;;  %v3460_v34 = vld [vmem:[#allocation10 + $0x8] sm:$0xff] }
 0xbd8   :  { %v1271_v39 = vsel %vm1268_vm15, %v1270_v63, %v1266_v32  ;;  %v3464_v63 = vld [vmem:[#allocation10] sm:$0xff] }
 0xbd9   :  { %v1292_v41 = vmul.f32 %v1290_v38, %v1271_v39  ;;  %v1361_v32 = vld [vmem:[#allocation5 + $0x18] sm:$0xff]  ;;  %v1358_v38 = vld [vmem:[#allocation2 + $0x30] sm:$0xff] }
 0xbdb   :  { %1294 = vrot.lane.b32.xlu1 %v1292_v41, %s3032_s23 }
 0xbe3   :  { %1451 = vrot.lane.b32.xlu1 %v1361_v32, %s3040_s13 }
 0xc31   :  { %v1193_v44 = vpop.permute.xlu0 %1192 }
 0xc32   :  { %2593 = vmatmul.msk.bf16.vlgmr.msrb.gmra.mxu3 %vm418_vm8, %v1193_v44 }
 0xc33   :  { %1514 = vmatpush.bf16.msrb.mxu3 %v3308_v62 }
 0xc37   :  { %1515 = vmatpush.bf16.msrb.mxu3 %v3323_v33 }
 0xc4d   :  { %v1295_v46 = vpop.permute.xlu1 %1294 }
 0xc4e   :  { %v1297_v47 = vadd.f32 %v1295_v46, %v1247_v35 }
 0xc50   :  { %2707 = vtanh.f32 %v1297_v47 }
 0xc51   :  { %2709 = vpow2.f32 %v2596_v51 }
 0xc56   :  { %v2708_v49 = vpop.eup %2707 }
 0xc57   :  { %1301 = vrot.lane.b32.xlu2 %v2708_v49, %s3038_s7  ;;  %v2710_v53 = vpop.eup %2709 }
 0xc58   :  { %v1257_v61 = vadd.f32 1.0, %v2710_v53 }
 0xc5a   :  { %2711 = vrcp.f32 %v1257_v61  ;;  %v1284_v37 = vand.u32 2147483648, %v1257_v61  ;;  %vm1278_vm3 = vweird.f32 %v1257_v61  ;;  %v1282_v4 = vand.u32 2147483647, %v1257_v61 }
 0xc5c   :  { %v1285_v55 = vor.u32 1.1754944e-38, %v1284_v37  ;;  %vm1283_vm5 = vcmp.eq.f32.partialorder %v1282_v4, 8.507059e+37 }
 0xc60   :  { %v2712_v1 = vpop.eup %2711 }
 0xc61   :  { %v1274_v3 = vmul.f32 %v2712_v1, %v1257_v61  ;;  %vm1279_vm2 = vweird.f32 %v2712_v1 }
 0xc62   :  { %vm1280_vm4 = vmor %vm1278_vm3, %vm1279_vm2 }
 0xc63   :  { %v1275_v6 = vsub.f32 1.0, %v1274_v3 }
 0xc65   :  { %v1276_v7 = vmul.f32 %v2712_v1, %v1275_v6 }
 0xc67   :  { %v1277_v59 = vadd.f32 %v2712_v1, %v1276_v7 }
 0xc69   :  { %v1281_v40 = vsel %vm1280_vm4, %v2712_v1, %v1277_v59 }
 0xc6a   :  { %v1286_v0 = vsel %vm1283_vm5, %v1285_v55, %v1281_v40 }
 0xc6b   :  { %v1299_v9 = vsub.f32 1.0, %v1286_v0  ;;  %v1305_v11 = vmul.f32 %v1286_v0, %v3387_v36 }
 0xcb1   :  { %v1302_v48 = vpop.permute.xlu2 %1301 }
 0xcb2   :  { %v1304_v10 = vmul.f32 %v1302_v48, %v1299_v9 }
 0xcb4   :  { %v3443_v12 = vadd.f32 %v1305_v11, %v1304_v10 }
 0xcb5   :  { %v1206_v16 = vpop.f32.mrf.mxu3 }
 0xcb6   :  { %v1307_v17 = vpack.c.bf16 %v3443_v12, %v3443_v12  ;;  %v1207_v54 = vadd.f32 %v1206_v16, %v3314_v13 }
 0xcb8   :  { %v1210_v27 = vmax.f32 %v1207_v54, 0.0  ;;  %2598 = vmatmul.msk.bf16.vlgmr.msra.gmra.mxu1 %vm418_vm8, %v1307_v17  ;;  %2599 = vmatmul.msk.bf16.vlgmr.msra.gmra.mxu2 %vm418_vm8, %v1307_v17 }
 0xcb9   :  { %1696 = vmatpush.bf16.msra.mxu2 %v3450_v28  ;;  %1677 = vmatpush.bf16.msra.mxu1 %v3257_v19 }
 0xcba   :  { %v1211_v36 = vpack.c.bf16 %v1210_v27, %v1210_v27 }
 0xcbc   :  { %2594 = vmatmul.msk.bf16.vlgmr.msra.gmra.mxu0 %vm418_vm8, %v1211_v36 }
 0xcbd   :  { %v1208_v42 = vpop.f32.mrf.mxu3  ;;  %1697 = vmatpush.bf16.msra.mxu2 %v3455_v8  ;;  %1664 = vmatpush.bf16.msra.mxu0 %v3126_v14 }
 0xcbe   :  { %1678 = vmatpush.bf16.msra.mxu1 %v3272_v60  ;;  %v1452_v42 = vpop.permute.xlu1 %1451 }
 0xcc1   :  { %1698 = vmatpush.bf16.msra.mxu2 %v3460_v34  ;;  %1665 = vmatpush.bf16.msra.mxu0 %v3137_v24 }
 0xcc5   :  { %1699 = vmatpush.bf16.msra.mxu2 %v3464_v63 }
 0xd35   :  { %v1374_v39 = vpop.f32.mrf.mxu1 }
 0xd36   :  { %v1393_v41 = vadd.f32 %v1374_v39, %v1358_v38 }
 0xd38   :  { %v1394_v44 = vmax.f32 %v1393_v41, 0.0 }
 0xd39   :  { %v3468_v45 = vpop.f32.mrf.mxu0 }
 0xd3a   :  { %v1395_v35 = vpack.c.bf16 %v1394_v44, %v1394_v44 }
 0xd3b   :  { %v1387_v46 = vpop.f32.mrf.mxu2 }
 0xd3c   :  { %v3471_v47 = vadd.f32 %v1387_v46, %v3279_v2  ;;  %2600 = vmatmul.msk.bf16.vlgmr.msra.gmra.mxu3 %vm380_vm1, %v1395_v35 }
 0xd3d   :  { %1714 = vmatpush.bf16.msra.mxu3 %v3196_v5  ;;  %v1376_v49 = vpop.f32.mrf.mxu1 }
 0xd3e   :  { %1582 = vrot.lane.b32.xlu1 %v3471_v47, %s3032_s23 }
 0xd41   :  { %1715 = vmatpush.bf16.msra.mxu3 %v3201_v20  ;;  %v1226_v50 = vpop.f32.mrf.mxu0 }
 0xd43   :  { %v1389_v51 = vpop.f32.mrf.mxu2 }
 0xd45   :  { %1716 = vmatpush.bf16.msra.mxu3 %v3226_v29 }
 0xd49   :  { %1717 = vmatpush.bf16.msra.mxu3 %v3229_v30 }
 0xdbf   :  { %v1408_v53 = vpop.f32.mrf.mxu3 }
 0xdc0   :  { %v1409_v61 = vadd.f32 %v1408_v53, %v3238_v56 }
 0xdc2   :  { %v1412_v1 = vmax.f32 %v1409_v61, 0.0  ;;  %v1391_v61 = vadd.f32 %v1374_v39, %v3279_v2 }
 0xdc4   :  { %v1413_v3 = vpack.c.bf16 %v1412_v1, %v1412_v1 }
 0xdc6   :  { %2601 = vmatmul.msk.bf16.vlgmr.msrb.gmra.mxu0 %vm380_vm1, %v1413_v3 }
 0xdc7   :  { %v1410_v6 = vpop.f32.mrf.mxu3  ;;  %1764 = vmatpush.bf16.msrb.mxu0 %v3255_v26 }
 0xe43   :  { %v1426_v7 = vpop.f32.mrf.mxu0 }
 0xe44   :  { %v3484_v59 = vadd.f32 %v1426_v7, %v3247_v22 }
 0xe46   :  { %v1433_v37 = vand.u32 2147483647, %v3484_v59  ;;  %v1430_v26 = vmax.f32 %v3484_v59, 0.0  ;;  %vm1431_vm7 = vcmp.ne.f32.partialorder %v3484_v59, %v3484_v59 }
 0xe48   :  { %v1434_v4 = vsub.f32 0.0, %v1433_v37 }
 0xe4a   :  { %v1435_v40 = vmul.f32 1.442695, %v1434_v4 }
 0xe4b   :  { %v1428_v55 = vpop.f32.mrf.mxu0 }
 0xe4c   :  { %2713 = vpow2.f32 %v1435_v40 }
 0xe52   :  { %v2714_v0 = vpop.eup %2713 }
 0xe53   :  { %v1437_v9 = vadd.f32 1.0, %v2714_v0  ;;  %v1440_v48 = vmul.f32 -0.5, %v2714_v0  ;;  %v1443_v11 = vand.u32 2147483647, %v2714_v0 }
 0xe55   :  { %2715 = vlog2.f32 %v1437_v9  ;;  %v1441_v10 = vadd.f32 1.0, %v1440_v48  ;;  %vm1444_vm6 = vcmp.lt.f32.partialorder %v1443_v11, 0.0004427343  ;;  %v1583_v11 = vpop.permute.xlu1 %1582 }
 0xe57   :  { %v1442_v54 = vmul.f32 %v2714_v0, %v1441_v10 }
 0xe5b   :  { %v2716_v16 = vpop.eup %2715 }
 0xe5c   :  { %v1439_v17 = vmul.f32 0.6931472, %v2716_v16 }
 0xe5e   :  { %v1445_v27 = vsel %vm1444_vm6, %v1442_v54, %v1439_v17 }
 0xe5f   :  { %v1446_v36 = vadd.f32 %v1445_v27, %v1430_v26  ;;  %v1359_v26 = vld [vmem:[#allocation2 + $0x38] sm:$0xff] }
 0xe61   :  { %v3491_v32 = vsel %vm1431_vm7, %v3484_v59, %v1446_v36 }
 0xe62   :  { %v1454_v44 = vmul.f32 %v1452_v42, %v3491_v32 }
 0xe64   :  { %1456 = vrot.lane.b32.xlu2 %v1454_v44, %s3038_s7 }
 0xebe   :  { %v1457_v35 = vpop.permute.xlu2 %1456 }
 0xebf   :  { %v1459_v46 = vadd.f32 %v1457_v35, %v3484_v59 }
 0xec1   :  { %v1460_v49 = vpack.c.bf16 %v1459_v46, %v1459_v46 }
 0xec3   :  { %2602 = vmatmul.msk.bf16.vlgmr.msrb.gmra.mxu1 %vm210_vm0, %v1460_v49 }
 0xec4   :  { %1789 = vmatpush.bf16.msrb.mxu1 %v3288_v15 }
 0xec8   :  { %1790 = vmatpush.bf16.msrb.mxu1 %v3291_v21 }
 0xf40   :  { %v1473_v50 = vpop.f32.mrf.mxu1 }
 0xf41   :  { %1478 = vrot.lane.b32.xlu0 %v1473_v50, %s3032_s23 }
 0xf48   :  { %v1475_v51 = vpop.f32.mrf.mxu1 }
 0xfb3   :  { %v1479_v53 = vpop.permute.xlu0 %1478 }
 0xfb4   :  { %v1539_v1 = vadd.f32 %v1479_v53, %v1358_v38  ;;  %v1481_v3 = vadd.f32 %v1479_v53, %v1393_v41  ;;  %v1540_v27 = vadd.f32 %v1479_v53, %v1359_v26 }
 0xfb6   :  { %v1541_v6 = vadd.f32 %v1539_v1, %v1391_v61  ;;  %v1482_v7 = vmax.f32 %v1481_v3, 0.0  ;;  %v1542_v35 = vadd.f32 %v1540_v27, %v3471_v47  ;;  %v1654_v1 = vld [vmem:[#allocation5 + $0x20] sm:$0xff] }
 0xfb8   :  { %v2605_v37 = vmul.f32 -1.442695, %v1541_v6  ;;  %v1483_v4 = vpack.c.bf16 %v1482_v7, %v1482_v7  ;;  %v2606_v46 = vmul.f32 -1.442695, %v1542_v35 }
 0xfba   :  { %2717 = vpow2.f32 %v2605_v37  ;;  %1485 = vrot.lane.b32.xlu1 %v1483_v4, %s3032_s23 }
 0xfc0   :  { %v2718_v40 = vpop.eup %2717 }
 0xfc1   :  { %v1549_v15 = vadd.f32 1.0, %v2718_v40 }
 0xfc3   :  { %2719 = vrcp.f32 %v1549_v15  ;;  %v1562_v9 = vand.u32 2147483648, %v1549_v15  ;;  %v1560_v10 = vand.u32 2147483647, %v1549_v15  ;;  %vm1556_vm10 = vweird.f32 %v1549_v15 }
 0xfc5   :  { %v1563_v38 = vor.u32 1.1754944e-38, %v1562_v9  ;;  %vm1561_vm12 = vcmp.eq.f32.partialorder %v1560_v10, 8.507059e+37 }
 0xfc9   :  { %v2720_v21 = vpop.eup %2719 }
 0xfca   :  { %v1552_v55 = vmul.f32 %v2720_v21, %v1549_v15  ;;  %vm1557_vm9 = vweird.f32 %v2720_v21 }
 0xfcb   :  { %vm1558_vm11 = vmor %vm1556_vm10, %vm1557_vm9 }
 0xfcc   :  { %v1553_v0 = vsub.f32 1.0, %v1552_v55 }
 0xfce   :  { %v1554_v48 = vmul.f32 %v2720_v21, %v1553_v0 }
 0xfd0   :  { %v1555_v39 = vadd.f32 %v2720_v21, %v1554_v48 }
 0xfd2   :  { %v1559_v41 = vsel %vm1558_vm11, %v2720_v21, %v1555_v39 }
 0xfd3   :  { %v1564_v16 = vsel %vm1561_vm12, %v1563_v38, %v1559_v41 }
 0xfd4   :  { %v1585_v17 = vmul.f32 %v1583_v11, %v1564_v16  ;;  %v3526_v11 = vld [vmem:[#allocation2 + $0x40] sm:$0xff] }
 0xfd6   :  { %1587 = vrot.lane.b32.xlu2 %v1585_v17, %s3032_s23 }
 0xfde   :  { %1744 = vrot.lane.b32.xlu2 %v1654_v1, %s3040_s13 }
0x102c   :  { %v1486_v54 = vpop.permute.xlu1 %1485 }
0x102d   :  { %2603 = vmatmul.msk.bf16.vlgmr.msrb.gmra.mxu2 %vm418_vm8, %v1486_v54 }
0x102e   :  { %1807 = vmatpush.bf16.msrb.mxu2 %v3308_v62 }
0x1030   :  { %v1588_v36 = vpop.permute.xlu2 %1587 }
0x1031   :  { %v1590_v42 = vadd.f32 %v1588_v36, %v1540_v27 }
0x1032   :  { %1808 = vmatpush.bf16.msrb.mxu2 %v3323_v33 }
0x1033   :  { %2721 = vtanh.f32 %v1590_v42 }
0x1034   :  { %2723 = vpow2.f32 %v2606_v46 }
0x1039   :  { %v2722_v44 = vpop.eup %2721 }
0x103a   :  { %1594 = vrot.lane.b32.xlu0 %v2722_v44, %s3038_s7  ;;  %v2724_v49 = vpop.eup %2723 }
0x103b   :  { %v1550_v50 = vadd.f32 1.0, %v2724_v49 }
0x103d   :  { %2725 = vrcp.f32 %v1550_v50  ;;  %v1577_v7 = vand.u32 2147483648, %v1550_v50  ;;  %vm1571_vm14 = vweird.f32 %v1550_v50  ;;  %v1575_v37 = vand.u32 2147483647, %v1550_v50 }
0x103f   :  { %v1578_v47 = vor.u32 1.1754944e-38, %v1577_v7  ;;  %vm1576_vm2 = vcmp.eq.f32.partialorder %v1575_v37, 8.507059e+37 }
0x1043   :  { %v2726_v51 = vpop.eup %2725 }
0x1044   :  { %v1567_v61 = vmul.f32 %v2726_v51, %v1550_v50  ;;  %vm1572_vm13 = vweird.f32 %v2726_v51 }
0x1045   :  { %vm1573_vm15 = vmor %vm1571_vm14, %vm1572_vm13 }
0x1046   :  { %v1568_v3 = vsub.f32 1.0, %v1567_v61  ;;  %v3546_v61 = vld [vmem:[%s3927_s5] sm:$0xff]  ;;  %s3041_s5 = smov 112  }
0x1048   :  { %v1569_v53 = vmul.f32 %v2726_v51, %v1568_v3 }
0x104a   :  { %v1570_v6 = vadd.f32 %v2726_v51, %v1569_v53 }
0x104c   :  { %v1574_v4 = vsel %vm1573_vm15, %v2726_v51, %v1570_v6 }
0x104d   :  { %v1579_v40 = vsel %vm1576_vm2, %v1578_v47, %v1574_v4 }
0x104e   :  { %v1592_v15 = vsub.f32 1.0, %v1579_v40  ;;  %v1598_v55 = vmul.f32 %v1579_v40, %v3443_v12 }
0x10ac   :  { %v1595_v21 = vpop.permute.xlu0 %1594 }
0x10ad   :  { %v1597_v0 = vmul.f32 %v1595_v21, %v1592_v15 }
0x10af   :  { %v3510_v9 = vadd.f32 %v1598_v55, %v1597_v0 }
0x10b0   :  { %v1499_v48 = vpop.f32.mrf.mxu2 }
0x10b1   :  { %v1600_v10 = vpack.c.bf16 %v3510_v9, %v3510_v9  ;;  %v1500_v39 = vadd.f32 %v1499_v48, %v3314_v13 }
0x10b3   :  { %v1503_v38 = vmax.f32 %v1500_v39, 0.0  ;;  %2608 = vmatmul.msk.bf16.vlgmr.msra.gmra.mxu0 %vm418_vm8, %v1600_v10  ;;  %2609 = vmatmul.msk.bf16.vlgmr.msra.gmra.mxu1 %vm418_vm8, %v1600_v10 }
0x10b4   :  { %1989 = vmatpush.bf16.msra.mxu1 %v3450_v28  ;;  %1970 = vmatpush.bf16.msra.mxu0 %v3257_v19 }
0x10b5   :  { %v1504_v41 = vpack.c.bf16 %v1503_v38, %v1503_v38 }
0x10b7   :  { %2604 = vmatmul.msk.bf16.vlgmr.msrb.gmra.mxu3 %vm418_vm8, %v1504_v41  ;;  %v1745_v41 = vpop.permute.xlu2 %1744 }
0x10b8   :  { %v1501_v12 = vpop.f32.mrf.mxu2  ;;  %1990 = vmatpush.bf16.msra.mxu1 %v3455_v8  ;;  %1957 = vmatpush.bf16.msrb.mxu3 %v3126_v14 }
0x10b9   :  { %1971 = vmatpush.bf16.msra.mxu0 %v3272_v60 }
0x10bc   :  { %1991 = vmatpush.bf16.msra.mxu1 %v3460_v34  ;;  %1958 = vmatpush.bf16.msrb.mxu3 %v3137_v24 }
0x10c0   :  { %1992 = vmatpush.bf16.msra.mxu1 %v3464_v63 }
0x1130   :  { %v1667_v16 = vpop.f32.mrf.mxu0  ;;  %v1680_v19 = vpop.f32.mrf.mxu1 }
0x1131   :  { %v1686_v17 = vadd.f32 %v1667_v16, %v3526_v11  ;;  %v3530_v54 = vadd.f32 %v1680_v19, %v3279_v2 }
0x1133   :  { %v1687_v26 = vmax.f32 %v1686_v17, 0.0  ;;  %1875 = vrot.lane.b32.xlu2 %v3530_v54, %s3032_s23 }
0x1135   :  { %v1688_v60 = vpack.c.bf16 %v1687_v26, %v1687_v26 }
0x1137   :  { %2610 = vmatmul.msk.bf16.vlgmr.msra.gmra.mxu2 %vm380_vm1, %v1688_v60 }
0x1138   :  { %2007 = vmatpush.bf16.msra.mxu2 %v3196_v5  ;;  %v1669_v27 = vpop.f32.mrf.mxu0  ;;  %v1682_v36 = vpop.f32.mrf.mxu1 }
0x1139   :  { %v3563_v36 = vld [vmem:[#allocation11 + $0x8] sm:$0xff] }
0x113a   :  { %v3536_v42 = vpop.f32.mrf.mxu3 }
0x113c   :  { %2008 = vmatpush.bf16.msra.mxu2 %v3201_v20 }
0x1140   :  { %2009 = vmatpush.bf16.msra.mxu2 %v3226_v29 }
0x1142   :  { %v1519_v44 = vpop.f32.mrf.mxu3 }
0x1143   :  { %v3566_v44 = vld [vmem:[#allocation11] sm:$0xff] }
0x1144   :  { %2010 = vmatpush.bf16.msra.mxu2 %v3229_v30 }
0x11ba   :  { %v1701_v35 = vpop.f32.mrf.mxu2 }
0x11bb   :  { %v1702_v46 = vadd.f32 %v1701_v35, %v3238_v56 }
0x11bd   :  { %v1705_v49 = vmax.f32 %v1702_v46, 0.0 }
0x11bf   :  { %v1706_v50 = vpack.c.bf16 %v1705_v49, %v1705_v49 }
0x11c1   :  { %2611 = vmatmul.msk.bf16.vlgmr.msra.gmra.mxu3 %vm380_vm1, %v1706_v50  ;;  %v1684_v50 = vadd.f32 %v1667_v16, %v3279_v2 }
0x11c2   :  { %v1703_v51 = vpop.f32.mrf.mxu2  ;;  %2057 = vmatpush.bf16.msra.mxu3 %v3546_v61 }
0x1244   :  { %v1719_v1 = vpop.f32.mrf.mxu3 }
0x1245   :  { %v3550_v3 = vadd.f32 %v1719_v1, %v3247_v22 }
0x1247   :  { %v1726_v53 = vand.u32 2147483647, %v3550_v3  ;;  %v1723_v10 = vmax.f32 %v3550_v3, 0.0  ;;  %vm1724_vm4 = vcmp.ne.f32.partialorder %v3550_v3, %v3550_v3 }
0x1249   :  { %v1727_v6 = vsub.f32 0.0, %v1726_v53 }
0x124b   :  { %v1728_v7 = vmul.f32 1.442695, %v1727_v6 }
0x124c   :  { %v1721_v37 = vpop.f32.mrf.mxu3 }
0x124d   :  { %2727 = vpow2.f32 %v1728_v7 }
0x1253   :  { %v2728_v4 = vpop.eup %2727 }
0x1254   :  { %v1730_v47 = vadd.f32 1.0, %v2728_v4  ;;  %v1733_v40 = vmul.f32 -0.5, %v2728_v4  ;;  %v1736_v21 = vand.u32 2147483647, %v2728_v4 }
0x1256   :  { %2729 = vlog2.f32 %v1730_v47  ;;  %v1734_v15 = vadd.f32 1.0, %v1733_v40  ;;  %vm1737_vm3 = vcmp.lt.f32.partialorder %v1736_v21, 0.0004427343 }
0x1258   :  { %v1735_v48 = vmul.f32 %v2728_v4, %v1734_v15 }
0x125c   :  { %v2730_v55 = vpop.eup %2729 }
0x125d   :  { %v1732_v0 = vmul.f32 0.6931472, %v2730_v55 }
0x125f   :  { %v1738_v39 = vsel %vm1737_vm3, %v1735_v48, %v1732_v0 }
0x1260   :  { %v1739_v38 = vadd.f32 %v1738_v39, %v1723_v10  ;;  %v1876_v10 = vpop.permute.xlu2 %1875 }
0x1262   :  { %v3557_v12 = vsel %vm1724_vm4, %v3550_v3, %v1739_v38 }
0x1263   :  { %v1747_v19 = vmul.f32 %v1745_v41, %v3557_v12 }
0x1265   :  { %1749 = vrot.lane.b32.xlu0 %v1747_v19, %s3038_s7  ;;  %v1652_v19 = vld [vmem:[#allocation2 + $0x48] sm:$0xff] }
0x12d7   :  { %v1750_v26 = vpop.permute.xlu0 %1749 }
0x12d8   :  { %v1752_v60 = vadd.f32 %v1750_v26, %v3550_v3 }
0x12da   :  { %v1753_v27 = vpack.c.bf16 %v1752_v60, %v1752_v60 }
0x12dc   :  { %2612 = vmatmul.msk.bf16.vlgmr.msrb.gmra.mxu0 %vm210_vm0, %v1753_v27 }
0x12dd   :  { %2082 = vmatpush.bf16.msrb.mxu0 %v3563_v36 }
0x12e1   :  { %2083 = vmatpush.bf16.msrb.mxu0 %v3566_v44 }
0x1359   :  { %v1766_v35 = vpop.f32.mrf.mxu0 }
0x135a   :  { %1771 = vrot.lane.b32.xlu1 %v1766_v35, %s3032_s23 }
0x1361   :  { %v1768_v46 = vpop.f32.mrf.mxu0 }
0x13cc   :  { %v1772_v49 = vpop.permute.xlu1 %1771 }
0x13cd   :  { %v1832_v51 = vadd.f32 %v1772_v49, %v3526_v11  ;;  %v1774_v1 = vadd.f32 %v1772_v49, %v1686_v17  ;;  %v1833_v26 = vadd.f32 %v1772_v49, %v1652_v19 }
0x13cf   :  { %v1834_v53 = vadd.f32 %v1832_v51, %v1684_v50  ;;  %v1775_v6 = vmax.f32 %v1774_v1, 0.0  ;;  %v1835_v46 = vadd.f32 %v1833_v26, %v3530_v54 }
0x13d1   :  { %v2615_v7 = vmul.f32 -1.442695, %v1834_v53  ;;  %v1776_v37 = vpack.c.bf16 %v1775_v6, %v1775_v6  ;;  %v2616_v51 = vmul.f32 -1.442695, %v1835_v46 }
0x13d3   :  { %2731 = vpow2.f32 %v2615_v7  ;;  %1778 = vrot.lane.b32.xlu2 %v1776_v37, %s3032_s23 }
0x13d9   :  { %v2732_v4 = vpop.eup %2731 }
0x13da   :  { %v1842_v47 = vadd.f32 1.0, %v2732_v4 }
0x13dc   :  { %2733 = vrcp.f32 %v1842_v47  ;;  %v1855_v55 = vand.u32 2147483648, %v1842_v47  ;;  %v1853_v16 = vand.u32 2147483647, %v1842_v47  ;;  %vm1849_vm6 = vweird.f32 %v1842_v47 }
0x13de   :  { %v1856_v11 = vor.u32 1.1754944e-38, %v1855_v55  ;;  %vm1854_vm9 = vcmp.eq.f32.partialorder %v1853_v16, 8.507059e+37 }
0x13e2   :  { %v2734_v40 = vpop.eup %2733 }
0x13e3   :  { %v1845_v15 = vmul.f32 %v2734_v40, %v1842_v47  ;;  %vm1850_vm5 = vweird.f32 %v2734_v40 }
0x13e4   :  { %vm1851_vm7 = vmor %vm1849_vm6, %vm1850_vm5 }
0x13e5   :  { %v1846_v21 = vsub.f32 1.0, %v1845_v15 }
0x13e7   :  { %v1847_v0 = vmul.f32 %v2734_v40, %v1846_v21 }
0x13e9   :  { %v1848_v48 = vadd.f32 %v2734_v40, %v1847_v0 }
0x13eb   :  { %v1852_v17 = vsel %vm1851_vm7, %v2734_v40, %v1848_v48 }
0x13ec   :  { %v1857_v39 = vsel %vm1854_vm9, %v1856_v11, %v1852_v17 }
0x13ed   :  { %v1878_v38 = vmul.f32 %v1876_v10, %v1857_v39 }
0x13ef   :  { %1880 = vrot.lane.b32.xlu0 %v1878_v38, %s3032_s23 }
0x142d   :  { %v1779_v41 = vpop.permute.xlu2 %1778 }
0x142e   :  { %2613 = vmatmul.msk.bf16.vlgmr.msrb.gmra.mxu1 %vm418_vm8, %v1779_v41 }
0x142f   :  { %2100 = vmatpush.bf16.msrb.mxu1 %v3308_v62 }
0x1433   :  { %2101 = vmatpush.bf16.msrb.mxu1 %v3323_v33 }
0x1461   :  { %v1881_v60 = vpop.permute.xlu0 %1880 }
0x1462   :  { %v1883_v27 = vadd.f32 %v1881_v60, %v1833_v26 }
0x1464   :  { %2735 = vtanh.f32 %v1883_v27 }
0x1465   :  { %2737 = vpow2.f32 %v2616_v51 }
0x146a   :  { %v2736_v35 = vpop.eup %2735 }
0x146b   :  { %1887 = vrot.lane.b32.xlu1 %v2736_v35, %s3038_s7  ;;  %v2738_v49 = vpop.eup %2737 }
0x146c   :  { %v1843_v37 = vadd.f32 1.0, %v2738_v49 }
0x146e   :  { %2739 = vrcp.f32 %v1843_v37  ;;  %v1870_v21 = vand.u32 2147483648, %v1843_v37  ;;  %vm1864_vm11 = vweird.f32 %v1843_v37  ;;  %v1868_v55 = vand.u32 2147483647, %v1843_v37 }
0x1470   :  { %v1871_v16 = vor.u32 1.1754944e-38, %v1870_v21  ;;  %vm1869_vm13 = vcmp.eq.f32.partialorder %v1868_v55, 8.507059e+37 }
0x1474   :  { %v2740_v4 = vpop.eup %2739 }
0x1475   :  { %v1860_v47 = vmul.f32 %v2740_v4, %v1843_v37  ;;  %vm1865_vm10 = vweird.f32 %v2740_v4 }
0x1476   :  { %vm1866_vm12 = vmor %vm1864_vm11, %vm1865_vm10 }
0x1477   :  { %v1861_v54 = vsub.f32 1.0, %v1860_v47 }
0x1479   :  { %v1862_v40 = vmul.f32 %v2740_v4, %v1861_v54 }
0x147b   :  { %v1863_v15 = vadd.f32 %v2740_v4, %v1862_v40 }
0x147d   :  { %v1867_v0 = vsel %vm1866_vm12, %v2740_v4, %v1863_v15 }
0x147e   :  { %v1872_v48 = vsel %vm1869_vm13, %v1871_v16, %v1867_v0 }
0x14ab   :  { %v1792_v50 = vpop.f32.mrf.mxu1 }
0x14ac   :  { %v1793_v1 = vadd.f32 %v1792_v50, %v3314_v13 }
0x14ae   :  { %v1796_v53 = vmax.f32 %v1793_v1, 0.0 }
0x14b0   :  { %v1797_v6 = vpack.c.bf16 %v1796_v53, %v1796_v53 }
0x14b2   :  { %2614 = vmatmul.msk.bf16.vlgmr.msrb.gmra.mxu2 %vm418_vm8, %v1797_v6 }
0x14b3   :  { %v1794_v7 = vpop.f32.mrf.mxu1  ;;  %2249 = vmatpush.bf16.msrb.mxu2 %v3126_v14  ;;  %v1885_v14 = vsub.f32 1.0, %v1872_v48 }
0x14b7   :  { %2250 = vmatpush.bf16.msrb.mxu2 %v3137_v24  ;;  %v1891_v24 = vmul.f32 %v1872_v48, %v3510_v9  ;;  %v1947_v9 = vld [vmem:[#allocation5 + $0x28] sm:$0xff] }
0x14b8   :  { %2037 = vrot.lane.b32.xlu0 %v1947_v9, %s3040_s13 }
0x14dd   :  { %v1888_v11 = vpop.permute.xlu1 %1887 }
0x14de   :  { %v1890_v17 = vmul.f32 %v1888_v11, %v1885_v14 }
0x14e0   :  { %v3584_v10 = vadd.f32 %v1891_v24, %v1890_v17 }
0x14e2   :  { %v1893_v39 = vpack.c.bf16 %v3584_v10, %v3584_v10 }
0x14e4   :  { %2618 = vmatmul.msk.bf16.vlgmr.msrb.gmra.mxu3 %vm418_vm8, %v1893_v39  ;;  %2619 = vmatmul.msk.bf16.vlgmr.msra.gmra.mxu0 %vm418_vm8, %v1893_v39 }
0x14e5   :  { %2284 = vmatpush.bf16.msra.mxu0 %v3196_v5  ;;  %2266 = vmatpush.bf16.msrb.mxu3 %v3450_v28 }
0x14e9   :  { %2285 = vmatpush.bf16.msra.mxu0 %v3201_v20  ;;  %2267 = vmatpush.bf16.msrb.mxu3 %v3455_v8  ;;  %v1944_v20 = vld [vmem:[#allocation2 + $0x50] sm:$0xff] }
0x14ed   :  { %2286 = vmatpush.bf16.msra.mxu0 %v3226_v29  ;;  %2268 = vmatpush.bf16.msrb.mxu3 %v3460_v34 }
0x14f1   :  { %2287 = vmatpush.bf16.msra.mxu0 %v3229_v30  ;;  %2269 = vmatpush.bf16.msrb.mxu3 %v3464_v63 }
0x152a   :  { %v2038_v55 = vpop.permute.xlu0 %2037 }
0x1535   :  { %v3599_v38 = vpop.f32.mrf.mxu2 }
0x153d   :  { %v1812_v5 = vpop.f32.mrf.mxu2 }
0x1561   :  { %v1973_v41 = vpop.f32.mrf.mxu0 }
0x1562   :  { %v3602_v28 = vadd.f32 %v1973_v41, %v3279_v2 }
0x1564   :  { %2168 = vrot.lane.b32.xlu0 %v3602_v28, %s3032_s23 }
0x1567   :  { %v1960_v29 = vpop.f32.mrf.mxu3 }
0x1568   :  { %v1979_v8 = vadd.f32 %v1960_v29, %v1944_v20  ;;  %v1977_v9 = vadd.f32 %v1960_v29, %v3279_v2 }
0x1569   :  { %v1975_v34 = vpop.f32.mrf.mxu0 }
0x156a   :  { %v1980_v30 = vmax.f32 %v1979_v8, 0.0 }
0x156c   :  { %v1981_v19 = vpack.c.bf16 %v1980_v30, %v1980_v30 }
0x156e   :  { %2620 = vmatmul.msk.bf16.vlgmr.msra.gmra.mxu1 %vm380_vm1, %v1981_v19 }
0x156f   :  { %v1962_v63 = vpop.f32.mrf.mxu3  ;;  %2334 = vmatpush.bf16.msra.mxu1 %v3546_v61 }
0x15eb   :  { %v1994_v26 = vpop.f32.mrf.mxu1 }
0x15ec   :  { %v1995_v60 = vadd.f32 %v1994_v26, %v3238_v56 }
0x15ee   :  { %v1998_v27 = vmax.f32 %v1995_v60, 0.0 }
0x15f0   :  { %v1999_v35 = vpack.c.bf16 %v1998_v27, %v1998_v27 }
0x15f2   :  { %2621 = vmatmul.msk.bf16.vlgmr.msra.gmra.mxu2 %vm380_vm1, %v1999_v35 }
0x15f3   :  { %v1996_v46 = vpop.f32.mrf.mxu1  ;;  %2359 = vmatpush.bf16.msra.mxu2 %v3563_v36 }
0x15f7   :  { %2360 = vmatpush.bf16.msra.mxu2 %v3566_v44 }
0x1675   :  { %v2012_v50 = vpop.f32.mrf.mxu2 }
0x1676   :  { %v3613_v51 = vadd.f32 %v2012_v50, %v3247_v22 }
0x1678   :  { %v2019_v1 = vand.u32 2147483647, %v3613_v51  ;;  %v2016_v44 = vmax.f32 %v3613_v51, 0.0  ;;  %vm2017_vm15 = vcmp.ne.f32.partialorder %v3613_v51, %v3613_v51 }
0x167a   :  { %v2020_v53 = vsub.f32 0.0, %v2019_v1 }
0x167c   :  { %v2021_v61 = vmul.f32 1.442695, %v2020_v53 }
0x167d   :  { %v2014_v6 = vpop.f32.mrf.mxu2 }
0x167e   :  { %2741 = vpow2.f32 %v2021_v61  ;;  %v1945_v6 = vld [vmem:[#allocation2 + $0x58] sm:$0xff] }
0x1684   :  { %v2742_v7 = vpop.eup %2741 }
0x1685   :  { %v2023_v49 = vadd.f32 1.0, %v2742_v7  ;;  %v2026_v37 = vmul.f32 -0.5, %v2742_v7  ;;  %v2029_v47 = vand.u32 2147483647, %v2742_v7 }
0x1687   :  { %2743 = vlog2.f32 %v2023_v49  ;;  %v2027_v4 = vadd.f32 1.0, %v2026_v37  ;;  %vm2030_vm14 = vcmp.lt.f32.partialorder %v2029_v47, 0.0004427343 }
0x1689   :  { %v2028_v40 = vmul.f32 %v2742_v7, %v2027_v4 }
0x168d   :  { %v2744_v54 = vpop.eup %2743 }
0x168e   :  { %v2025_v36 = vmul.f32 0.6931472, %v2744_v54 }
0x1690   :  { %v2031_v15 = vsel %vm2030_vm14, %v2028_v40, %v2025_v36 }
0x1691   :  { %v2032_v21 = vadd.f32 %v2031_v15, %v2016_v44 }
0x1693   :  { %v3620_v0 = vsel %vm2017_vm15, %v3613_v51, %v2032_v21 }
0x1694   :  { %v2040_v16 = vmul.f32 %v2038_v55, %v3620_v0 }
0x1696   :  { %2042 = vrot.lane.b32.xlu1 %v2040_v16, %s3038_s7 }
0x1708   :  { %v2043_v48 = vpop.permute.xlu1 %2042 }
0x1709   :  { %v2045_v14 = vadd.f32 %v2043_v48, %v3613_v51 }
0x170b   :  { %v2046_v11 = vpack.c.bf16 %v2045_v14, %v2045_v14 }
0x170d   :  { %2622 = vmatmul.msk.bf16.vlgmr.msra.gmra.mxu3 %vm210_vm0, %v2046_v11 }
0x170e   :  { %2377 = vmatpush.bf16.msra.mxu3 %v3308_v62 }
0x1712   :  { %2378 = vmatpush.bf16.msra.mxu3 %v3323_v33 }
0x1790   :  { %v2059_v17 = vpop.f32.mrf.mxu3 }
0x1791   :  { %2064 = vrot.lane.b32.xlu2 %v2059_v17, %s3032_s23 }
0x1798   :  { %v2061_v24 = vpop.f32.mrf.mxu3 }
0x17eb   :  { %v2065_v39 = vpop.permute.xlu2 %2064 }
0x17ec   :  { %v2125_v5 = vadd.f32 %v2065_v39, %v1944_v20  ;;  %v2067_v41 = vadd.f32 %v2065_v39, %v1979_v8  ;;  %v2169_v8 = vpop.permute.xlu0 %2168  ;;  %v2126_v7 = vadd.f32 %v2065_v39, %v1945_v6 }
0x17ee   :  { %v2127_v34 = vadd.f32 %v2125_v5, %v1977_v9  ;;  %v2068_v30 = vmax.f32 %v2067_v41, 0.0  ;;  %v2128_v47 = vadd.f32 %v2126_v7, %v3602_v28 }
0x17f0   :  { %v2625_v19 = vmul.f32 -1.442695, %v2127_v34  ;;  %v2069_v63 = vpack.c.bf16 %v2068_v30, %v2068_v30  ;;  %v2626_v54 = vmul.f32 -1.442695, %v2128_v47 }
0x17f2   :  { %2745 = vpow2.f32 %v2625_v19  ;;  %2071 = vrot.lane.b32.xlu0 %v2069_v63, %s3032_s23 }
0x17f8   :  { %v2746_v26 = vpop.eup %2745 }
0x17f9   :  { %v2135_v62 = vadd.f32 1.0, %v2746_v26 }
0x17fb   :  { %2747 = vrcp.f32 %v2135_v62  ;;  %v2148_v35 = vand.u32 2147483648, %v2135_v62  ;;  %v2146_v50 = vand.u32 2147483647, %v2135_v62  ;;  %vm2142_vm3 = vweird.f32 %v2135_v62 }
0x17fd   :  { %v2149_v20 = vor.u32 1.1754944e-38, %v2148_v35  ;;  %vm2147_vm5 = vcmp.eq.f32.partialorder %v2146_v50, 8.507059e+37 }
0x1801   :  { %v2748_v33 = vpop.eup %2747 }
0x1802   :  { %v2138_v60 = vmul.f32 %v2748_v33, %v2135_v62  ;;  %vm2143_vm2 = vweird.f32 %v2748_v33 }
0x1803   :  { %vm2144_vm4 = vmor %vm2142_vm3, %vm2143_vm2 }
0x1804   :  { %v2139_v27 = vsub.f32 1.0, %v2138_v60 }
0x1806   :  { %v2140_v46 = vmul.f32 %v2748_v33, %v2139_v27  ;;  %v2237_v27 = vld [vmem:[#allocation2 + $0x60] sm:$0xff] }
0x1808   :  { %v2141_v2 = vadd.f32 %v2748_v33, %v2140_v46 }
0x180a   :  { %v2145_v29 = vsel %vm2144_vm4, %v2748_v33, %v2141_v2 }
0x180b   :  { %v2150_v1 = vsel %vm2147_vm5, %v2149_v20, %v2145_v29  ;;  %v2239_v20 = vld [vmem:[#allocation5 + $0x30] sm:$0xff] }
0x180c   :  { %v2171_v53 = vmul.f32 %v2169_v8, %v2150_v1 }
0x180e   :  { %2173 = vrot.lane.b32.xlu1 %v2171_v53, %s3032_s23 }
0x1816   :  { %2314 = vrot.lane.b32.xlu1 %v2239_v20, %s3040_s13 }
0x1864   :  { %v2072_v61 = vpop.permute.xlu0 %2071 }
0x1865   :  { %2623 = vmatmul.msk.bf16.vlgmr.msrb.gmra.mxu0 %vm418_vm8, %v2072_v61 }
0x1880   :  { %v2174_v49 = vpop.permute.xlu1 %2173 }
0x1881   :  { %v2176_v37 = vadd.f32 %v2174_v49, %v2126_v7 }
0x1883   :  { %2749 = vtanh.f32 %v2176_v37 }
0x1884   :  { %2751 = vpow2.f32 %v2626_v54 }
0x1889   :  { %v2750_v4 = vpop.eup %2749 }
0x188a   :  { %2180 = vrot.lane.b32.xlu2 %v2750_v4, %s3038_s7  ;;  %v2752_v36 = vpop.eup %2751 }
0x188b   :  { %v2136_v40 = vadd.f32 1.0, %v2752_v36 }
0x188d   :  { %2753 = vrcp.f32 %v2136_v40  ;;  %v2163_v48 = vand.u32 2147483648, %v2136_v40  ;;  %vm2157_vm7 = vweird.f32 %v2136_v40  ;;  %v2161_v14 = vand.u32 2147483647, %v2136_v40 }
0x188f   :  { %v2164_v17 = vor.u32 1.1754944e-38, %v2163_v48  ;;  %vm2162_vm10 = vcmp.eq.f32.partialorder %v2161_v14, 8.507059e+37  ;;  %v2315_v14 = vpop.permute.xlu1 %2314 }
0x1893   :  { %v2754_v44 = vpop.eup %2753 }
0x1894   :  { %v2153_v15 = vmul.f32 %v2754_v44, %v2136_v40  ;;  %vm2158_vm6 = vweird.f32 %v2754_v44 }
0x1895   :  { %vm2159_vm9 = vmor %vm2157_vm7, %vm2158_vm6 }
0x1896   :  { %v2154_v21 = vsub.f32 1.0, %v2153_v15 }
0x1898   :  { %v2155_v55 = vmul.f32 %v2754_v44, %v2154_v21 }
0x189a   :  { %v2156_v16 = vadd.f32 %v2754_v44, %v2155_v55 }
0x189c   :  { %v2160_v11 = vsel %vm2159_vm9, %v2754_v44, %v2156_v16 }
0x189d   :  { %v2165_v24 = vsel %vm2162_vm10, %v2164_v17, %v2160_v11 }
0x189e   :  { %v2178_v9 = vsub.f32 1.0, %v2165_v24  ;;  %v2184_v34 = vmul.f32 %v2165_v24, %v3584_v10  ;;  %v3659_v24 = vmul.f32 %v3268_v52, %v3268_v52 }
0x18e2   :  { %v2085_v28 = vpop.f32.mrf.mxu0 }
0x18e3   :  { %v2086_v39 = vadd.f32 %v2085_v28, %v3314_v13  ;;  %v3665_v28 = vmul.f32 %v3424_v58, %v3424_v58 }
0x18e4   :  { %v2181_v5 = vpop.permute.xlu2 %2180 }
0x18e5   :  { %v2089_v41 = vmax.f32 %v2086_v39, 0.0  ;;  %v2183_v30 = vmul.f32 %v2181_v5, %v2178_v9 }
0x18e7   :  { %v2090_v19 = vpack.c.bf16 %v2089_v41, %v2089_v41  ;;  %v2185_v63 = vadd.f32 %v2184_v34, %v2183_v30 }
0x18e9   :  { %v2186_v26 = vpack.c.bf16 %v2185_v63, %v2185_v63  ;;  %2624 = vmatmul.msk.bf16.vlgmr.msrb.gmra.mxu1 %vm418_vm8, %v2090_v19 }
0x18ea   :  { %v2087_v62 = vpop.f32.mrf.mxu0 }
0x18eb   :  { %2628 = vmatmul.msk.bf16.vlgmr.msrb.gmra.mxu2 %vm418_vm8, %v2186_v26  ;;  %v3679_v62 = vmul.f32 %v3364_v31, %v3364_v31 }
0x1966   :  { %v3639_v33 = vpop.f32.mrf.mxu1 }
0x196e   :  { %v2105_v60 = vpop.f32.mrf.mxu1  ;;  %v2252_v35 = vpop.f32.mrf.mxu2 }
0x196f   :  { %v3641_v46 = vadd.f32 %v2252_v35, %v2237_v27 }
0x1971   :  { %v2257_v50 = vmax.f32 %v3641_v46, 0.0 }
0x1973   :  { %v2258_v2 = vpack.c.bf16 %v2257_v50, %v2257_v50 }
0x1975   :  { %2629 = vmatmul.msk.bf16.vlgmr.msrb.gmra.mxu3 %vm380_vm1, %v2258_v2  ;;  %v3687_v2 = vmul.f32 %v3557_v12, %v3557_v12 }
0x1976   :  { %v2254_v10 = vpop.f32.mrf.mxu2 }
0x19f8   :  { %v2271_v29 = vpop.f32.mrf.mxu3 }
0x19f9   :  { %v2272_v8 = vadd.f32 %v2271_v29, %v3238_v56 }
0x19fb   :  { %v2275_v1 = vmax.f32 %v2272_v8, 0.0 }
0x19fd   :  { %v2276_v53 = vpack.c.bf16 %v2275_v1, %v2275_v1 }
0x19ff   :  { %2630 = vmatmul.msk.bf16.vlgmr.msra.gmra.mxu0 %vm380_vm1, %v2276_v53 }
0x1a00   :  { %v2273_v61 = vpop.f32.mrf.mxu3 }
0x1a7c   :  { %v2289_v6 = vpop.f32.mrf.mxu0 }
0x1a7d   :  { %v2290_v7 = vadd.f32 %v2289_v6, %v3247_v22 }
0x1a7f   :  { %v2296_v49 = vand.u32 2147483647, %v2290_v7  ;;  %v2293_v16 = vmax.f32 %v2290_v7, 0.0  ;;  %vm2294_vm11 = vcmp.ne.f32.partialorder %v2290_v7, %v2290_v7 }
0x1a81   :  { %v2297_v37 = vsub.f32 0.0, %v2296_v49 }
0x1a83   :  { %v2298_v4 = vmul.f32 1.442695, %v2297_v37 }
0x1a84   :  { %v2291_v47 = vpop.f32.mrf.mxu0 }
0x1a85   :  { %2755 = vpow2.f32 %v2298_v4  ;;  %v3705_v4 = vmul.f32 %v3620_v0, %v3620_v0 }
0x1a8b   :  { %v2756_v54 = vpop.eup %2755 }
0x1a8c   :  { %v2300_v36 = vadd.f32 1.0, %v2756_v54  ;;  %v2303_v40 = vmul.f32 -0.5, %v2756_v54  ;;  %v2306_v15 = vand.u32 2147483647, %v2756_v54 }
0x1a8e   :  { %2757 = vlog2.f32 %v2300_v36  ;;  %v2304_v44 = vadd.f32 1.0, %v2303_v40  ;;  %vm2307_vm1 = vcmp.lt.f32.partialorder %v2306_v15, 0.0004427343 }
0x1a8f   :  { %2759 = vrcp.f32 %v3659_v24 }
0x1a90   :  { %v2305_v55 = vmul.f32 %v2756_v54, %v2304_v44  ;;  %2761 = vrcp.f32 %v3665_v28 }
0x1a91   :  { %2763 = vrcp.f32 %v3679_v62 }
0x1a92   :  { %2765 = vrcp.f32 %v3687_v2 }
0x1a93   :  { %2767 = vlog2.f32 %v3364_v31 }
0x1a94   :  { %v2758_v56 = vpop.eup %2757  ;;  %2769 = vrcp.f32 %v3705_v4 }
0x1a95   :  { %v2302_v21 = vmul.f32 0.6931472, %v2758_v56  ;;  %v2760_v39 = vpop.eup %2759  ;;  %2771 = vlog2.f32 %v3268_v52 }
0x1a96   :  { %v2762_v9 = vpop.eup %2761 }
0x1a97   :  { %v2308_v48 = vsel %vm2307_vm1, %v2305_v55, %v2302_v21  ;;  %v2764_v27 = vpop.eup %2763 }
0x1a98   :  { %v2309_v11 = vadd.f32 %v2308_v48, %v2293_v16  ;;  %v2766_v10 = vpop.eup %2765  ;;  %v3725_v16 = vmul.f32 %v3491_v32, %v3491_v32 }
0x1a9a   :  { %v3649_v22 = vsel %vm2294_vm11, %v2290_v7, %v2309_v11  ;;  %2773 = vrcp.f32 %v3725_v16  ;;  %vm2484_vm11 = vcmask 8192  }
0x1a9b   :  { %v2317_v17 = vmul.f32 %v2315_v14, %v3649_v22  ;;  %2775 = vlog2.f32 %v3557_v12 }
0x1a9d   :  { %2319 = vrot.lane.b32.xlu2 %v2317_v17, %s3038_s7 }
0x1aa5   :  { %723 = vrot.lane.b32.xlu2 %v3250_v25, %s3041_s5 }
0x1aad   :  { %1602 = vrot.lane.b32.xlu2 %v3484_v59, %s3041_s5 }
0x1ab5   :  { %2403 = vrot.lane.b32.xlu2 %v2290_v7, %s3041_s5 }
0x1abd   :  { %742 = vrot.lane.b32.xlu2 %v2760_v39, %s3041_s5 }
0x1ac5   :  { %1328 = vrot.lane.b32.xlu2 %v2762_v9, %s3041_s5 }
0x1af7   :  { %v2320_v5 = vpop.permute.xlu2 %2319 }
0x1af8   :  { %v2322_v41 = vadd.f32 %v2320_v5, %v2290_v7 }
0x1afa   :  { %v2323_v34 = vpack.c.bf16 %v2322_v41, %v2322_v41 }
0x1afc   :  { %2631 = vmatmul.msk.bf16.vlgmr.msra.gmra.mxu1 %vm210_vm0, %v2323_v34 }
0x1aff   :  { %v724_v63 = vpop.permute.xlu2 %723 }
0x1b00   :  { %v726_v26 = vsub.f32 %v3250_v25, %v724_v63 }
0x1b02   :  { %v734_v60 = vmul.f32 %v726_v26, %v726_v26 }
0x1b07   :  { %v1603_v35 = vpop.permute.xlu2 %1602 }
0x1b08   :  { %v1605_v50 = vsub.f32 %v3484_v59, %v1603_v35  ;;  %v2768_v59 = vpop.eup %2767 }
0x1b09   :  { %v3694_v1 = vmul.f32 0.6931472, %v2768_v59  ;;  %v2770_v54 = vpop.eup %2769 }
0x1b0a   :  { %v1613_v25 = vmul.f32 %v1605_v50, %v1605_v50 }
0x1b0f   :  { %v2404_v20 = vpop.permute.xlu2 %2403 }
0x1b10   :  { %v2406_v29 = vsub.f32 %v2290_v7, %v2404_v20 }
0x1b12   :  { %v2414_v8 = vmul.f32 %v2406_v29, %v2406_v29 }
0x1b17   :  { %v743_v56 = vpop.permute.xlu2 %742 }
0x1b1f   :  { %v3737_v34 = vpop.permute.xlu2 %1328 }
0x1b79   :  { %v2336_v30 = vpop.f32.mrf.mxu1 }
0x1b7a   :  { %2341 = vrot.lane.b32.xlu0 %v2336_v30, %s3032_s23 }
0x1b81   :  { %v2338_v19 = vpop.f32.mrf.mxu1 }
0x1b82   :  { %1016 = vrot.lane.b32.xlu0 %v3357_v57, %s3041_s5 }
0x1b8a   :  { %1895 = vrot.lane.b32.xlu0 %v3550_v3, %s3041_s5 }
0x1b92   :  { %736 = vrot.lane.b32.xlu0 %v734_v60, %s3040_s13 }
0x1b9a   :  { %1035 = vrot.lane.b32.xlu0 %v2764_v27, %s3041_s5 }
0x1ba2   :  { %1615 = vrot.lane.b32.xlu0 %v1613_v25, %s3040_s13  ;;  %v2850_v25 = vld [vmem:[#allocation13] sm:$0x3f] }
0x1baa   :  { %1914 = vrot.lane.b32.xlu0 %v2766_v10, %s3041_s5 }
0x1bb2   :  { %2416 = vrot.lane.b32.xlu0 %v2414_v8, %s3040_s13 }
0x1bba   :  { %1021 = vrot.lane.b32.xlu0 %v3694_v1, %s3042_s19 }
0x1bec   :  { %v2342_v53 = vpop.permute.xlu0 %2341 }
0x1bed   :  { %v2344_v61 = vadd.f32 %v2342_v53, %v3641_v46 }
0x1bef   :  { %v2345_v6 = vmax.f32 %v2344_v61, 0.0 }
0x1bf1   :  { %v2346_v49 = vpack.c.bf16 %v2345_v6, %v2345_v6 }
0x1bf3   :  { %2348 = vrot.lane.b32.xlu1 %v2346_v49, %s3032_s23 }
0x1bf4   :  { %v1017_v7 = vpop.permute.xlu0 %1016 }
0x1bf5   :  { %v1019_v46 = vsub.f32 %v3357_v57, %v1017_v7 }
0x1bf7   :  { %v1027_v36 = vmul.f32 %v1019_v46, %v1019_v46 }
0x1bfb   :  { %1309 = vrot.lane.b32.xlu1 %v3417_v18, %s3041_s5 }
0x1bfc   :  { %v1896_v31 = vpop.permute.xlu0 %1895 }
0x1bfd   :  { %v1898_v37 = vsub.f32 %v3550_v3, %v1896_v31  ;;  %v2772_v3 = vpop.eup %2771 }
0x1bfe   :  { %v3715_v40 = vmul.f32 0.6931472, %v2772_v3  ;;  %v2774_v11 = vpop.eup %2773 }
0x1bff   :  { %v1906_v47 = vmul.f32 %v1898_v37, %v1898_v37 }
0x1c01   :  { %1908 = vrot.lane.b32.xlu2 %v1906_v47, %s3040_s13 }
0x1c03   :  { %2188 = vrot.lane.b32.xlu1 %v3613_v51, %s3041_s5 }
0x1c04   :  { %v737_v44 = vpop.permute.xlu0 %736 }
0x1c05   :  { %v739_v15 = vadd.f32 %v737_v44, %v3659_v24 }
0x1c07   :  { %v745_v21 = vmul.f32 %v743_v56, %v739_v15 }
0x1c09   :  { %2207 = vrot.lane.b32.xlu2 %v2770_v54, %s3041_s5 }
0x1c0b   :  { %1029 = vrot.lane.b32.xlu1 %v1027_v36, %s3040_s13 }
0x1c0c   :  { %v1036_v17 = vpop.permute.xlu0 %1035 }
0x1c11   :  { %728 = vrot.lane.b32.xlu2 %v3715_v40, %s3042_s19 }
0x1c14   :  { %v3742_v30 = vpop.permute.xlu0 %1615 }
0x1c19   :  { %747 = vrot.lane.b32.xlu2 %v745_v21, %s3042_s19 }
0x1c1c   :  { %v1915_v60 = vpop.permute.xlu0 %1914 }
0x1c5b   :  { %v1909_v26 = vpop.permute.xlu2 %1908 }
0x1c5c   :  { %v1911_v12 = vadd.f32 %v1909_v26, %v3687_v2  ;;  %v3761_v2 = vperm.slane %v2850_v25, 5 }
0x1c5e   :  { %v1917_v27 = vmul.f32 %v1915_v60, %v1911_v12  ;;  %v3770_v20 = vadd.f32 %v3399_v23, %v3761_v2  ;;  %v3775_v59 = vadd.f32 %v3468_v45, %v3761_v2  ;;  %v3780_v49 = vadd.f32 %v3536_v42, %v3761_v2 }
0x1c5f   :  { %v3785_v45 = vadd.f32 %v3599_v38, %v3761_v2  ;;  %v3790_v42 = vadd.f32 %v3639_v33, %v3761_v2 }
0x1c60   :  { %v938_v8 = vand.u32 2147483647, %v3770_v20  ;;  %v1231_v6 = vand.u32 2147483647, %v3775_v59  ;;  %v1524_v23 = vand.u32 2147483647, %v3780_v49  ;;  %vm936_vm15 = vcmp.ne.f32.partialorder %v3770_v20, %v3770_v20 }
0x1c61   :  { %v1817_v36 = vand.u32 2147483647, %v3785_v45  ;;  %v2110_v38 = vand.u32 2147483647, %v3790_v42  ;;  %vm1229_vm3 = vcmp.ne.f32.partialorder %v3775_v59, %v3775_v59  ;;  %vm1522_vm5 = vcmp.ne.f32.partialorder %v3780_v49, %v3780_v49 }
0x1c62   :  { %v939_v61 = vsub.f32 0.0, %v938_v8  ;;  %v1232_v7 = vsub.f32 0.0, %v1231_v6  ;;  %v1525_v47 = vsub.f32 0.0, %v1524_v23  ;;  %vm1815_vm7 = vcmp.ne.f32.partialorder %v3785_v45, %v3785_v45 }
0x1c63   :  { %v1818_v15 = vsub.f32 0.0, %v1817_v36  ;;  %vm2108_vm9 = vcmp.ne.f32.partialorder %v3790_v42, %v3790_v42 }
0x1c64   :  { %v1233_v37 = vmul.f32 1.442695, %v1232_v7  ;;  %v1526_v3 = vmul.f32 1.442695, %v1525_v47 }
0x1c65   :  { %v2349_v52 = vpop.permute.xlu1 %2348 }
0x1c66   :  { %2632 = vmatmul.msk.bf16.vlgmr.msra.gmra.mxu2 %vm418_vm8, %v2349_v52  ;;  %v1819_v52 = vmul.f32 1.442695, %v1818_v15 }
0x1c6d   :  { %v1310_v57 = vpop.permute.xlu1 %1309 }
0x1c6e   :  { %v1312_v55 = vsub.f32 %v3417_v18, %v1310_v57  ;;  %v3734_v18 = vmul.f32 %v3649_v22, %v3649_v22 }
0x1c70   :  { %v1320_v48 = vmul.f32 %v1312_v55, %v1312_v55  ;;  %2777 = vrcp.f32 %v3734_v18 }
0x1c71   :  { %2779 = vlog2.f32 %v3424_v58 }
0x1c72   :  { %1322 = vrot.lane.b32.xlu1 %v1320_v48, %s3040_s13  ;;  %2781 = vlog2.f32 %v3491_v32  ;;  %v3765_v32 = vadd.f32 %v3346_v43, %v3761_v2  ;;  %v940_v43 = vmul.f32 1.442695, %v939_v61 }
0x1c74   :  { %v645_v10 = vand.u32 2147483647, %v3765_v32  ;;  %vm643_vm14 = vcmp.ne.f32.partialorder %v3765_v32, %v3765_v32 }
0x1c75   :  { %v2189_v14 = vpop.permute.xlu1 %2188 }
0x1c76   :  { %v2191_v24 = vsub.f32 %v3613_v51, %v2189_v14  ;;  %v2776_v51 = vpop.eup %2775  ;;  %v646_v29 = vsub.f32 0.0, %v645_v10 }
0x1c77   :  { %v3745_v19 = vmul.f32 0.6931472, %v2776_v51  ;;  %v2778_v63 = vpop.eup %2777 }
0x1c78   :  { %v2199_v5 = vmul.f32 %v2191_v24, %v2191_v24  ;;  %v647_v53 = vmul.f32 1.442695, %v646_v29 }
0x1c7a   :  { %1621 = vrot.lane.b32.xlu1 %v2774_v11, %s3041_s5  ;;  %2783 = vpow2.f32 %v647_v53  ;;  %v2111_v11 = vsub.f32 0.0, %v2110_v38 }
0x1c7b   :  { %2785 = vpow2.f32 %v940_v43 }
0x1c7c   :  { %2787 = vpow2.f32 %v1233_v37 }
0x1c7d   :  { %v1030_v39 = vpop.permute.xlu1 %1029 }
0x1c7e   :  { %v1032_v9 = vadd.f32 %v1030_v39, %v3679_v62  ;;  %v2780_v62 = vpop.eup %2779 }
0x1c7f   :  { %v3752_v35 = vmul.f32 0.6931472, %v2780_v62  ;;  %v2782_v58 = vpop.eup %2781 }
0x1c80   :  { %v1038_v41 = vmul.f32 %v1036_v17, %v1032_v9  ;;  %v3757_v50 = vmul.f32 0.6931472, %v2782_v58  ;;  %v2784_v31 = vpop.eup %2783  ;;  %v642_v58 = vmax.f32 %v3765_v32, 0.0 }
0x1c81   :  { %v649_v46 = vadd.f32 1.0, %v2784_v31  ;;  %v2786_v54 = vpop.eup %2785  ;;  %v652_v21 = vmul.f32 -0.5, %v2784_v31  ;;  %v655_v17 = vand.u32 2147483647, %v2784_v31 }
0x1c82   :  { %2201 = vrot.lane.b32.xlu1 %v2199_v5, %s3040_s13  ;;  %1040 = vrot.lane.b32.xlu0 %v1038_v41, %s3042_s19  ;;  %v942_v44 = vadd.f32 1.0, %v2786_v54  ;;  %v3792_v56 = vpop.eup %2787  ;;  %v945_v14 = vmul.f32 -0.5, %v2786_v54  ;;  %v948_v26 = vand.u32 2147483647, %v2786_v54 }
0x1c83   :  { %2789 = vlog2.f32 %v649_v46  ;;  %v1235_v55 = vadd.f32 1.0, %v3792_v56  ;;  %v653_v48 = vadd.f32 1.0, %v652_v21  ;;  %vm656_vm12 = vcmp.lt.f32.partialorder %v655_v17, 0.0004427343 }
0x1c84   :  { %2791 = vpow2.f32 %v1526_v3  ;;  %v946_v51 = vadd.f32 1.0, %v945_v14  ;;  %v1238_v25 = vmul.f32 -0.5, %v3792_v56  ;;  %vm3808_vm13 = vcmp.lt.f32.partialorder %v948_v26, 0.0004427343 }
0x1c85   :  { %2793 = vlog2.f32 %v942_v44  ;;  %v654_v41 = vmul.f32 %v2784_v31, %v653_v48  ;;  %v1241_v46 = vand.u32 2147483647, %v3792_v56 }
0x1c86   :  { %2795 = vpow2.f32 %v1819_v52  ;;  %v947_v29 = vmul.f32 %v2786_v54, %v946_v51  ;;  %v1239_v31 = vadd.f32 1.0, %v1238_v25 }
0x1c87   :  { %2797 = vlog2.f32 %v1235_v55  ;;  %vm1242_vm2 = vcmp.lt.f32.partialorder %v1241_v46, 0.0004427343 }
0x1c88   :  { %2799 = vlog2.f32 %v3620_v0  ;;  %v1240_v21 = vmul.f32 %v3792_v56, %v1239_v31  ;;  %v1228_v56 = vmax.f32 %v3775_v59, 0.0 }
0x1c89   :  { %v2790_v57 = vpop.eup %2789 }
0x1c8a   :  { %2422 = vrot.lane.b32.xlu1 %v2778_v63, %s3041_s5  ;;  %1900 = vrot.lane.b32.xlu0 %v3745_v19, %s3042_s19  ;;  %v3796_v33 = vpop.eup %2791  ;;  %v651_v24 = vmul.f32 0.6931472, %v2790_v57  ;;  %v2112_v63 = vmul.f32 1.442695, %v2111_v11 }
0x1c8b   :  { %v2794_v9 = vpop.eup %2793  ;;  %v1528_v12 = vadd.f32 1.0, %v3796_v33  ;;  %v1534_v11 = vand.u32 2147483647, %v3796_v33 }
0x1c8c   :  { %v657_v60 = vsel %vm656_vm12, %v654_v41, %v651_v24  ;;  %2801 = vpow2.f32 %v2112_v63 }
0x1c8d   :  { %v658_v53 = vadd.f32 %v657_v60, %v642_v58  ;;  %2803 = vlog2.f32 %v1528_v12  ;;  %v2208_v12 = vpop.permute.xlu2 %2207  ;;  %v2417_v58 = vpop.permute.xlu0 %2416 }
0x1c8e   :  { %2805 = vlog2.f32 %v3649_v22 }
0x1c8f   :  { %v659_v54 = vsel %vm643_vm14, %v3765_v32, %v658_v53 }
0x1c90   :  { %v755_v57 = vmul.f32 %v659_v54, %v659_v54 }
0x1c92   :  { %1314 = vrot.lane.b32.xlu1 %v3752_v35, %s3042_s19  ;;  %1919 = vrot.lane.b32.xlu0 %v1917_v27, %s3042_s19  ;;  %v944_v27 = vmul.f32 0.6931472, %v2794_v9 }
0x1c94   :  { %v950_v43 = vsel %vm3808_vm13, %v947_v29, %v944_v27 }
0x1c9a   :  { %1607 = vrot.lane.b32.xlu1 %v3757_v50, %s3042_s19 }
0x1ce4   :  { %v1323_v39 = vpop.permute.xlu1 %1322 }
0x1ce5   :  { %v1325_v5 = vadd.f32 %v1323_v39, %v3665_v28  ;;  %v3805_v28 = vpop.eup %2795 }
0x1ce6   :  { %v2798_v8 = vpop.eup %2797  ;;  %v1821_v47 = vadd.f32 1.0, %v3805_v28  ;;  %v1824_v9 = vmul.f32 -0.5, %v3805_v28 }
0x1ce7   :  { %v1331_v62 = vmul.f32 %v3737_v34, %v1325_v5  ;;  %v1618_v34 = vadd.f32 %v3742_v30, %v3725_v16  ;;  %v2800_v6 = vpop.eup %2799  ;;  %v1531_v16 = vmul.f32 -0.5, %v3796_v33  ;;  %v1237_v22 = vmul.f32 0.6931472, %v2798_v8 }
0x1ce8   :  { %v3825_v3 = vmul.f32 0.6931472, %v2800_v6  ;;  %v3827_v44 = vpop.eup %2801  ;;  %2807 = vlog2.f32 %v1821_v47  ;;  %v1825_v25 = vadd.f32 1.0, %v1824_v9 }
0x1ce9   :  { %v2362_v10 = vpop.f32.mrf.mxu2  ;;  %1333 = vrot.lane.b32.xlu2 %v1331_v62, %s3042_s19  ;;  %v2804_v15 = vpop.eup %2803  ;;  %v1532_v55 = vadd.f32 1.0, %v1531_v16  ;;  %v1243_v14 = vsel %vm1242_vm2, %v1240_v21, %v1237_v22  ;;  %v2114_v17 = vadd.f32 1.0, %v3827_v44  ;;  %2809 = vlog2.f32 %v659_v54 }
0x1cea   :  { %v2363_v0 = vadd.f32 %v2362_v10, %v3314_v13  ;;  %v935_v13 = vmax.f32 %v3770_v20, 0.0  ;;  %v2806_v52 = vpop.eup %2805  ;;  %v1530_v24 = vmul.f32 0.6931472, %v2804_v15  ;;  %2811 = vrcp.f32 %v755_v57 }
0x1ceb   :  { %v3841_v41 = vmul.f32 0.6931472, %v2806_v52  ;;  %v1244_v63 = vadd.f32 %v1243_v14, %v1228_v56  ;;  %v1533_v26 = vmul.f32 %v3796_v33, %v1532_v55  ;;  %2813 = vlog2.f32 %v2114_v17 }
0x1cec   :  { %v2366_v7 = vmax.f32 %v2363_v0, 0.0  ;;  %v1622_v23 = vpop.permute.xlu1 %1621  ;;  %v951_v36 = vadd.f32 %v950_v43, %v935_v13  ;;  %v1521_v33 = vmax.f32 %v3780_v49, 0.0  ;;  %v1827_v10 = vand.u32 2147483647, %v3805_v28 }
0x1ced   :  { %v1624_v37 = vmul.f32 %v1622_v23, %v1618_v34  ;;  %v1245_v29 = vsel %vm1229_vm3, %v3775_v59, %v1244_v63  ;;  %v2117_v0 = vmul.f32 -0.5, %v3827_v44  ;;  %v2419_v34 = vadd.f32 %v2417_v58, %v3734_v18 }
0x1cee   :  { %v2367_v30 = vpack.c.bf16 %v2366_v7, %v2366_v7  ;;  %v952_v48 = vsel %vm936_vm15, %v3770_v20, %v951_v36  ;;  %v2808_v62 = vpop.eup %2807  ;;  %v1826_v7 = vmul.f32 %v3805_v28, %v1825_v25  ;;  %v1341_v13 = vmul.f32 %v1245_v29, %v1245_v29 }
0x1cef   :  { %1626 = vrot.lane.b32.xlu1 %v1624_v37, %s3042_s19  ;;  %v1048_v51 = vmul.f32 %v952_v48, %v952_v48  ;;  %2815 = vlog2.f32 %v952_v48  ;;  %v1823_v8 = vmul.f32 0.6931472, %v2808_v62  ;;  %v2810_v53 = vpop.eup %2809  ;;  %vm3861_vm4 = vcmp.lt.f32.partialorder %v1827_v10, 0.0004427343 }
0x1cf0   :  { %2633 = vmatmul.msk.bf16.vlgmr.msra.gmra.mxu3 %vm418_vm8, %v2367_v30  ;;  %vm3844_vm8 = vcmp.lt.f32.partialorder %v1534_v11, 0.0004427343  ;;  %v2812_v6 = vpop.eup %2811  ;;  %v2118_v46 = vadd.f32 1.0, %v2117_v0  ;;  %v1814_v30 = vmax.f32 %v3785_v45, 0.0  ;;  %v2120_v28 = vand.u32 2147483647, %v3827_v44  ;;  %v729_v0 = vpop.permute.xlu2 %728 }
0x1cf1   :  { %v2364_v38 = vpop.f32.mrf.mxu2  ;;  %2193 = vrot.lane.b32.xlu2 %v3825_v3, %s3042_s19  ;;  %2817 = vrcp.f32 %v1048_v51  ;;  %v2814_v23 = vpop.eup %2813  ;;  %v1829_v16 = vsel %vm3861_vm4, %v1826_v7, %v1823_v8  ;;  %v763_v22 = vmul.f32 0.6931472, %v2810_v53  ;;  %v2107_v55 = vmax.f32 %v3790_v42, 0.0 }
0x1cf2   :  { %v2116_v36 = vmul.f32 0.6931472, %v2814_v23  ;;  %2819 = vlog2.f32 %v1245_v29  ;;  %v1830_v21 = vadd.f32 %v1829_v16, %v1814_v30  ;;  %v2119_v38 = vmul.f32 %v3827_v44, %v2118_v46  ;;  %v1022_v53 = vpop.permute.xlu0 %1021 }
0x1cf3   :  { %2821 = vrcp.f32 %v1341_v13  ;;  %vm2121_vm6 = vcmp.lt.f32.partialorder %v2120_v28, 0.0004427343  ;;  %v764_v48 = vmul.f32 2.0, %v763_v22  ;;  %v1024_v7 = vsub.f32 %v3694_v1, %v1022_v53  ;;  %v1067_v53 = vld [vmem:[#allocation3 + $0x18] sm:$0xff] }
0x1cf4   :  { %v2202_v39 = vpop.permute.xlu1 %2201  ;;  %v2122_v57 = vsel %vm2121_vm6, %v2119_v38, %v2116_v36  ;;  %v1831_v11 = vsel %vm1815_vm7, %v3785_v45, %v1830_v21  ;;  %v731_v13 = vsub.f32 %v3715_v40, %v729_v0 }
0x1cf5   :  { %v2204_v5 = vadd.f32 %v2202_v39, %v3705_v4  ;;  %v1536_v4 = vsel %vm3844_vm8, %v1533_v26, %v1530_v24  ;;  %v2816_v47 = vpop.eup %2815  ;;  %v2123_v24 = vadd.f32 %v2122_v57, %v2107_v55  ;;  %v1927_v51 = vmul.f32 %v1831_v11, %v1831_v11 }
0x1cf6   :  { %v1537_v61 = vadd.f32 %v1536_v4, %v1521_v33  ;;  %v1056_v15 = vmul.f32 0.6931472, %v2816_v47  ;;  %v1025_v47 = vmul.f32 2.0, %v1024_v7  ;;  %v732_v16 = vmul.f32 2.0, %v731_v13  ;;  %v1360_v7 = vld [vmem:[#allocation3 + $0x20] sm:$0xff] }
0x1cf7   :  { %v2210_v27 = vmul.f32 %v2208_v12, %v2204_v5  ;;  %2408 = vrot.lane.b32.xlu1 %v3841_v41, %s3042_s19  ;;  %v2818_v54 = vpop.eup %2817  ;;  %v2124_v9 = vsel %vm2108_vm9, %v3790_v42, %v2123_v24 }
0x1cf8   :  { %v1538_v18 = vsel %vm1522_vm5, %v3780_v49, %v1537_v61  ;;  %v1057_v14 = vmul.f32 2.0, %v1056_v15  ;;  %v2820_v17 = vpop.eup %2819  ;;  %v2220_v62 = vmul.f32 %v2124_v9, %v2124_v9  ;;  %v748_v8 = vpop.permute.xlu2 %747 }
0x1cf9   :  { %2212 = vrot.lane.b32.xlu2 %v2210_v27, %s3042_s19  ;;  %2823 = vlog2.f32 %v1538_v18  ;;  %v1634_v52 = vmul.f32 %v1538_v18, %v1538_v18  ;;  %v2822_v56 = vpop.eup %2821  ;;  %v1349_v39 = vmul.f32 0.6931472, %v2820_v17 }
0x1cfb   :  { %2825 = vrcp.f32 %v1634_v52  ;;  %v1350_v26 = vmul.f32 2.0, %v1349_v39 }
0x1cfc   :  { %v2423_v43 = vpop.permute.xlu1 %2422  ;;  %2827 = vlog2.f32 %v1831_v11 }
0x1cfd   :  { %v2425_v31 = vmul.f32 %v2423_v43, %v2419_v34  ;;  %2829 = vrcp.f32 %v1927_v51  ;;  %v396_v51 = vld [vmem:[#allocation3 + $0x8] sm:$0xff] }
0x1cfe   :  { %2831 = vlog2.f32 %v2124_v9 }
0x1cff   :  { %2427 = vrot.lane.b32.xlu0 %v2425_v31, %s3042_s19  ;;  %758 = vrot.lane.b32.xlu1 %v2812_v6, %s3041_s5  ;;  %v2824_v44 = vpop.eup %2823  ;;  %2833 = vrcp.f32 %v2220_v62  ;;  %v1041_v6 = vpop.permute.xlu0 %1040 }
0x1d00   :  { %v1642_v5 = vmul.f32 0.6931472, %v2824_v44  ;;  %v1043_v18 = vadd.f32 %v1041_v6, %v1025_v47 }
0x1d01   :  { %1051 = vrot.lane.b32.xlu2 %v2818_v54, %s3041_s5  ;;  %v2826_v63 = vpop.eup %2825  ;;  %v750_v54 = vadd.f32 %v748_v8, %v732_v16  ;;  %v1632_v16 = vsub.f32 %v1360_v7, %v3780_v49 }
0x1d02   :  { %v2828_v12 = vpop.eup %2827  ;;  %v1643_v60 = vmul.f32 2.0, %v1642_v5  ;;  %v2587_v15 = vadd.f32 -1.0, %v1043_v18  ;;  %v774_v5 = vld [vmem:[#allocation3 + $0x10] sm:$0xff] }
0x1d03   :  { %v1935_v27 = vmul.f32 0.6931472, %v2828_v12  ;;  %v2830_v4 = vpop.eup %2829  ;;  %v2577_v52 = vadd.f32 -1.0, %v750_v54  ;;  %v1633_v54 = vmul.f32 %v1632_v16, %v1632_v16 }
0x1d04   :  { %v2832_v25 = vpop.eup %2831  ;;  %v1315_v61 = vpop.permute.xlu1 %1314 }
0x1d05   :  { %v1936_v58 = vmul.f32 2.0, %v1935_v27  ;;  %v2834_v33 = vpop.eup %2833  ;;  %v2228_v10 = vmul.f32 0.6931472, %v2832_v25  ;;  %v1317_v31 = vsub.f32 %v3752_v35, %v1315_v61  ;;  %v1045_v35 = vadd.f32 %v2587_v15, %v2577_v52  ;;  %v1653_v15 = vld [vmem:[#allocation3 + $0x28] sm:$0xff] }
0x1d07   :  { %766 = vrot.lane.b32.xlu0 %v764_v48, %s3041_s5  ;;  %1059 = vrot.lane.b32.xlu1 %v1057_v14, %s3041_s5  ;;  %v2229_v29 = vmul.f32 2.0, %v2228_v10  ;;  %v1901_v37 = vpop.permute.xlu0 %1900  ;;  %v1318_v30 = vmul.f32 2.0, %v1317_v31 }
0x1d08   :  { %v1903_v21 = vsub.f32 %v3745_v19, %v1901_v37 }
0x1d09   :  { %1344 = vrot.lane.b32.xlu2 %v2822_v56, %s3041_s5 }
0x1d0a   :  { %v1904_v55 = vmul.f32 2.0, %v1903_v21 }
0x1d0c   :  { %v1608_v43 = vpop.permute.xlu1 %1607 }
0x1d0d   :  { %v1610_v46 = vsub.f32 %v3757_v50, %v1608_v43 }
0x1d0f   :  { %1637 = vrot.lane.b32.xlu1 %v2826_v63, %s3041_s5  ;;  %1352 = vrot.lane.b32.xlu0 %v1350_v26, %s3041_s5  ;;  %v1611_v36 = vmul.f32 2.0, %v1610_v46  ;;  %v1920_v57 = vpop.permute.xlu0 %1919 }
0x1d10   :  { %v1922_v11 = vadd.f32 %v1920_v57, %v1904_v55  ;;  %v1925_v55 = vsub.f32 %v1653_v15, %v3785_v45 }
0x1d11   :  { %1645 = vrot.lane.b32.xlu2 %v1643_v60, %s3041_s5 }
0x1d12   :  { %v2617_v39 = vadd.f32 -1.0, %v1922_v11 }
0x1d17   :  { %1938 = vrot.lane.b32.xlu1 %v1936_v58, %s3041_s5  ;;  %1930 = vrot.lane.b32.xlu0 %v2830_v4, %s3041_s5  ;;  %v753_v4 = vsub.f32 %v396_v51, %v3765_v32 }
0x1d19   :  { %2223 = vrot.lane.b32.xlu2 %v2834_v33, %s3041_s5  ;;  %v754_v0 = vmul.f32 %v753_v4, %v753_v4 }
0x1d1f   :  { %2231 = vrot.lane.b32.xlu0 %v2229_v29, %s3041_s5 }
0x1d43   :  { %v1334_v34 = vpop.permute.xlu2 %1333 }
0x1d44   :  { %v1336_v22 = vadd.f32 %v1334_v34, %v1318_v30 }
0x1d46   :  { %v2597_v40 = vadd.f32 -1.0, %v1336_v22 }
0x1d48   :  { %v1338_v17 = vadd.f32 %v2597_v40, %v1045_v35 }
0x1d4b   :  { %v2194_v23 = vpop.permute.xlu2 %2193 }
0x1d4c   :  { %v2196_v48 = vsub.f32 %v3825_v3, %v2194_v23  ;;  %v1046_v3 = vsub.f32 %v774_v5, %v3770_v20  ;;  %v1339_v23 = vsub.f32 %v1067_v53, %v3775_v59 }
0x1d4e   :  { %v2197_v56 = vmul.f32 2.0, %v2196_v48  ;;  %v1047_v10 = vmul.f32 %v1046_v3, %v1046_v3  ;;  %v1340_v18 = vmul.f32 %v1339_v23, %v1339_v23 }
0x1d53   :  { %v2213_v1 = vpop.permute.xlu2 %2212 }
0x1d54   :  { %v2215_v9 = vadd.f32 %v2213_v1, %v2197_v56 }
0x1d56   :  { %v2627_v60 = vadd.f32 -1.0, %v2215_v9 }
0x1d5b   :  { %v1052_v19 = vpop.permute.xlu2 %1051 }
0x1d5c   :  { %v1054_v61 = vmul.f32 %v1052_v19, %v1047_v10 }
0x1d61   :  { %v1627_v28 = vpop.permute.xlu1 %1626 }
0x1d62   :  { %v1629_v38 = vadd.f32 %v1627_v28, %v1611_v36 }
0x1d63   :  { %v1345_v34 = vpop.permute.xlu2 %1344 }
0x1d64   :  { %v2607_v50 = vadd.f32 -1.0, %v1629_v38  ;;  %v1347_v28 = vmul.f32 %v1345_v34, %v1340_v18 }
0x1d66   :  { %v1631_v24 = vadd.f32 %v2607_v50, %v1338_v17  ;;  %v1946_v50 = vld [vmem:[#allocation3 + $0x30] sm:$0xff]  ;;  %v1926_v17 = vmul.f32 %v1925_v55, %v1925_v55 }
0x1d68   :  { %v1924_v63 = vadd.f32 %v2617_v39, %v1631_v24 }
0x1d69   :  { %v2409_v14 = vpop.permute.xlu1 %2408 }
0x1d6a   :  { %v2411_v44 = vsub.f32 %v3841_v41, %v2409_v14  ;;  %v2217_v25 = vadd.f32 %v2627_v60, %v1924_v63 }
0x1d6b   :  { %v1646_v59 = vpop.permute.xlu2 %1645 }
0x1d6c   :  { %v2412_v26 = vmul.f32 2.0, %v2411_v44  ;;  %v2218_v44 = vsub.f32 %v1946_v50, %v3790_v42 }
0x1d71   :  { %v2428_v12 = vpop.permute.xlu0 %2427  ;;  %v759_v62 = vpop.permute.xlu1 %758 }
0x1d72   :  { %v2430_v27 = vadd.f32 %v2428_v12, %v2412_v26  ;;  %v761_v6 = vmul.f32 %v759_v62, %v754_v0  ;;  %v2219_v62 = vmul.f32 %v2218_v44, %v2218_v44 }
0x1d73   :  { %v2380_v58 = vpop.f32.mrf.mxu3  ;;  %v2224_v45 = vpop.permute.xlu2 %2223 }
0x1d74   :  { %v2634_v33 = vadd.f32 -1.0, %v2430_v27  ;;  %v3903_v41 = vadd.f32 %v2380_v58, %v3761_v2  ;;  %v2226_v27 = vmul.f32 %v2224_v45, %v2219_v62 }
0x1d76   :  { %v2432_v29 = vadd.f32 %v2634_v33, %v2217_v25  ;;  %v2387_v8 = vand.u32 2147483647, %v3903_v41  ;;  %v2384_v26 = vmax.f32 %v3903_v41, 0.0  ;;  %vm2385_vm1 = vcmp.ne.f32.partialorder %v3903_v41, %v3903_v41 }
0x1d78   :  { %v2388_v43 = vsub.f32 0.0, %v2387_v8  ;;  %2453 = vrot.lane.b32.xlu0 %v2432_v29, %s3043_s20 }
0x1d79   :  { %v767_v20 = vpop.permute.xlu0 %766  ;;  %v1060_v32 = vpop.permute.xlu1 %1059 }
0x1d7a   :  { %v2389_v13 = vmul.f32 1.442695, %v2388_v43  ;;  %v769_v2 = vadd.f32 %v767_v20, %v761_v6  ;;  %v1062_v31 = vadd.f32 %v1060_v32, %v1054_v61  ;;  %v2238_v43 = vld [vmem:[#allocation3 + $0x38] sm:$0xff] }
0x1d7b   :  { %v2382_v37 = vpop.f32.mrf.mxu3  ;;  %v2433_v20 = vsub.f32 %v2238_v43, %v3903_v41 }
0x1d7c   :  { %2835 = vpow2.f32 %v2389_v13  ;;  %v770_v47 = vadd.f32 1.837877, %v769_v2  ;;  %v1063_v46 = vadd.f32 1.837877, %v1062_v31 }
0x1d7d   :  { %v2434_v32 = vmul.f32 %v2433_v20, %v2433_v20 }
0x1d7e   :  { %v1064_v30 = vadd.f32 %v1063_v46, %v770_v47 }
0x1d81   :  { %v1638_v36 = vpop.permute.xlu1 %1637  ;;  %v1353_v22 = vpop.permute.xlu0 %1352 }
0x1d82   :  { %v2836_v21 = vpop.eup %2835  ;;  %v1640_v1 = vmul.f32 %v1638_v36, %v1633_v54  ;;  %v1355_v38 = vadd.f32 %v1353_v22, %v1347_v28 }
0x1d83   :  { %v2391_v52 = vadd.f32 1.0, %v2836_v21  ;;  %v2394_v40 = vmul.f32 -0.5, %v2836_v21  ;;  %v2397_v56 = vand.u32 2147483647, %v2836_v21 }
0x1d84   :  { %v1648_v57 = vadd.f32 %v1646_v59, %v1640_v1  ;;  %v1356_v35 = vadd.f32 1.837877, %v1355_v38 }
0x1d85   :  { %2837 = vlog2.f32 %v2391_v52  ;;  %v2395_v14 = vadd.f32 1.0, %v2394_v40  ;;  %vm2398_vm10 = vcmp.lt.f32.partialorder %v2397_v56, 0.0004427343  ;;  %v2480_v52 = vlaneseq }
0x1d86   :  { %v1649_v48 = vadd.f32 1.837877, %v1648_v57  ;;  %v1357_v49 = vadd.f32 %v1356_v35, %v1064_v30 }
0x1d87   :  { %v2396_v51 = vmul.f32 %v2836_v21, %v2395_v14  ;;  %v2481_v40 = vand.u32 127, %v2480_v52 }
0x1d88   :  { %v1650_v11 = vadd.f32 %v1649_v48, %v1357_v49 }
0x1d89   :  { %v1931_v24 = vpop.permute.xlu0 %1930  ;;  %v1939_v19 = vpop.permute.xlu1 %1938 }
0x1d8a   :  { %v1933_v39 = vmul.f32 %v1931_v24, %v1926_v17 }
0x1d8b   :  { %v2838_v9 = vpop.eup %2837 }
0x1d8c   :  { %v2393_v5 = vmul.f32 0.6931472, %v2838_v9  ;;  %v1941_v63 = vadd.f32 %v1939_v19, %v1933_v39 }
0x1d8e   :  { %v2399_v12 = vsel %vm2398_vm10, %v2396_v51, %v2393_v5  ;;  %v1942_v60 = vadd.f32 1.837877, %v1941_v63 }
0x1d8f   :  { %v2400_v3 = vadd.f32 %v2399_v12, %v2384_v26 }
0x1d90   :  { %v1943_v4 = vadd.f32 %v1942_v60, %v1650_v11 }
0x1d91   :  { %v2401_v42 = vsel %vm2385_vm1, %v3903_v41, %v2400_v3  ;;  %v2232_v58 = vpop.permute.xlu0 %2231 }
0x1d92   :  { %v2435_v25 = vmul.f32 %v2401_v42, %v2401_v42  ;;  %v2234_v33 = vadd.f32 %v2232_v58, %v2226_v27  ;;  %2839 = vlog2.f32 %v2401_v42 }
0x1d94   :  { %2841 = vrcp.f32 %v2435_v25  ;;  %v2235_v10 = vadd.f32 1.837877, %v2234_v33 }
0x1d96   :  { %v2236_v29 = vadd.f32 %v2235_v10, %v1943_v4 }
0x1d98   :  { %v2840_v0 = vpop.eup %2839 }
0x1d99   :  { %v2443_v8 = vmul.f32 0.6931472, %v2840_v0 }
0x1d9a   :  { %v2842_v53 = vpop.eup %2841 }
0x1d9b   :  { %2438 = vrot.lane.b32.xlu1 %v2842_v53, %s3041_s5  ;;  %v2444_v61 = vmul.f32 2.0, %v2443_v8 }
0x1d9d   :  { %2446 = vrot.lane.b32.xlu2 %v2444_v61, %s3041_s5 }
0x1dea   :  { %v2454_v34 = vpop.permute.xlu0 %2453 }
0x1deb   :  { %v2456_v6 = vsel %vm210_vm0, %v2454_v34, 0.0 }
0x1dec   :  { %2457 = vadd.xlane.f32.xlu1 %v2456_v6 }
0x1df7   :  { %v2447_v13 = vpop.permute.xlu2 %2446 }
0x1e0d   :  { %v2439_v7 = vpop.permute.xlu1 %2438 }
0x1e0e   :  { %v2441_v23 = vmul.f32 %v2439_v7, %v2434_v32 }
0x1e10   :  { %v2449_v2 = vadd.f32 %v2447_v13, %v2441_v23 }
0x1e12   :  { %v2450_v31 = vadd.f32 1.837877, %v2449_v2 }
0x1e14   :  { %v2451_v37 = vadd.f32 %v2450_v31, %v2236_v29 }
0x1e16   :  { %v2468_v47 = vsel %vm210_vm0, %v2451_v37, 0.0  ;;  %vm2482_vm0 = vcmp.eq.s32.totalorder %v2481_v40, 0 }
0x1e17   :  { %2469 = vadd.xlane.f32.xlu2 %v2468_v47 }
0x1e5f   :  { %v2458_v46 = vpop.xlane.xlu1 %2457 }
0x1e60   :  { %v2459_v16 = vrot.slane %v2458_v46, 4 }
0x1e62   :  { %v2460_v18 = vadd.f32 %v2459_v16, %v2458_v46 }
0x1e64   :  { %v2461_v30 = vrot.slane %v2460_v18, 2 }
0x1e66   :  { %v2462_v28 = vadd.f32 %v2461_v30, %v2460_v18 }
0x1e68   :  { %v2463_v54 = vrot.slane %v2462_v28, 1 }
0x1e6a   :  { %v2464_v36 = vadd.f32 %v2463_v54, %v2462_v28 }
0x1e6c   :  { %2650 = vpush %v2464_v36 }
0x1e8a   :  { %v2470_v22 = vpop.xlane.xlu2 %2469 }
0x1e8b   :  { %v2471_v41 = vrot.slane %v2470_v22, 4 }
0x1e8d   :  { %v2472_v15 = vadd.f32 %v2471_v41, %v2470_v22 }
0x1e8f   :  { %v2473_v21 = vrot.slane %v2472_v15, 2 }
0x1e91   :  { %v2474_v1 = vadd.f32 %v2473_v21, %v2472_v15 }
0x1e93   :  { %v2475_v38 = vrot.slane %v2474_v1, 1 }
0x1e95   :  { %v2476_v59 = vadd.f32 %v2475_v38, %v2474_v1 }
0x1e97   :  { %2652 = vpush %v2476_v59 }
0x1e9d   :  { %s2651_s21 = spop %2650 }
0x1e9e   :  { %v2466_v57 = vstv %s2651_s21 }
0x1e9f   :  { %v2467_v55 = vmul.f32 0.5, %v2466_v57 }
0x1ec8   :  { %s2653_s22 = spop %2652 }
0x1ec9   :  { %v2478_v35 = vstv %s2653_s22 }
0x1eca   :  { %v2479_v48 = vmul.f32 0.5, %v2478_v35 }
0x1ecc   :  { %v2483_v49 = vsel %vm2482_vm0, %v2467_v55, %v2479_v48 }
0x1ecd   :  { %2485 = vst.msk [vmem:[%s3930_s8] sm:$0x1] %vm2484_vm11, %v2483_v49 }
0x1ece   :  { %2490 = vsyncpa [#allocation4], 1 }
0x1ecf   :  { %2491 = vsyncpa [#allocation6], 1 }
0x1ed0   :  { %2492 = vsyncpa [#allocation9], 1 }
0x1ed1   :  { %2493 = vsyncpa [#allocation12], 1 }

</bundles_post_ra>
